<compile_context>
chip_gen: v7x
topology: tpu7x:2x2x1
jax: 0.10.0
libtpu: 0.0.40
codegen_flags: <defaults>
</compile_context>

<pallas_src>
import math

import jax
import jax.numpy as jnp
from jax import lax
from jax.experimental import pallas as pl
from jax.experimental.pallas import tpu as pltpu

D_MODEL = 3          # module default
NHEAD = 1            # module default (single head -> head_dim == d_model)
NUM_LAYERS = 10      # module default
DIM_FF = 512         # ScaledTransformerEncoderLayer default dim_feedforward
FF_CHUNK = 128       # DIM_FF strip width (one lane tile)
SCALING = 0.1        # scaling_factor passed by MNISTTransformer
NEG_INF = -1e9
TARGET_TOKENS = 128  # tokens per grid step (softmax-bound; 128 also fills v5e MXU M dim)


def _encoder_stack_kernel(x_ref, bias_ref, blockdiag_ref,
                          wq_ref, bq_ref, wk_ref, bk_ref, wv_ref, bv_ref,
                          wo_ref, bo_ref, w1_ref, b1_ref, w2t_ref, b2_ref,
                          o_ref, abias_ref):
    """One batch tile: x (T, d_model) = batch_tile flattened sequences."""
    scale = 1.0 / math.sqrt(D_MODEL // NHEAD)   # nhead=1 -> head_dim == d_model

    # Combined additive attention bias: block-diagonal (token pairs from different
    # sequences in the flattened tile are masked) + per-key padding bias.  Written
    # once per grid step into VMEM scratch, read per layer -> not held in vregs
    # across the fully unrolled 10-layer body.
    abias_ref[...] = blockdiag_ref[0] + bias_ref[0]

    def layer(_, x):
        # --- self-attention (separate, lane-aligned q/k/v projections) ---
        q = jnp.dot(x, wq_ref[...], preferred_element_type=jnp.float32) + bq_ref[...]
        k = jnp.dot(x, wk_ref[...], preferred_element_type=jnp.float32) + bk_ref[...]
        s = lax.dot_general(q, k, (((1,), (1,)), ((), ())),
                            preferred_element_type=jnp.float32) * scale + abias_ref[...]
        s = s - jnp.max(s, axis=-1, keepdims=True)
        p = jnp.exp(s)
        p = p * pl.reciprocal(jnp.sum(p, axis=-1, keepdims=True), approx=True)
        # v is computed after the softmax to keep it out of the peak-pressure region.
        v = jnp.dot(x, wv_ref[...], preferred_element_type=jnp.float32) + bv_ref[...]
        ctx = jnp.dot(p, v, preferred_element_type=jnp.float32)
        attn_out = jnp.dot(ctx, wo_ref[...], preferred_element_type=jnp.float32) + bo_ref[...]
        x = x + SCALING * attn_out

        # --- feed-forward, chunked over DIM_FF (ReLU; norms/dropouts are Identity) ---
        # Each 128-wide strip of h is produced and immediately contracted with the
        # matching strip of w2t (stored transposed: (d_model, DIM_FF), lane axis = FF).
        ff = jnp.zeros_like(x)
        for c0 in range(0, DIM_FF, FF_CHUNK):
            h_c = jnp.maximum(
                jnp.dot(x, w1_ref[:, c0:c0 + FF_CHUNK],
                        preferred_element_type=jnp.float32)
                + b1_ref[:, c0:c0 + FF_CHUNK], 0.0)
            ff = ff + lax.dot_general(h_c, w2t_ref[:, c0:c0 + FF_CHUNK],
                                      (((1,), (1,)), ((), ())),
                                      preferred_element_type=jnp.float32)
        return x + SCALING * (ff + b2_ref[...])

    o_ref[...] = lax.fori_loop(0, NUM_LAYERS, layer, x_ref[...], unroll=True)


def mnist_transformer_forward(tokens, lengths, params, *, batch_tile=None):
    """tokens: (B, L, 2) float32; lengths: (B,) int32. Returns (B, L, d_model)."""
    B, L, tok_dim = tokens.shape
    # torch.cat([tokens, zeros(..., d_model - 2)], dim=2)
    x = jnp.concatenate(
        [tokens, jnp.zeros((B, L, D_MODEL - tok_dim), tokens.dtype)], axis=2)
    # attention_mask = arange(L) < lengths[:, None]; key_padding_mask = ~attention_mask
    valid = jnp.arange(L)[None, :] < lengths[:, None]                  # (B, L)
    bias = jnp.where(valid, 0.0, NEG_INF).astype(jnp.float32)          # (B, L)

    # --- batch tiling: ~TARGET_TOKENS tokens per grid step ---
    if batch_tile is None:
        batch_tile = max(1, TARGET_TOKENS // L)
        # v7x megacore: keep at least 2 grid steps whenever B > 1 so the "parallel"
        # grid axis can shard across both TensorCores.
        batch_tile = min(batch_tile, max(1, -(-B // 2)))
    while (batch_tile * L) % 8 != 0:                 # sublane alignment of the tile
        batch_tile += 1
    num_tiles = -(-B // batch_tile)
    b_pad = num_tiles * batch_tile
    if b_pad != B:
        # Padded batch rows get bias 0.0 ("valid"); safe because the block-diagonal
        # mask isolates them and they are sliced off at the end.
        x = jnp.concatenate(
            [x, jnp.zeros((b_pad - B, L, D_MODEL), x.dtype)], axis=0)
        bias = jnp.concatenate(
            [bias, jnp.zeros((b_pad - B, L), bias.dtype)], axis=0)
    T = batch_tile * L                               # tokens per grid step

    x_flat = x.reshape(b_pad * L, D_MODEL)           # (num_tiles*T, d_model)
    bias_flat = bias.reshape(num_tiles, 1, T)        # (num_tiles, 1, T)
    # Block-diagonal mask, identical for every tile (precomputed: no in-kernel
    # integer divisions). Constant index_map -> DMA'd once, stays resident.
    tok_seq = jnp.arange(T, dtype=jnp.int32) // L
    blockdiag = jnp.where(tok_seq[:, None] == tok_seq[None, :],
                          0.0, NEG_INF).astype(jnp.float32)[None]      # (1, T, T)

    def wspec(shape):                                # shared (weight) blocks
        return pl.BlockSpec(shape, lambda b: (0,) * len(shape))

    in_specs = [
        pl.BlockSpec((T, D_MODEL), lambda b: (b, 0)),       # x (flattened tile)
        pl.BlockSpec((1, 1, T), lambda b: (b, 0, 0)),        # key-padding bias
        pl.BlockSpec((1, T, T), lambda b: (0, 0, 0)),        # block-diagonal bias
        wspec((D_MODEL, D_MODEL)), wspec((1, D_MODEL)),      # wq, bq
        wspec((D_MODEL, D_MODEL)), wspec((1, D_MODEL)),      # wk, bk
        wspec((D_MODEL, D_MODEL)), wspec((1, D_MODEL)),      # wv, bv
        wspec((D_MODEL, D_MODEL)), wspec((1, D_MODEL)),      # wo, bo
        wspec((D_MODEL, DIM_FF)), wspec((1, DIM_FF)),        # w1, b1
        wspec((D_MODEL, DIM_FF)), wspec((1, D_MODEL)),       # w2t (transposed), b2
    ]
    out_spec = pl.BlockSpec((T, D_MODEL), lambda b: (b, 0))

    out_flat = pl.pallas_call(
        _encoder_stack_kernel,
        out_shape=jax.ShapeDtypeStruct((b_pad * L, D_MODEL), jnp.float32),
        grid_spec=pltpu.PrefetchScalarGridSpec(
            num_scalar_prefetch=0,
            grid=(num_tiles,),
            in_specs=in_specs,
            out_specs=out_spec,
            scratch_shapes=[pltpu.VMEM((T, T), jnp.float32)],   # combined attn bias
        ),
        compiler_params=pltpu.CompilerParams(
            dimension_semantics=("parallel",)),
    )(x_flat, bias_flat, blockdiag, *params)

    return out_flat.reshape(b_pad, L, D_MODEL)[:B]


def init_params(key):
    """Deterministic synthetic weights with the shapes implied by the module.
    Stored in kernel layout: x @ W + b; linear2 stored transposed (d_model, DIM_FF)."""
    ks = jax.random.split(key, 12)

    def w(k, shape, scale=0.2):
        return (scale * jax.random.normal(k, shape)).astype(jnp.float32)

    wq = w(ks[0], (D_MODEL, D_MODEL)); bq = w(ks[1], (1, D_MODEL), 0.05)
    wk = w(ks[2], (D_MODEL, D_MODEL)); bk = w(ks[3], (1, D_MODEL), 0.05)
    wv = w(ks[4], (D_MODEL, D_MODEL)); bv = w(ks[5], (1, D_MODEL), 0.05)
    wo = w(ks[6], (D_MODEL, D_MODEL)); bo = w(ks[7], (1, D_MODEL), 0.05)
    w1 = w(ks[8], (D_MODEL, DIM_FF), 0.1); b1 = w(ks[9], (1, DIM_FF), 0.05)
    w2t = w(ks[10], (D_MODEL, DIM_FF), 0.1); b2 = w(ks[11], (1, D_MODEL), 0.05)
    return (wq, bq, wk, bk, wv, bv, wo, bo, w1, b1, w2t, b2)


def reference_forward(tokens, lengths, params):
    """Pure-JAX reference of the same forward pass (for correctness check)."""
    wq, bq, wk, bk, wv, bv, wo, bo, w1, b1, w2t, b2 = params
    w2 = w2t.T
    B, L, tok_dim = tokens.shape
    x = jnp.concatenate(
        [tokens, jnp.zeros((B, L, D_MODEL - tok_dim), tokens.dtype)], axis=2)
    valid = jnp.arange(L)[None, :] < lengths[:, None]
    bias = jnp.where(valid, 0.0, NEG_INF).astype(jnp.float32)[:, None, :]
    scale = 1.0 / math.sqrt(D_MODEL // NHEAD)
    hp = jax.lax.Precision.HIGHEST
    for _ in range(NUM_LAYERS):
        q = jnp.einsum('bld,de->ble', x, wq, precision=hp) + bq
        k = jnp.einsum('bld,de->ble', x, wk, precision=hp) + bk
        v = jnp.einsum('bld,de->ble', x, wv, precision=hp) + bv
        s = jnp.einsum('bqd,bkd->bqk', q, k, precision=hp) * scale + bias
        p = jax.nn.softmax(s, axis=-1)
        ctx = jnp.einsum('bqk,bkd->bqd', p, v, precision=hp)
        attn_out = jnp.einsum('bld,de->ble', ctx, wo, precision=hp) + bo
        x = x + SCALING * attn_out
        h = jnp.maximum(jnp.einsum('bld,df->blf', x, w1, precision=hp) + b1, 0.0)
        ff = jnp.einsum('blf,fd->bld', h, w2, precision=hp) + b2
        x = x + SCALING * ff
    return x


if __name__ == "__main__":
    key = jax.random.PRNGKey(0)
    k1, k2, kp = jax.random.split(key, 3)
    params = init_params(kp)

    # Case 1: B=2, L=8 -> two grid steps of one sequence each (v7x: both TCs active).
    tokens1 = jax.random.normal(k1, (2, 8, 2), dtype=jnp.float32)
    lengths1 = jnp.array([8, 5], dtype=jnp.int32)
    out1 = jax.block_until_ready(mnist_transformer_forward(tokens1, lengths1, params))
    ref1 = reference_forward(tokens1, lengths1, params)
    assert out1.shape == (2, 8, D_MODEL)
    d1 = float(jnp.max(jnp.abs(out1 - ref1)))
    assert jnp.allclose(out1, ref1, rtol=5e-3, atol=5e-3), f"case1 max abs diff = {d1}"

    # Case 2: B=3, L=10 -> exercises batch padding to a whole tile and ragged lengths.
    tokens2 = jax.random.normal(k2, (3, 10, 2), dtype=jnp.float32)
    lengths2 = jnp.array([10, 7, 3], dtype=jnp.int32)
    out2 = jax.block_until_ready(mnist_transformer_forward(tokens2, lengths2, params))
    ref2 = reference_forward(tokens2, lengths2, params)
    assert out2.shape == (3, 10, D_MODEL)
    d2 = float(jnp.max(jnp.abs(out2 - ref2)))
    assert jnp.allclose(out2, ref2, rtol=5e-3, atol=5e-3), f"case2 max abs diff = {d2}"

    print("KERNEL_OK")
</pallas_src>

<mosaic_0001>
module attributes {stable_mosaic.version = 11 : i64} {
  func.func @_encoder_stack_kernel(%arg0: i32, %arg1: memref<8x3xf32, #tpu.memory_space<vmem>>, %arg2: memref<1x1x8xf32, #tpu.memory_space<vmem>>, %arg3: memref<1x8x8xf32, #tpu.memory_space<vmem>>, %arg4: memref<3x3xf32, #tpu.memory_space<vmem>>, %arg5: memref<1x3xf32, #tpu.memory_space<vmem>>, %arg6: memref<3x3xf32, #tpu.memory_space<vmem>>, %arg7: memref<1x3xf32, #tpu.memory_space<vmem>>, %arg8: memref<3x3xf32, #tpu.memory_space<vmem>>, %arg9: memref<1x3xf32, #tpu.memory_space<vmem>>, %arg10: memref<3x3xf32, #tpu.memory_space<vmem>>, %arg11: memref<1x3xf32, #tpu.memory_space<vmem>>, %arg12: memref<3x512xf32, #tpu.memory_space<vmem>>, %arg13: memref<1x512xf32, #tpu.memory_space<vmem>>, %arg14: memref<3x512xf32, #tpu.memory_space<vmem>>, %arg15: memref<1x3xf32, #tpu.memory_space<vmem>>, %arg16: memref<8x3xf32, #tpu.memory_space<vmem>>, %arg17: memref<8x8xf32, #tpu.memory_space<vmem>>) attributes {dimension_semantics = [#tpu.dimension_semantics<parallel>], iteration_bounds = array<i64: 2>, scalar_prefetch = 0 : i64, scratch_operands = 1 : i64, tpu.core_type = #tpu.core_type<tc>, window_params = [{transform_indices = @transform_0, window_bounds = array<i64: 8, 3>}, {transform_indices = @transform_1, window_bounds = array<i64: 1, 1, 8>}, {pipeline_mode = #tpu.pipeline_mode<synchronous>, transform_indices = @transform_2, window_bounds = array<i64: 1, 8, 8>}, {pipeline_mode = #tpu.pipeline_mode<synchronous>, transform_indices = @transform_3, window_bounds = array<i64: 3, 3>}, {pipeline_mode = #tpu.pipeline_mode<synchronous>, transform_indices = @transform_4, window_bounds = array<i64: 1, 3>}, {pipeline_mode = #tpu.pipeline_mode<synchronous>, transform_indices = @transform_5, window_bounds = array<i64: 3, 3>}, {pipeline_mode = #tpu.pipeline_mode<synchronous>, transform_indices = @transform_6, window_bounds = array<i64: 1, 3>}, {pipeline_mode = #tpu.pipeline_mode<synchronous>, transform_indices = @transform_7, window_bounds = array<i64: 3, 3>}, {pipeline_mode = #tpu.pipeline_mode<synchronous>, transform_indices = @transform_8, window_bounds = array<i64: 1, 3>}, {pipeline_mode = #tpu.pipeline_mode<synchronous>, transform_indices = @transform_9, window_bounds = array<i64: 3, 3>}, {pipeline_mode = #tpu.pipeline_mode<synchronous>, transform_indices = @transform_10, window_bounds = array<i64: 1, 3>}, {pipeline_mode = #tpu.pipeline_mode<synchronous>, transform_indices = @transform_11, window_bounds = array<i64: 3, 512>}, {pipeline_mode = #tpu.pipeline_mode<synchronous>, transform_indices = @transform_12, window_bounds = array<i64: 1, 512>}, {pipeline_mode = #tpu.pipeline_mode<synchronous>, transform_indices = @transform_13, window_bounds = array<i64: 3, 512>}, {pipeline_mode = #tpu.pipeline_mode<synchronous>, transform_indices = @transform_14, window_bounds = array<i64: 1, 3>}, {transform_indices = @transform_15, window_bounds = array<i64: 8, 3>}]} {
    %c0 = arith.constant 0 : index
    %c0_0 = arith.constant 0 : index
    %c0_1 = arith.constant 0 : index
    %0 = vector.load %arg3[%c0, %c0_0, %c0_1] : memref<1x8x8xf32, #tpu.memory_space<vmem>>, vector<1x8x8xf32>
    %1 = vector.shape_cast %0 : vector<1x8x8xf32> to vector<8x8xf32>
    %c0_2 = arith.constant 0 : index
    %c0_3 = arith.constant 0 : index
    %c0_4 = arith.constant 0 : index
    %2 = vector.load %arg2[%c0_2, %c0_3, %c0_4] : memref<1x1x8xf32, #tpu.memory_space<vmem>>, vector<1x1x8xf32>
    %3 = vector.shape_cast %2 : vector<1x1x8xf32> to vector<1x8xf32>
    %4 = vector.broadcast %3 : vector<1x8xf32> to vector<8x8xf32>
    %5 = arith.addf %1, %4 : vector<8x8xf32>
    %c0_5 = arith.constant 0 : index
    %c0_6 = arith.constant 0 : index
    %6 = vector.load %arg17[%c0_5, %c0_6] : memref<8x8xf32, #tpu.memory_space<vmem>>, vector<8x8xf32>
    tpu.vector_store %arg17[%c0_5, %c0_6], %5 {strides = array<i32>} : memref<8x8xf32, #tpu.memory_space<vmem>>, vector<8x8xf32>,
    %c0_7 = arith.constant 0 : index
    %c0_8 = arith.constant 0 : index
    %7 = vector.load %arg1[%c0_7, %c0_8] : memref<8x3xf32, #tpu.memory_space<vmem>>, vector<8x3xf32>
    %c0_i32 = arith.constant 0 : i32
    %c0_9 = arith.constant 0 : index
    %c0_10 = arith.constant 0 : index
    %8 = vector.load %arg4[%c0_9, %c0_10] : memref<3x3xf32, #tpu.memory_space<vmem>>, vector<3x3xf32>
    %cst = arith.constant dense<0.000000e+00> : vector<8x3xf32>
    %9 = tpu.matmul %7, %8, %cst {dimension_numbers = #tpu.dot_dimension_numbers<[1], [0], [0], [1], [0, 0, 1, 1], [], []>} : vector<8x3xf32>, vector<3x3xf32>, vector<8x3xf32> -> vector<8x3xf32>
    %c0_11 = arith.constant 0 : index
    %c0_12 = arith.constant 0 : index
    %10 = vector.load %arg5[%c0_11, %c0_12] : memref<1x3xf32, #tpu.memory_space<vmem>>, vector<1x3xf32>
    %11 = vector.broadcast %10 : vector<1x3xf32> to vector<8x3xf32>
    %12 = arith.addf %9, %11 : vector<8x3xf32>
    %c0_13 = arith.constant 0 : index
    %c0_14 = arith.constant 0 : index
    %13 = vector.load %arg6[%c0_13, %c0_14] : memref<3x3xf32, #tpu.memory_space<vmem>>, vector<3x3xf32>
    %cst_15 = arith.constant dense<0.000000e+00> : vector<8x3xf32>
    %14 = tpu.matmul %7, %13, %cst_15 {dimension_numbers = #tpu.dot_dimension_numbers<[1], [0], [0], [1], [0, 0, 1, 1], [], []>} : vector<8x3xf32>, vector<3x3xf32>, vector<8x3xf32> -> vector<8x3xf32>
    %c0_16 = arith.constant 0 : index
    %c0_17 = arith.constant 0 : index
    %15 = vector.load %arg7[%c0_16, %c0_17] : memref<1x3xf32, #tpu.memory_space<vmem>>, vector<1x3xf32>
    %16 = vector.broadcast %15 : vector<1x3xf32> to vector<8x3xf32>
    %17 = arith.addf %14, %16 : vector<8x3xf32>
    %cst_18 = arith.constant dense<0.000000e+00> : vector<8x8xf32>
    %18 = tpu.matmul %12, %17, %cst_18 {dimension_numbers = #tpu.dot_dimension_numbers<[1], [1], [0], [0], [0, 0, 1, 0], [], []>} : vector<8x3xf32>, vector<8x3xf32>, vector<8x8xf32> -> vector<8x8xf32>
    %cst_19 = arith.constant 0.577350259 : f32
    %19 = vector.broadcast %cst_19 : f32 to vector<8x8xf32>
    %20 = arith.mulf %18, %19 : vector<8x8xf32>
    %c0_20 = arith.constant 0 : index
    %c0_21 = arith.constant 0 : index
    %21 = vector.load %arg17[%c0_20, %c0_21] : memref<8x8xf32, #tpu.memory_space<vmem>>, vector<8x8xf32>
    %22 = arith.addf %20, %21 : vector<8x8xf32>
    %cst_22 = arith.constant dense<0xFF800000> : vector<8xf32>
    %23 = vector.multi_reduction <maximumf>, %22, %cst_22 [1] : vector<8x8xf32> to vector<8xf32>
    %24 = vector.shape_cast %23 : vector<8xf32> to vector<8x1xf32>
    %25 = vector.broadcast %24 : vector<8x1xf32> to vector<8x8xf32>
    %26 = arith.subf %22, %25 : vector<8x8xf32>
    %27 = math.exp %26 : vector<8x8xf32>
    %cst_23 = arith.constant dense<0.000000e+00> : vector<8xf32>
    %28 = vector.multi_reduction <add>, %27, %cst_23 [1] : vector<8x8xf32> to vector<8xf32>
    %29 = vector.shape_cast %28 : vector<8xf32> to vector<8x1xf32>
    %30 = tpu.reciprocal %29 {approx = true} : vector<8x1xf32> -> vector<8x1xf32>
    %31 = vector.broadcast %30 : vector<8x1xf32> to vector<8x8xf32>
    %32 = arith.mulf %27, %31 : vector<8x8xf32>
    %c0_24 = arith.constant 0 : index
    %c0_25 = arith.constant 0 : index
    %33 = vector.load %arg8[%c0_24, %c0_25] : memref<3x3xf32, #tpu.memory_space<vmem>>, vector<3x3xf32>
    %cst_26 = arith.constant dense<0.000000e+00> : vector<8x3xf32>
    %34 = tpu.matmul %7, %33, %cst_26 {dimension_numbers = #tpu.dot_dimension_numbers<[1], [0], [0], [1], [0, 0, 1, 1], [], []>} : vector<8x3xf32>, vector<3x3xf32>, vector<8x3xf32> -> vector<8x3xf32>
    %c0_27 = arith.constant 0 : index
    %c0_28 = arith.constant 0 : index
    %35 = vector.load %arg9[%c0_27, %c0_28] : memref<1x3xf32, #tpu.memory_space<vmem>>, vector<1x3xf32>
    %36 = vector.broadcast %35 : vector<1x3xf32> to vector<8x3xf32>
    %37 = arith.addf %34, %36 : vector<8x3xf32>
    %cst_29 = arith.constant dense<0.000000e+00> : vector<8x3xf32>
    %38 = tpu.matmul %32, %37, %cst_29 {dimension_numbers = #tpu.dot_dimension_numbers<[1], [0], [0], [1], [0, 0, 1, 1], [], []>} : vector<8x8xf32>, vector<8x3xf32>, vector<8x3xf32> -> vector<8x3xf32>
    %c0_30 = arith.constant 0 : index
    %c0_31 = arith.constant 0 : index
    %39 = vector.load %arg10[%c0_30, %c0_31] : memref<3x3xf32, #tpu.memory_space<vmem>>, vector<3x3xf32>
    %cst_32 = arith.constant dense<0.000000e+00> : vector<8x3xf32>
    %40 = tpu.matmul %38, %39, %cst_32 {dimension_numbers = #tpu.dot_dimension_numbers<[1], [0], [0], [1], [0, 0, 1, 1], [], []>} : vector<8x3xf32>, vector<3x3xf32>, vector<8x3xf32> -> vector<8x3xf32>
    %c0_33 = arith.constant 0 : index
    %c0_34 = arith.constant 0 : index
    %41 = vector.load %arg11[%c0_33, %c0_34] : memref<1x3xf32, #tpu.memory_space<vmem>>, vector<1x3xf32>
    %42 = vector.broadcast %41 : vector<1x3xf32> to vector<8x3xf32>
    %43 = arith.addf %40, %42 : vector<8x3xf32>
    %cst_35 = arith.constant 1.000000e-01 : f32
    %44 = vector.broadcast %cst_35 : f32 to vector<8x3xf32>
    %45 = arith.mulf %44, %43 : vector<8x3xf32>
    %46 = arith.addf %7, %45 : vector<8x3xf32>
    %cst_36 = arith.constant 0.000000e+00 : f32
    %47 = vector.broadcast %cst_36 : f32 to vector<8x3xf32>
    %c0_37 = arith.constant 0 : index
    %c0_38 = arith.constant 0 : index
    %48 = vector.load %arg12[%c0_37, %c0_38] : memref<3x512xf32, #tpu.memory_space<vmem>>, vector<3x128xf32>
    %cst_39 = arith.constant dense<0.000000e+00> : vector<8x128xf32>
    %49 = tpu.matmul %46, %48, %cst_39 {dimension_numbers = #tpu.dot_dimension_numbers<[1], [0], [0], [1], [0, 0, 1, 1], [], []>} : vector<8x3xf32>, vector<3x128xf32>, vector<8x128xf32> -> vector<8x128xf32>
    %c0_40 = arith.constant 0 : index
    %c0_41 = arith.constant 0 : index
    %50 = vector.load %arg13[%c0_40, %c0_41] : memref<1x512xf32, #tpu.memory_space<vmem>>, vector<1x128xf32>
    %51 = vector.broadcast %50 : vector<1x128xf32> to vector<8x128xf32>
    %52 = arith.addf %49, %51 : vector<8x128xf32>
    %cst_42 = arith.constant 0.000000e+00 : f32
    %53 = vector.broadcast %cst_42 : f32 to vector<8x128xf32>
    %54 = arith.maximumf %52, %53 : vector<8x128xf32>
    %c0_43 = arith.constant 0 : index
    %c0_44 = arith.constant 0 : index
    %55 = vector.load %arg14[%c0_43, %c0_44] : memref<3x512xf32, #tpu.memory_space<vmem>>, vector<3x128xf32>
    %cst_45 = arith.constant dense<0.000000e+00> : vector<8x3xf32>
    %56 = tpu.matmul %54, %55, %cst_45 {dimension_numbers = #tpu.dot_dimension_numbers<[1], [1], [0], [0], [0, 0, 1, 0], [], []>} : vector<8x128xf32>, vector<3x128xf32>, vector<8x3xf32> -> vector<8x3xf32>
    %57 = arith.addf %47, %56 : vector<8x3xf32>
    %c0_46 = arith.constant 0 : index
    %c128 = arith.constant 128 : index
    %58 = vector.load %arg12[%c0_46, %c128] : memref<3x512xf32, #tpu.memory_space<vmem>>, vector<3x128xf32>
    %cst_47 = arith.constant dense<0.000000e+00> : vector<8x128xf32>
    %59 = tpu.matmul %46, %58, %cst_47 {dimension_numbers = #tpu.dot_dimension_numbers<[1], [0], [0], [1], [0, 0, 1, 1], [], []>} : vector<8x3xf32>, vector<3x128xf32>, vector<8x128xf32> -> vector<8x128xf32>
    %c0_48 = arith.constant 0 : index
    %c128_49 = arith.constant 128 : index
    %60 = vector.load %arg13[%c0_48, %c128_49] : memref<1x512xf32, #tpu.memory_space<vmem>>, vector<1x128xf32>
    %61 = vector.broadcast %60 : vector<1x128xf32> to vector<8x128xf32>
    %62 = arith.addf %59, %61 : vector<8x128xf32>
    %cst_50 = arith.constant 0.000000e+00 : f32
    %63 = vector.broadcast %cst_50 : f32 to vector<8x128xf32>
    %64 = arith.maximumf %62, %63 : vector<8x128xf32>
    %c0_51 = arith.constant 0 : index
    %c128_52 = arith.constant 128 : index
    %65 = vector.load %arg14[%c0_51, %c128_52] : memref<3x512xf32, #tpu.memory_space<vmem>>, vector<3x128xf32>
    %cst_53 = arith.constant dense<0.000000e+00> : vector<8x3xf32>
    %66 = tpu.matmul %64, %65, %cst_53 {dimension_numbers = #tpu.dot_dimension_numbers<[1], [1], [0], [0], [0, 0, 1, 0], [], []>} : vector<8x128xf32>, vector<3x128xf32>, vector<8x3xf32> -> vector<8x3xf32>
    %67 = arith.addf %57, %66 : vector<8x3xf32>
    %c0_54 = arith.constant 0 : index
    %c256 = arith.constant 256 : index
    %68 = vector.load %arg12[%c0_54, %c256] : memref<3x512xf32, #tpu.memory_space<vmem>>, vector<3x128xf32>
    %cst_55 = arith.constant dense<0.000000e+00> : vector<8x128xf32>
    %69 = tpu.matmul %46, %68, %cst_55 {dimension_numbers = #tpu.dot_dimension_numbers<[1], [0], [0], [1], [0, 0, 1, 1], [], []>} : vector<8x3xf32>, vector<3x128xf32>, vector<8x128xf32> -> vector<8x128xf32>
    %c0_56 = arith.constant 0 : index
    %c256_57 = arith.constant 256 : index
    %70 = vector.load %arg13[%c0_56, %c256_57] : memref<1x512xf32, #tpu.memory_space<vmem>>, vector<1x128xf32>
    %71 = vector.broadcast %70 : vector<1x128xf32> to vector<8x128xf32>
    %72 = arith.addf %69, %71 : vector<8x128xf32>
    %cst_58 = arith.constant 0.000000e+00 : f32
    %73 = vector.broadcast %cst_58 : f32 to vector<8x128xf32>
    %74 = arith.maximumf %72, %73 : vector<8x128xf32>
    %c0_59 = arith.constant 0 : index
    %c256_60 = arith.constant 256 : index
    %75 = vector.load %arg14[%c0_59, %c256_60] : memref<3x512xf32, #tpu.memory_space<vmem>>, vector<3x128xf32>
    %cst_61 = arith.constant dense<0.000000e+00> : vector<8x3xf32>
    %76 = tpu.matmul %74, %75, %cst_61 {dimension_numbers = #tpu.dot_dimension_numbers<[1], [1], [0], [0], [0, 0, 1, 0], [], []>} : vector<8x128xf32>, vector<3x128xf32>, vector<8x3xf32> -> vector<8x3xf32>
    %77 = arith.addf %67, %76 : vector<8x3xf32>
    %c0_62 = arith.constant 0 : index
    %c384 = arith.constant 384 : index
    %78 = vector.load %arg12[%c0_62, %c384] : memref<3x512xf32, #tpu.memory_space<vmem>>, vector<3x128xf32>
    %cst_63 = arith.constant dense<0.000000e+00> : vector<8x128xf32>
    %79 = tpu.matmul %46, %78, %cst_63 {dimension_numbers = #tpu.dot_dimension_numbers<[1], [0], [0], [1], [0, 0, 1, 1], [], []>} : vector<8x3xf32>, vector<3x128xf32>, vector<8x128xf32> -> vector<8x128xf32>
    %c0_64 = arith.constant 0 : index
    %c384_65 = arith.constant 384 : index
    %80 = vector.load %arg13[%c0_64, %c384_65] : memref<1x512xf32, #tpu.memory_space<vmem>>, vector<1x128xf32>
    %81 = vector.broadcast %80 : vector<1x128xf32> to vector<8x128xf32>
    %82 = arith.addf %79, %81 : vector<8x128xf32>
    %cst_66 = arith.constant 0.000000e+00 : f32
    %83 = vector.broadcast %cst_66 : f32 to vector<8x128xf32>
    %84 = arith.maximumf %82, %83 : vector<8x128xf32>
    %c0_67 = arith.constant 0 : index
    %c384_68 = arith.constant 384 : index
    %85 = vector.load %arg14[%c0_67, %c384_68] : memref<3x512xf32, #tpu.memory_space<vmem>>, vector<3x128xf32>
    %cst_69 = arith.constant dense<0.000000e+00> : vector<8x3xf32>
    %86 = tpu.matmul %84, %85, %cst_69 {dimension_numbers = #tpu.dot_dimension_numbers<[1], [1], [0], [0], [0, 0, 1, 0], [], []>} : vector<8x128xf32>, vector<3x128xf32>, vector<8x3xf32> -> vector<8x3xf32>
    %87 = arith.addf %77, %86 : vector<8x3xf32>
    %c0_70 = arith.constant 0 : index
    %c0_71 = arith.constant 0 : index
    %88 = vector.load %arg15[%c0_70, %c0_71] : memref<1x3xf32, #tpu.memory_space<vmem>>, vector<1x3xf32>
    %89 = vector.broadcast %88 : vector<1x3xf32> to vector<8x3xf32>
    %90 = arith.addf %87, %89 : vector<8x3xf32>
    %cst_72 = arith.constant 1.000000e-01 : f32
    %91 = vector.broadcast %cst_72 : f32 to vector<8x3xf32>
    %92 = arith.mulf %91, %90 : vector<8x3xf32>
    %93 = arith.addf %46, %92 : vector<8x3xf32>
    %c1_i32 = arith.constant 1 : i32
    %c0_73 = arith.constant 0 : index
    %c0_74 = arith.constant 0 : index
    %94 = vector.load %arg4[%c0_73, %c0_74] : memref<3x3xf32, #tpu.memory_space<vmem>>, vector<3x3xf32>
    %cst_75 = arith.constant dense<0.000000e+00> : vector<8x3xf32>
    %95 = tpu.matmul %93, %94, %cst_75 {dimension_numbers = #tpu.dot_dimension_numbers<[1], [0], [0], [1], [0, 0, 1, 1], [], []>} : vector<8x3xf32>, vector<3x3xf32>, vector<8x3xf32> -> vector<8x3xf32>
    %c0_76 = arith.constant 0 : index
    %c0_77 = arith.constant 0 : index
    %96 = vector.load %arg5[%c0_76, %c0_77] : memref<1x3xf32, #tpu.memory_space<vmem>>, vector<1x3xf32>
    %97 = vector.broadcast %96 : vector<1x3xf32> to vector<8x3xf32>
    %98 = arith.addf %95, %97 : vector<8x3xf32>
    %c0_78 = arith.constant 0 : index
    %c0_79 = arith.constant 0 : index
    %99 = vector.load %arg6[%c0_78, %c0_79] : memref<3x3xf32, #tpu.memory_space<vmem>>, vector<3x3xf32>
    %cst_80 = arith.constant dense<0.000000e+00> : vector<8x3xf32>
    %100 = tpu.matmul %93, %99, %cst_80 {dimension_numbers = #tpu.dot_dimension_numbers<[1], [0], [0], [1], [0, 0, 1, 1], [], []>} : vector<8x3xf32>, vector<3x3xf32>, vector<8x3xf32> -> vector<8x3xf32>
    %c0_81 = arith.constant 0 : index
    %c0_82 = arith.constant 0 : index
    %101 = vector.load %arg7[%c0_81, %c0_82] : memref<1x3xf32, #tpu.memory_space<vmem>>, vector<1x3xf32>
    %102 = vector.broadcast %101 : vector<1x3xf32> to vector<8x3xf32>
    %103 = arith.addf %100, %102 : vector<8x3xf32>
    %cst_83 = arith.constant dense<0.000000e+00> : vector<8x8xf32>
    %104 = tpu.matmul %98, %103, %cst_83 {dimension_numbers = #tpu.dot_dimension_numbers<[1], [1], [0], [0], [0, 0, 1, 0], [], []>} : vector<8x3xf32>, vector<8x3xf32>, vector<8x8xf32> -> vector<8x8xf32>
    %cst_84 = arith.constant 0.577350259 : f32
    %105 = vector.broadcast %cst_84 : f32 to vector<8x8xf32>
    %106 = arith.mulf %104, %105 : vector<8x8xf32>
    %c0_85 = arith.constant 0 : index
    %c0_86 = arith.constant 0 : index
    %107 = vector.load %arg17[%c0_85, %c0_86] : memref<8x8xf32, #tpu.memory_space<vmem>>, vector<8x8xf32>
    %108 = arith.addf %106, %107 : vector<8x8xf32>
    %cst_87 = arith.constant dense<0xFF800000> : vector<8xf32>
    %109 = vector.multi_reduction <maximumf>, %108, %cst_87 [1] : vector<8x8xf32> to vector<8xf32>
    %110 = vector.shape_cast %109 : vector<8xf32> to vector<8x1xf32>
    %111 = vector.broadcast %110 : vector<8x1xf32> to vector<8x8xf32>
    %112 = arith.subf %108, %111 : vector<8x8xf32>
    %113 = math.exp %112 : vector<8x8xf32>
    %cst_88 = arith.constant dense<0.000000e+00> : vector<8xf32>
    %114 = vector.multi_reduction <add>, %113, %cst_88 [1] : vector<8x8xf32> to vector<8xf32>
    %115 = vector.shape_cast %114 : vector<8xf32> to vector<8x1xf32>
    %116 = tpu.reciprocal %115 {approx = true} : vector<8x1xf32> -> vector<8x1xf32>
    %117 = vector.broadcast %116 : vector<8x1xf32> to vector<8x8xf32>
    %118 = arith.mulf %113, %117 : vector<8x8xf32>
    %c0_89 = arith.constant 0 : index
    %c0_90 = arith.constant 0 : index
    %119 = vector.load %arg8[%c0_89, %c0_90] : memref<3x3xf32, #tpu.memory_space<vmem>>, vector<3x3xf32>
    %cst_91 = arith.constant dense<0.000000e+00> : vector<8x3xf32>
    %120 = tpu.matmul %93, %119, %cst_91 {dimension_numbers = #tpu.dot_dimension_numbers<[1], [0], [0], [1], [0, 0, 1, 1], [], []>} : vector<8x3xf32>, vector<3x3xf32>, vector<8x3xf32> -> vector<8x3xf32>
    %c0_92 = arith.constant 0 : index
    %c0_93 = arith.constant 0 : index
    %121 = vector.load %arg9[%c0_92, %c0_93] : memref<1x3xf32, #tpu.memory_space<vmem>>, vector<1x3xf32>
    %122 = vector.broadcast %121 : vector<1x3xf32> to vector<8x3xf32>
    %123 = arith.addf %120, %122 : vector<8x3xf32>
    %cst_94 = arith.constant dense<0.000000e+00> : vector<8x3xf32>
    %124 = tpu.matmul %118, %123, %cst_94 {dimension_numbers = #tpu.dot_dimension_numbers<[1], [0], [0], [1], [0, 0, 1, 1], [], []>} : vector<8x8xf32>, vector<8x3xf32>, vector<8x3xf32> -> vector<8x3xf32>
    %c0_95 = arith.constant 0 : index
    %c0_96 = arith.constant 0 : index
    %125 = vector.load %arg10[%c0_95, %c0_96] : memref<3x3xf32, #tpu.memory_space<vmem>>, vector<3x3xf32>
    %cst_97 = arith.constant dense<0.000000e+00> : vector<8x3xf32>
    %126 = tpu.matmul %124, %125, %cst_97 {dimension_numbers = #tpu.dot_dimension_numbers<[1], [0], [0], [1], [0, 0, 1, 1], [], []>} : vector<8x3xf32>, vector<3x3xf32>, vector<8x3xf32> -> vector<8x3xf32>
    %c0_98 = arith.constant 0 : index
    %c0_99 = arith.constant 0 : index
    %127 = vector.load %arg11[%c0_98, %c0_99] : memref<1x3xf32, #tpu.memory_space<vmem>>, vector<1x3xf32>
    %128 = vector.broadcast %127 : vector<1x3xf32> to vector<8x3xf32>
    %129 = arith.addf %126, %128 : vector<8x3xf32>
    %cst_100 = arith.constant 1.000000e-01 : f32
    %130 = vector.broadcast %cst_100 : f32 to vector<8x3xf32>
    %131 = arith.mulf %130, %129 : vector<8x3xf32>
    %132 = arith.addf %93, %131 : vector<8x3xf32>
    %cst_101 = arith.constant 0.000000e+00 : f32
    %133 = vector.broadcast %cst_101 : f32 to vector<8x3xf32>
    %c0_102 = arith.constant 0 : index
    %c0_103 = arith.constant 0 : index
    %134 = vector.load %arg12[%c0_102, %c0_103] : memref<3x512xf32, #tpu.memory_space<vmem>>, vector<3x128xf32>
    %cst_104 = arith.constant dense<0.000000e+00> : vector<8x128xf32>
    %135 = tpu.matmul %132, %134, %cst_104 {dimension_numbers = #tpu.dot_dimension_numbers<[1], [0], [0], [1], [0, 0, 1, 1], [], []>} : vector<8x3xf32>, vector<3x128xf32>, vector<8x128xf32> -> vector<8x128xf32>
    %c0_105 = arith.constant 0 : index
    %c0_106 = arith.constant 0 : index
    %136 = vector.load %arg13[%c0_105, %c0_106] : memref<1x512xf32, #tpu.memory_space<vmem>>, vector<1x128xf32>
    %137 = vector.broadcast %136 : vector<1x128xf32> to vector<8x128xf32>
    %138 = arith.addf %135, %137 : vector<8x128xf32>
    %cst_107 = arith.constant 0.000000e+00 : f32
    %139 = vector.broadcast %cst_107 : f32 to vector<8x128xf32>
    %140 = arith.maximumf %138, %139 : vector<8x128xf32>
    %c0_108 = arith.constant 0 : index
    %c0_109 = arith.constant 0 : index
    %141 = vector.load %arg14[%c0_108, %c0_109] : memref<3x512xf32, #tpu.memory_space<vmem>>, vector<3x128xf32>
    %cst_110 = arith.constant dense<0.000000e+00> : vector<8x3xf32>
    %142 = tpu.matmul %140, %141, %cst_110 {dimension_numbers = #tpu.dot_dimension_numbers<[1], [1], [0], [0], [0, 0, 1, 0], [], []>} : vector<8x128xf32>, vector<3x128xf32>, vector<8x3xf32> -> vector<8x3xf32>
    %143 = arith.addf %133, %142 : vector<8x3xf32>
    %c0_111 = arith.constant 0 : index
    %c128_112 = arith.constant 128 : index
    %144 = vector.load %arg12[%c0_111, %c128_112] : memref<3x512xf32, #tpu.memory_space<vmem>>, vector<3x128xf32>
    %cst_113 = arith.constant dense<0.000000e+00> : vector<8x128xf32>
    %145 = tpu.matmul %132, %144, %cst_113 {dimension_numbers = #tpu.dot_dimension_numbers<[1], [0], [0], [1], [0, 0, 1, 1], [], []>} : vector<8x3xf32>, vector<3x128xf32>, vector<8x128xf32> -> vector<8x128xf32>
    %c0_114 = arith.constant 0 : index
    %c128_115 = arith.constant 128 : index
    %146 = vector.load %arg13[%c0_114, %c128_115] : memref<1x512xf32, #tpu.memory_space<vmem>>, vector<1x128xf32>
    %147 = vector.broadcast %146 : vector<1x128xf32> to vector<8x128xf32>
    %148 = arith.addf %145, %147 : vector<8x128xf32>
    %cst_116 = arith.constant 0.000000e+00 : f32
    %149 = vector.broadcast %cst_116 : f32 to vector<8x128xf32>
    %150 = arith.maximumf %148, %149 : vector<8x128xf32>
    %c0_117 = arith.constant 0 : index
    %c128_118 = arith.constant 128 : index
    %151 = vector.load %arg14[%c0_117, %c128_118] : memref<3x512xf32, #tpu.memory_space<vmem>>, vector<3x128xf32>
    %cst_119 = arith.constant dense<0.000000e+00> : vector<8x3xf32>
    %152 = tpu.matmul %150, %151, %cst_119 {dimension_numbers = #tpu.dot_dimension_numbers<[1], [1], [0], [0], [0, 0, 1, 0], [], []>} : vector<8x128xf32>, vector<3x128xf32>, vector<8x3xf32> -> vector<8x3xf32>
    %153 = arith.addf %143, %152 : vector<8x3xf32>
    %c0_120 = arith.constant 0 : index
    %c256_121 = arith.constant 256 : index
    %154 = vector.load %arg12[%c0_120, %c256_121] : memref<3x512xf32, #tpu.memory_space<vmem>>, vector<3x128xf32>
    %cst_122 = arith.constant dense<0.000000e+00> : vector<8x128xf32>
    %155 = tpu.matmul %132, %154, %cst_122 {dimension_numbers = #tpu.dot_dimension_numbers<[1], [0], [0], [1], [0, 0, 1, 1], [], []>} : vector<8x3xf32>, vector<3x128xf32>, vector<8x128xf32> -> vector<8x128xf32>
    %c0_123 = arith.constant 0 : index
    %c256_124 = arith.constant 256 : index
    %156 = vector.load %arg13[%c0_123, %c256_124] : memref<1x512xf32, #tpu.memory_space<vmem>>, vector<1x128xf32>
    %157 = vector.broadcast %156 : vector<1x128xf32> to vector<8x128xf32>
    %158 = arith.addf %155, %157 : vector<8x128xf32>
    %cst_125 = arith.constant 0.000000e+00 : f32
    %159 = vector.broadcast %cst_125 : f32 to vector<8x128xf32>
    %160 = arith.maximumf %158, %159 : vector<8x128xf32>
    %c0_126 = arith.constant 0 : index
    %c256_127 = arith.constant 256 : index
    %161 = vector.load %arg14[%c0_126, %c256_127] : memref<3x512xf32, #tpu.memory_space<vmem>>, vector<3x128xf32>
    %cst_128 = arith.constant dense<0.000000e+00> : vector<8x3xf32>
    %162 = tpu.matmul %160, %161, %cst_128 {dimension_numbers = #tpu.dot_dimension_numbers<[1], [1], [0], [0], [0, 0, 1, 0], [], []>} : vector<8x128xf32>, vector<3x128xf32>, vector<8x3xf32> -> vector<8x3xf32>
    %163 = arith.addf %153, %162 : vector<8x3xf32>
    %c0_129 = arith.constant 0 : index
    %c384_130 = arith.constant 384 : index
    %164 = vector.load %arg12[%c0_129, %c384_130] : memref<3x512xf32, #tpu.memory_space<vmem>>, vector<3x128xf32>
    %cst_131 = arith.constant dense<0.000000e+00> : vector<8x128xf32>
    %165 = tpu.matmul %132, %164, %cst_131 {dimension_numbers = #tpu.dot_dimension_numbers<[1], [0], [0], [1], [0, 0, 1, 1], [], []>} : vector<8x3xf32>, vector<3x128xf32>, vector<8x128xf32> -> vector<8x128xf32>
    %c0_132 = arith.constant 0 : index
    %c384_133 = arith.constant 384 : index
    %166 = vector.load %arg13[%c0_132, %c384_133] : memref<1x512xf32, #tpu.memory_space<vmem>>, vector<1x128xf32>
    %167 = vector.broadcast %166 : vector<1x128xf32> to vector<8x128xf32>
    %168 = arith.addf %165, %167 : vector<8x128xf32>
    %cst_134 = arith.constant 0.000000e+00 : f32
    %169 = vector.broadcast %cst_134 : f32 to vector<8x128xf32>
    %170 = arith.maximumf %168, %169 : vector<8x128xf32>
    %c0_135 = arith.constant 0 : index
    %c384_136 = arith.constant 384 : index
    %171 = vector.load %arg14[%c0_135, %c384_136] : memref<3x512xf32, #tpu.memory_space<vmem>>, vector<3x128xf32>
    %cst_137 = arith.constant dense<0.000000e+00> : vector<8x3xf32>
    %172 = tpu.matmul %170, %171, %cst_137 {dimension_numbers = #tpu.dot_dimension_numbers<[1], [1], [0], [0], [0, 0, 1, 0], [], []>} : vector<8x128xf32>, vector<3x128xf32>, vector<8x3xf32> -> vector<8x3xf32>
    %173 = arith.addf %163, %172 : vector<8x3xf32>
    %c0_138 = arith.constant 0 : index
    %c0_139 = arith.constant 0 : index
    %174 = vector.load %arg15[%c0_138, %c0_139] : memref<1x3xf32, #tpu.memory_space<vmem>>, vector<1x3xf32>
    %175 = vector.broadcast %174 : vector<1x3xf32> to vector<8x3xf32>
    %176 = arith.addf %173, %175 : vector<8x3xf32>
    %cst_140 = arith.constant 1.000000e-01 : f32
    %177 = vector.broadcast %cst_140 : f32 to vector<8x3xf32>
    %178 = arith.mulf %177, %176 : vector<8x3xf32>
    %179 = arith.addf %132, %178 : vector<8x3xf32>
    %c2_i32 = arith.constant 2 : i32
    %c0_141 = arith.constant 0 : index
    %c0_142 = arith.constant 0 : index
    %180 = vector.load %arg4[%c0_141, %c0_142] : memref<3x3xf32, #tpu.memory_space<vmem>>, vector<3x3xf32>
    %cst_143 = arith.constant dense<0.000000e+00> : vector<8x3xf32>
    %181 = tpu.matmul %179, %180, %cst_143 {dimension_numbers = #tpu.dot_dimension_numbers<[1], [0], [0], [1], [0, 0, 1, 1], [], []>} : vector<8x3xf32>, vector<3x3xf32>, vector<8x3xf32> -> vector<8x3xf32>
    %c0_144 = arith.constant 0 : index
    %c0_145 = arith.constant 0 : index
    %182 = vector.load %arg5[%c0_144, %c0_145] : memref<1x3xf32, #tpu.memory_space<vmem>>, vector<1x3xf32>
    %183 = vector.broadcast %182 : vector<1x3xf32> to vector<8x3xf32>
    %184 = arith.addf %181, %183 : vector<8x3xf32>
    %c0_146 = arith.constant 0 : index
    %c0_147 = arith.constant 0 : index
    %185 = vector.load %arg6[%c0_146, %c0_147] : memref<3x3xf32, #tpu.memory_space<vmem>>, vector<3x3xf32>
    %cst_148 = arith.constant dense<0.000000e+00> : vector<8x3xf32>
    %186 = tpu.matmul %179, %185, %cst_148 {dimension_numbers = #tpu.dot_dimension_numbers<[1], [0], [0], [1], [0, 0, 1, 1], [], []>} : vector<8x3xf32>, vector<3x3xf32>, vector<8x3xf32> -> vector<8x3xf32>
    %c0_149 = arith.constant 0 : index
    %c0_150 = arith.constant 0 : index
    %187 = vector.load %arg7[%c0_149, %c0_150] : memref<1x3xf32, #tpu.memory_space<vmem>>, vector<1x3xf32>
    %188 = vector.broadcast %187 : vector<1x3xf32> to vector<8x3xf32>
    %189 = arith.addf %186, %188 : vector<8x3xf32>
    %cst_151 = arith.constant dense<0.000000e+00> : vector<8x8xf32>
    %190 = tpu.matmul %184, %189, %cst_151 {dimension_numbers = #tpu.dot_dimension_numbers<[1], [1], [0], [0], [0, 0, 1, 0], [], []>} : vector<8x3xf32>, vector<8x3xf32>, vector<8x8xf32> -> vector<8x8xf32>
    %cst_152 = arith.constant 0.577350259 : f32
    %191 = vector.broadcast %cst_152 : f32 to vector<8x8xf32>
    %192 = arith.mulf %190, %191 : vector<8x8xf32>
    %c0_153 = arith.constant 0 : index
    %c0_154 = arith.constant 0 : index
    %193 = vector.load %arg17[%c0_153, %c0_154] : memref<8x8xf32, #tpu.memory_space<vmem>>, vector<8x8xf32>
    %194 = arith.addf %192, %193 : vector<8x8xf32>
    %cst_155 = arith.constant dense<0xFF800000> : vector<8xf32>
    %195 = vector.multi_reduction <maximumf>, %194, %cst_155 [1] : vector<8x8xf32> to vector<8xf32>
    %196 = vector.shape_cast %195 : vector<8xf32> to vector<8x1xf32>
    %197 = vector.broadcast %196 : vector<8x1xf32> to vector<8x8xf32>
    %198 = arith.subf %194, %197 : vector<8x8xf32>
    %199 = math.exp %198 : vector<8x8xf32>
    %cst_156 = arith.constant dense<0.000000e+00> : vector<8xf32>
    %200 = vector.multi_reduction <add>, %199, %cst_156 [1] : vector<8x8xf32> to vector<8xf32>
    %201 = vector.shape_cast %200 : vector<8xf32> to vector<8x1xf32>
    %202 = tpu.reciprocal %201 {approx = true} : vector<8x1xf32> -> vector<8x1xf32>
    %203 = vector.broadcast %202 : vector<8x1xf32> to vector<8x8xf32>
    %204 = arith.mulf %199, %203 : vector<8x8xf32>
    %c0_157 = arith.constant 0 : index
    %c0_158 = arith.constant 0 : index
    %205 = vector.load %arg8[%c0_157, %c0_158] : memref<3x3xf32, #tpu.memory_space<vmem>>, vector<3x3xf32>
    %cst_159 = arith.constant dense<0.000000e+00> : vector<8x3xf32>
    %206 = tpu.matmul %179, %205, %cst_159 {dimension_numbers = #tpu.dot_dimension_numbers<[1], [0], [0], [1], [0, 0, 1, 1], [], []>} : vector<8x3xf32>, vector<3x3xf32>, vector<8x3xf32> -> vector<8x3xf32>
    %c0_160 = arith.constant 0 : index
    %c0_161 = arith.constant 0 : index
    %207 = vector.load %arg9[%c0_160, %c0_161] : memref<1x3xf32, #tpu.memory_space<vmem>>, vector<1x3xf32>
    %208 = vector.broadcast %207 : vector<1x3xf32> to vector<8x3xf32>
    %209 = arith.addf %206, %208 : vector<8x3xf32>
    %cst_162 = arith.constant dense<0.000000e+00> : vector<8x3xf32>
    %210 = tpu.matmul %204, %209, %cst_162 {dimension_numbers = #tpu.dot_dimension_numbers<[1], [0], [0], [1], [0, 0, 1, 1], [], []>} : vector<8x8xf32>, vector<8x3xf32>, vector<8x3xf32> -> vector<8x3xf32>
    %c0_163 = arith.constant 0 : index
    %c0_164 = arith.constant 0 : index
    %211 = vector.load %arg10[%c0_163, %c0_164] : memref<3x3xf32, #tpu.memory_space<vmem>>, vector<3x3xf32>
    %cst_165 = arith.constant dense<0.000000e+00> : vector<8x3xf32>
    %212 = tpu.matmul %210, %211, %cst_165 {dimension_numbers = #tpu.dot_dimension_numbers<[1], [0], [0], [1], [0, 0, 1, 1], [], []>} : vector<8x3xf32>, vector<3x3xf32>, vector<8x3xf32> -> vector<8x3xf32>
    %c0_166 = arith.constant 0 : index
    %c0_167 = arith.constant 0 : index
    %213 = vector.load %arg11[%c0_166, %c0_167] : memref<1x3xf32, #tpu.memory_space<vmem>>, vector<1x3xf32>
    %214 = vector.broadcast %213 : vector<1x3xf32> to vector<8x3xf32>
    %215 = arith.addf %212, %214 : vector<8x3xf32>
    %cst_168 = arith.constant 1.000000e-01 : f32
    %216 = vector.broadcast %cst_168 : f32 to vector<8x3xf32>
    %217 = arith.mulf %216, %215 : vector<8x3xf32>
    %218 = arith.addf %179, %217 : vector<8x3xf32>
    %cst_169 = arith.constant 0.000000e+00 : f32
    %219 = vector.broadcast %cst_169 : f32 to vector<8x3xf32>
    %c0_170 = arith.constant 0 : index
    %c0_171 = arith.constant 0 : index
    %220 = vector.load %arg12[%c0_170, %c0_171] : memref<3x512xf32, #tpu.memory_space<vmem>>, vector<3x128xf32>
    %cst_172 = arith.constant dense<0.000000e+00> : vector<8x128xf32>
    %221 = tpu.matmul %218, %220, %cst_172 {dimension_numbers = #tpu.dot_dimension_numbers<[1], [0], [0], [1], [0, 0, 1, 1], [], []>} : vector<8x3xf32>, vector<3x128xf32>, vector<8x128xf32> -> vector<8x128xf32>
    %c0_173 = arith.constant 0 : index
    %c0_174 = arith.constant 0 : index
    %222 = vector.load %arg13[%c0_173, %c0_174] : memref<1x512xf32, #tpu.memory_space<vmem>>, vector<1x128xf32>
    %223 = vector.broadcast %222 : vector<1x128xf32> to vector<8x128xf32>
    %224 = arith.addf %221, %223 : vector<8x128xf32>
    %cst_175 = arith.constant 0.000000e+00 : f32
    %225 = vector.broadcast %cst_175 : f32 to vector<8x128xf32>
    %226 = arith.maximumf %224, %225 : vector<8x128xf32>
    %c0_176 = arith.constant 0 : index
    %c0_177 = arith.constant 0 : index
    %227 = vector.load %arg14[%c0_176, %c0_177] : memref<3x512xf32, #tpu.memory_space<vmem>>, vector<3x128xf32>
    %cst_178 = arith.constant dense<0.000000e+00> : vector<8x3xf32>
    %228 = tpu.matmul %226, %227, %cst_178 {dimension_numbers = #tpu.dot_dimension_numbers<[1], [1], [0], [0], [0, 0, 1, 0], [], []>} : vector<8x128xf32>, vector<3x128xf32>, vector<8x3xf32> -> vector<8x3xf32>
    %229 = arith.addf %219, %228 : vector<8x3xf32>
    %c0_179 = arith.constant 0 : index
    %c128_180 = arith.constant 128 : index
    %230 = vector.load %arg12[%c0_179, %c128_180] : memref<3x512xf32, #tpu.memory_space<vmem>>, vector<3x128xf32>
    %cst_181 = arith.constant dense<0.000000e+00> : vector<8x128xf32>
    %231 = tpu.matmul %218, %230, %cst_181 {dimension_numbers = #tpu.dot_dimension_numbers<[1], [0], [0], [1], [0, 0, 1, 1], [], []>} : vector<8x3xf32>, vector<3x128xf32>, vector<8x128xf32> -> vector<8x128xf32>
    %c0_182 = arith.constant 0 : index
    %c128_183 = arith.constant 128 : index
    %232 = vector.load %arg13[%c0_182, %c128_183] : memref<1x512xf32, #tpu.memory_space<vmem>>, vector<1x128xf32>
    %233 = vector.broadcast %232 : vector<1x128xf32> to vector<8x128xf32>
    %234 = arith.addf %231, %233 : vector<8x128xf32>
    %cst_184 = arith.constant 0.000000e+00 : f32
    %235 = vector.broadcast %cst_184 : f32 to vector<8x128xf32>
    %236 = arith.maximumf %234, %235 : vector<8x128xf32>
    %c0_185 = arith.constant 0 : index
    %c128_186 = arith.constant 128 : index
    %237 = vector.load %arg14[%c0_185, %c128_186] : memref<3x512xf32, #tpu.memory_space<vmem>>, vector<3x128xf32>
    %cst_187 = arith.constant dense<0.000000e+00> : vector<8x3xf32>
    %238 = tpu.matmul %236, %237, %cst_187 {dimension_numbers = #tpu.dot_dimension_numbers<[1], [1], [0], [0], [0, 0, 1, 0], [], []>} : vector<8x128xf32>, vector<3x128xf32>, vector<8x3xf32> -> vector<8x3xf32>
    %239 = arith.addf %229, %238 : vector<8x3xf32>
    %c0_188 = arith.constant 0 : index
    %c256_189 = arith.constant 256 : index
    %240 = vector.load %arg12[%c0_188, %c256_189] : memref<3x512xf32, #tpu.memory_space<vmem>>, vector<3x128xf32>
    %cst_190 = arith.constant dense<0.000000e+00> : vector<8x128xf32>
    %241 = tpu.matmul %218, %240, %cst_190 {dimension_numbers = #tpu.dot_dimension_numbers<[1], [0], [0], [1], [0, 0, 1, 1], [], []>} : vector<8x3xf32>, vector<3x128xf32>, vector<8x128xf32> -> vector<8x128xf32>
    %c0_191 = arith.constant 0 : index
    %c256_192 = arith.constant 256 : index
    %242 = vector.load %arg13[%c0_191, %c256_192] : memref<1x512xf32, #tpu.memory_space<vmem>>, vector<1x128xf32>
    %243 = vector.broadcast %242 : vector<1x128xf32> to vector<8x128xf32>
    %244 = arith.addf %241, %243 : vector<8x128xf32>
    %cst_193 = arith.constant 0.000000e+00 : f32
    %245 = vector.broadcast %cst_193 : f32 to vector<8x128xf32>
    %246 = arith.maximumf %244, %245 : vector<8x128xf32>
    %c0_194 = arith.constant 0 : index
    %c256_195 = arith.constant 256 : index
    %247 = vector.load %arg14[%c0_194, %c256_195] : memref<3x512xf32, #tpu.memory_space<vmem>>, vector<3x128xf32>
    %cst_196 = arith.constant dense<0.000000e+00> : vector<8x3xf32>
    %248 = tpu.matmul %246, %247, %cst_196 {dimension_numbers = #tpu.dot_dimension_numbers<[1], [1], [0], [0], [0, 0, 1, 0], [], []>} : vector<8x128xf32>, vector<3x128xf32>, vector<8x3xf32> -> vector<8x3xf32>
    %249 = arith.addf %239, %248 : vector<8x3xf32>
    %c0_197 = arith.constant 0 : index
    %c384_198 = arith.constant 384 : index
    %250 = vector.load %arg12[%c0_197, %c384_198] : memref<3x512xf32, #tpu.memory_space<vmem>>, vector<3x128xf32>
    %cst_199 = arith.constant dense<0.000000e+00> : vector<8x128xf32>
    %251 = tpu.matmul %218, %250, %cst_199 {dimension_numbers = #tpu.dot_dimension_numbers<[1], [0], [0], [1], [0, 0, 1, 1], [], []>} : vector<8x3xf32>, vector<3x128xf32>, vector<8x128xf32> -> vector<8x128xf32>
    %c0_200 = arith.constant 0 : index
    %c384_201 = arith.constant 384 : index
    %252 = vector.load %arg13[%c0_200, %c384_201] : memref<1x512xf32, #tpu.memory_space<vmem>>, vector<1x128xf32>
    %253 = vector.broadcast %252 : vector<1x128xf32> to vector<8x128xf32>
    %254 = arith.addf %251, %253 : vector<8x128xf32>
    %cst_202 = arith.constant 0.000000e+00 : f32
    %255 = vector.broadcast %cst_202 : f32 to vector<8x128xf32>
    %256 = arith.maximumf %254, %255 : vector<8x128xf32>
    %c0_203 = arith.constant 0 : index
    %c384_204 = arith.constant 384 : index
    %257 = vector.load %arg14[%c0_203, %c384_204] : memref<3x512xf32, #tpu.memory_space<vmem>>, vector<3x128xf32>
    %cst_205 = arith.constant dense<0.000000e+00> : vector<8x3xf32>
    %258 = tpu.matmul %256, %257, %cst_205 {dimension_numbers = #tpu.dot_dimension_numbers<[1], [1], [0], [0], [0, 0, 1, 0], [], []>} : vector<8x128xf32>, vector<3x128xf32>, vector<8x3xf32> -> vector<8x3xf32>
    %259 = arith.addf %249, %258 : vector<8x3xf32>
    %c0_206 = arith.constant 0 : index
    %c0_207 = arith.constant 0 : index
    %260 = vector.load %arg15[%c0_206, %c0_207] : memref<1x3xf32, #tpu.memory_space<vmem>>, vector<1x3xf32>
    %261 = vector.broadcast %260 : vector<1x3xf32> to vector<8x3xf32>
    %262 = arith.addf %259, %261 : vector<8x3xf32>
    %cst_208 = arith.constant 1.000000e-01 : f32
    %263 = vector.broadcast %cst_208 : f32 to vector<8x3xf32>
    %264 = arith.mulf %263, %262 : vector<8x3xf32>
    %265 = arith.addf %218, %264 : vector<8x3xf32>
    %c3_i32 = arith.constant 3 : i32
    %c0_209 = arith.constant 0 : index
    %c0_210 = arith.constant 0 : index
    %266 = vector.load %arg4[%c0_209, %c0_210] : memref<3x3xf32, #tpu.memory_space<vmem>>, vector<3x3xf32>
    %cst_211 = arith.constant dense<0.000000e+00> : vector<8x3xf32>
    %267 = tpu.matmul %265, %266, %cst_211 {dimension_numbers = #tpu.dot_dimension_numbers<[1], [0], [0], [1], [0, 0, 1, 1], [], []>} : vector<8x3xf32>, vector<3x3xf32>, vector<8x3xf32> -> vector<8x3xf32>
    %c0_212 = arith.constant 0 : index
    %c0_213 = arith.constant 0 : index
    %268 = vector.load %arg5[%c0_212, %c0_213] : memref<1x3xf32, #tpu.memory_space<vmem>>, vector<1x3xf32>
    %269 = vector.broadcast %268 : vector<1x3xf32> to vector<8x3xf32>
    %270 = arith.addf %267, %269 : vector<8x3xf32>
    %c0_214 = arith.constant 0 : index
    %c0_215 = arith.constant 0 : index
    %271 = vector.load %arg6[%c0_214, %c0_215] : memref<3x3xf32, #tpu.memory_space<vmem>>, vector<3x3xf32>
    %cst_216 = arith.constant dense<0.000000e+00> : vector<8x3xf32>
    %272 = tpu.matmul %265, %271, %cst_216 {dimension_numbers = #tpu.dot_dimension_numbers<[1], [0], [0], [1], [0, 0, 1, 1], [], []>} : vector<8x3xf32>, vector<3x3xf32>, vector<8x3xf32> -> vector<8x3xf32>
    %c0_217 = arith.constant 0 : index
    %c0_218 = arith.constant 0 : index
    %273 = vector.load %arg7[%c0_217, %c0_218] : memref<1x3xf32, #tpu.memory_space<vmem>>, vector<1x3xf32>
    %274 = vector.broadcast %273 : vector<1x3xf32> to vector<8x3xf32>
    %275 = arith.addf %272, %274 : vector<8x3xf32>
    %cst_219 = arith.constant dense<0.000000e+00> : vector<8x8xf32>
    %276 = tpu.matmul %270, %275, %cst_219 {dimension_numbers = #tpu.dot_dimension_numbers<[1], [1], [0], [0], [0, 0, 1, 0], [], []>} : vector<8x3xf32>, vector<8x3xf32>, vector<8x8xf32> -> vector<8x8xf32>
    %cst_220 = arith.constant 0.577350259 : f32
    %277 = vector.broadcast %cst_220 : f32 to vector<8x8xf32>
    %278 = arith.mulf %276, %277 : vector<8x8xf32>
    %c0_221 = arith.constant 0 : index
    %c0_222 = arith.constant 0 : index
    %279 = vector.load %arg17[%c0_221, %c0_222] : memref<8x8xf32, #tpu.memory_space<vmem>>, vector<8x8xf32>
    %280 = arith.addf %278, %279 : vector<8x8xf32>
    %cst_223 = arith.constant dense<0xFF800000> : vector<8xf32>
    %281 = vector.multi_reduction <maximumf>, %280, %cst_223 [1] : vector<8x8xf32> to vector<8xf32>
    %282 = vector.shape_cast %281 : vector<8xf32> to vector<8x1xf32>
    %283 = vector.broadcast %282 : vector<8x1xf32> to vector<8x8xf32>
    %284 = arith.subf %280, %283 : vector<8x8xf32>
    %285 = math.exp %284 : vector<8x8xf32>
    %cst_224 = arith.constant dense<0.000000e+00> : vector<8xf32>
    %286 = vector.multi_reduction <add>, %285, %cst_224 [1] : vector<8x8xf32> to vector<8xf32>
    %287 = vector.shape_cast %286 : vector<8xf32> to vector<8x1xf32>
    %288 = tpu.reciprocal %287 {approx = true} : vector<8x1xf32> -> vector<8x1xf32>
    %289 = vector.broadcast %288 : vector<8x1xf32> to vector<8x8xf32>
    %290 = arith.mulf %285, %289 : vector<8x8xf32>
    %c0_225 = arith.constant 0 : index
    %c0_226 = arith.constant 0 : index
    %291 = vector.load %arg8[%c0_225, %c0_226] : memref<3x3xf32, #tpu.memory_space<vmem>>, vector<3x3xf32>
    %cst_227 = arith.constant dense<0.000000e+00> : vector<8x3xf32>
    %292 = tpu.matmul %265, %291, %cst_227 {dimension_numbers = #tpu.dot_dimension_numbers<[1], [0], [0], [1], [0, 0, 1, 1], [], []>} : vector<8x3xf32>, vector<3x3xf32>, vector<8x3xf32> -> vector<8x3xf32>
    %c0_228 = arith.constant 0 : index
    %c0_229 = arith.constant 0 : index
    %293 = vector.load %arg9[%c0_228, %c0_229] : memref<1x3xf32, #tpu.memory_space<vmem>>, vector<1x3xf32>
    %294 = vector.broadcast %293 : vector<1x3xf32> to vector<8x3xf32>
    %295 = arith.addf %292, %294 : vector<8x3xf32>
    %cst_230 = arith.constant dense<0.000000e+00> : vector<8x3xf32>
    %296 = tpu.matmul %290, %295, %cst_230 {dimension_numbers = #tpu.dot_dimension_numbers<[1], [0], [0], [1], [0, 0, 1, 1], [], []>} : vector<8x8xf32>, vector<8x3xf32>, vector<8x3xf32> -> vector<8x3xf32>
    %c0_231 = arith.constant 0 : index
    %c0_232 = arith.constant 0 : index
    %297 = vector.load %arg10[%c0_231, %c0_232] : memref<3x3xf32, #tpu.memory_space<vmem>>, vector<3x3xf32>
    %cst_233 = arith.constant dense<0.000000e+00> : vector<8x3xf32>
    %298 = tpu.matmul %296, %297, %cst_233 {dimension_numbers = #tpu.dot_dimension_numbers<[1], [0], [0], [1], [0, 0, 1, 1], [], []>} : vector<8x3xf32>, vector<3x3xf32>, vector<8x3xf32> -> vector<8x3xf32>
    %c0_234 = arith.constant 0 : index
    %c0_235 = arith.constant 0 : index
    %299 = vector.load %arg11[%c0_234, %c0_235] : memref<1x3xf32, #tpu.memory_space<vmem>>, vector<1x3xf32>
    %300 = vector.broadcast %299 : vector<1x3xf32> to vector<8x3xf32>
    %301 = arith.addf %298, %300 : vector<8x3xf32>
    %cst_236 = arith.constant 1.000000e-01 : f32
    %302 = vector.broadcast %cst_236 : f32 to vector<8x3xf32>
    %303 = arith.mulf %302, %301 : vector<8x3xf32>
    %304 = arith.addf %265, %303 : vector<8x3xf32>
    %cst_237 = arith.constant 0.000000e+00 : f32
    %305 = vector.broadcast %cst_237 : f32 to vector<8x3xf32>
    %c0_238 = arith.constant 0 : index
    %c0_239 = arith.constant 0 : index
    %306 = vector.load %arg12[%c0_238, %c0_239] : memref<3x512xf32, #tpu.memory_space<vmem>>, vector<3x128xf32>
    %cst_240 = arith.constant dense<0.000000e+00> : vector<8x128xf32>
    %307 = tpu.matmul %304, %306, %cst_240 {dimension_numbers = #tpu.dot_dimension_numbers<[1], [0], [0], [1], [0, 0, 1, 1], [], []>} : vector<8x3xf32>, vector<3x128xf32>, vector<8x128xf32> -> vector<8x128xf32>
    %c0_241 = arith.constant 0 : index
    %c0_242 = arith.constant 0 : index
    %308 = vector.load %arg13[%c0_241, %c0_242] : memref<1x512xf32, #tpu.memory_space<vmem>>, vector<1x128xf32>
    %309 = vector.broadcast %308 : vector<1x128xf32> to vector<8x128xf32>
    %310 = arith.addf %307, %309 : vector<8x128xf32>
    %cst_243 = arith.constant 0.000000e+00 : f32
    %311 = vector.broadcast %cst_243 : f32 to vector<8x128xf32>
    %312 = arith.maximumf %310, %311 : vector<8x128xf32>
    %c0_244 = arith.constant 0 : index
    %c0_245 = arith.constant 0 : index
    %313 = vector.load %arg14[%c0_244, %c0_245] : memref<3x512xf32, #tpu.memory_space<vmem>>, vector<3x128xf32>
    %cst_246 = arith.constant dense<0.000000e+00> : vector<8x3xf32>
    %314 = tpu.matmul %312, %313, %cst_246 {dimension_numbers = #tpu.dot_dimension_numbers<[1], [1], [0], [0], [0, 0, 1, 0], [], []>} : vector<8x128xf32>, vector<3x128xf32>, vector<8x3xf32> -> vector<8x3xf32>
    %315 = arith.addf %305, %314 : vector<8x3xf32>
    %c0_247 = arith.constant 0 : index
    %c128_248 = arith.constant 128 : index
    %316 = vector.load %arg12[%c0_247, %c128_248] : memref<3x512xf32, #tpu.memory_space<vmem>>, vector<3x128xf32>
    %cst_249 = arith.constant dense<0.000000e+00> : vector<8x128xf32>
    %317 = tpu.matmul %304, %316, %cst_249 {dimension_numbers = #tpu.dot_dimension_numbers<[1], [0], [0], [1], [0, 0, 1, 1], [], []>} : vector<8x3xf32>, vector<3x128xf32>, vector<8x128xf32> -> vector<8x128xf32>
    %c0_250 = arith.constant 0 : index
    %c128_251 = arith.constant 128 : index
    %318 = vector.load %arg13[%c0_250, %c128_251] : memref<1x512xf32, #tpu.memory_space<vmem>>, vector<1x128xf32>
    %319 = vector.broadcast %318 : vector<1x128xf32> to vector<8x128xf32>
    %320 = arith.addf %317, %319 : vector<8x128xf32>
    %cst_252 = arith.constant 0.000000e+00 : f32
    %321 = vector.broadcast %cst_252 : f32 to vector<8x128xf32>
    %322 = arith.maximumf %320, %321 : vector<8x128xf32>
    %c0_253 = arith.constant 0 : index
    %c128_254 = arith.constant 128 : index
    %323 = vector.load %arg14[%c0_253, %c128_254] : memref<3x512xf32, #tpu.memory_space<vmem>>, vector<3x128xf32>
    %cst_255 = arith.constant dense<0.000000e+00> : vector<8x3xf32>
    %324 = tpu.matmul %322, %323, %cst_255 {dimension_numbers = #tpu.dot_dimension_numbers<[1], [1], [0], [0], [0, 0, 1, 0], [], []>} : vector<8x128xf32>, vector<3x128xf32>, vector<8x3xf32> -> vector<8x3xf32>
    %325 = arith.addf %315, %324 : vector<8x3xf32>
    %c0_256 = arith.constant 0 : index
    %c256_257 = arith.constant 256 : index
    %326 = vector.load %arg12[%c0_256, %c256_257] : memref<3x512xf32, #tpu.memory_space<vmem>>, vector<3x128xf32>
    %cst_258 = arith.constant dense<0.000000e+00> : vector<8x128xf32>
    %327 = tpu.matmul %304, %326, %cst_258 {dimension_numbers = #tpu.dot_dimension_numbers<[1], [0], [0], [1], [0, 0, 1, 1], [], []>} : vector<8x3xf32>, vector<3x128xf32>, vector<8x128xf32> -> vector<8x128xf32>
    %c0_259 = arith.constant 0 : index
    %c256_260 = arith.constant 256 : index
    %328 = vector.load %arg13[%c0_259, %c256_260] : memref<1x512xf32, #tpu.memory_space<vmem>>, vector<1x128xf32>
    %329 = vector.broadcast %328 : vector<1x128xf32> to vector<8x128xf32>
    %330 = arith.addf %327, %329 : vector<8x128xf32>
    %cst_261 = arith.constant 0.000000e+00 : f32
    %331 = vector.broadcast %cst_261 : f32 to vector<8x128xf32>
    %332 = arith.maximumf %330, %331 : vector<8x128xf32>
    %c0_262 = arith.constant 0 : index
    %c256_263 = arith.constant 256 : index
    %333 = vector.load %arg14[%c0_262, %c256_263] : memref<3x512xf32, #tpu.memory_space<vmem>>, vector<3x128xf32>
    %cst_264 = arith.constant dense<0.000000e+00> : vector<8x3xf32>
    %334 = tpu.matmul %332, %333, %cst_264 {dimension_numbers = #tpu.dot_dimension_numbers<[1], [1], [0], [0], [0, 0, 1, 0], [], []>} : vector<8x128xf32>, vector<3x128xf32>, vector<8x3xf32> -> vector<8x3xf32>
    %335 = arith.addf %325, %334 : vector<8x3xf32>
    %c0_265 = arith.constant 0 : index
    %c384_266 = arith.constant 384 : index
    %336 = vector.load %arg12[%c0_265, %c384_266] : memref<3x512xf32, #tpu.memory_space<vmem>>, vector<3x128xf32>
    %cst_267 = arith.constant dense<0.000000e+00> : vector<8x128xf32>
    %337 = tpu.matmul %304, %336, %cst_267 {dimension_numbers = #tpu.dot_dimension_numbers<[1], [0], [0], [1], [0, 0, 1, 1], [], []>} : vector<8x3xf32>, vector<3x128xf32>, vector<8x128xf32> -> vector<8x128xf32>
    %c0_268 = arith.constant 0 : index
    %c384_269 = arith.constant 384 : index
    %338 = vector.load %arg13[%c0_268, %c384_269] : memref<1x512xf32, #tpu.memory_space<vmem>>, vector<1x128xf32>
    %339 = vector.broadcast %338 : vector<1x128xf32> to vector<8x128xf32>
    %340 = arith.addf %337, %339 : vector<8x128xf32>
    %cst_270 = arith.constant 0.000000e+00 : f32
    %341 = vector.broadcast %cst_270 : f32 to vector<8x128xf32>
    %342 = arith.maximumf %340, %341 : vector<8x128xf32>
    %c0_271 = arith.constant 0 : index
    %c384_272 = arith.constant 384 : index
    %343 = vector.load %arg14[%c0_271, %c384_272] : memref<3x512xf32, #tpu.memory_space<vmem>>, vector<3x128xf32>
    %cst_273 = arith.constant dense<0.000000e+00> : vector<8x3xf32>
    %344 = tpu.matmul %342, %343, %cst_273 {dimension_numbers = #tpu.dot_dimension_numbers<[1], [1], [0], [0], [0, 0, 1, 0], [], []>} : vector<8x128xf32>, vector<3x128xf32>, vector<8x3xf32> -> vector<8x3xf32>
    %345 = arith.addf %335, %344 : vector<8x3xf32>
    %c0_274 = arith.constant 0 : index
    %c0_275 = arith.constant 0 : index
    %346 = vector.load %arg15[%c0_274, %c0_275] : memref<1x3xf32, #tpu.memory_space<vmem>>, vector<1x3xf32>
    %347 = vector.broadcast %346 : vector<1x3xf32> to vector<8x3xf32>
    %348 = arith.addf %345, %347 : vector<8x3xf32>
    %cst_276 = arith.constant 1.000000e-01 : f32
    %349 = vector.broadcast %cst_276 : f32 to vector<8x3xf32>
    %350 = arith.mulf %349, %348 : vector<8x3xf32>
    %351 = arith.addf %304, %350 : vector<8x3xf32>
    %c4_i32 = arith.constant 4 : i32
    %c0_277 = arith.constant 0 : index
    %c0_278 = arith.constant 0 : index
    %352 = vector.load %arg4[%c0_277, %c0_278] : memref<3x3xf32, #tpu.memory_space<vmem>>, vector<3x3xf32>
    %cst_279 = arith.constant dense<0.000000e+00> : vector<8x3xf32>
    %353 = tpu.matmul %351, %352, %cst_279 {dimension_numbers = #tpu.dot_dimension_numbers<[1], [0], [0], [1], [0, 0, 1, 1], [], []>} : vector<8x3xf32>, vector<3x3xf32>, vector<8x3xf32> -> vector<8x3xf32>
    %c0_280 = arith.constant 0 : index
    %c0_281 = arith.constant 0 : index
    %354 = vector.load %arg5[%c0_280, %c0_281] : memref<1x3xf32, #tpu.memory_space<vmem>>, vector<1x3xf32>
    %355 = vector.broadcast %354 : vector<1x3xf32> to vector<8x3xf32>
    %356 = arith.addf %353, %355 : vector<8x3xf32>
    %c0_282 = arith.constant 0 : index
    %c0_283 = arith.constant 0 : index
    %357 = vector.load %arg6[%c0_282, %c0_283] : memref<3x3xf32, #tpu.memory_space<vmem>>, vector<3x3xf32>
    %cst_284 = arith.constant dense<0.000000e+00> : vector<8x3xf32>
    %358 = tpu.matmul %351, %357, %cst_284 {dimension_numbers = #tpu.dot_dimension_numbers<[1], [0], [0], [1], [0, 0, 1, 1], [], []>} : vector<8x3xf32>, vector<3x3xf32>, vector<8x3xf32> -> vector<8x3xf32>
    %c0_285 = arith.constant 0 : index
    %c0_286 = arith.constant 0 : index
    %359 = vector.load %arg7[%c0_285, %c0_286] : memref<1x3xf32, #tpu.memory_space<vmem>>, vector<1x3xf32>
    %360 = vector.broadcast %359 : vector<1x3xf32> to vector<8x3xf32>
    %361 = arith.addf %358, %360 : vector<8x3xf32>
    %cst_287 = arith.constant dense<0.000000e+00> : vector<8x8xf32>
    %362 = tpu.matmul %356, %361, %cst_287 {dimension_numbers = #tpu.dot_dimension_numbers<[1], [1], [0], [0], [0, 0, 1, 0], [], []>} : vector<8x3xf32>, vector<8x3xf32>, vector<8x8xf32> -> vector<8x8xf32>
    %cst_288 = arith.constant 0.577350259 : f32
    %363 = vector.broadcast %cst_288 : f32 to vector<8x8xf32>
    %364 = arith.mulf %362, %363 : vector<8x8xf32>
    %c0_289 = arith.constant 0 : index
    %c0_290 = arith.constant 0 : index
    %365 = vector.load %arg17[%c0_289, %c0_290] : memref<8x8xf32, #tpu.memory_space<vmem>>, vector<8x8xf32>
    %366 = arith.addf %364, %365 : vector<8x8xf32>
    %cst_291 = arith.constant dense<0xFF800000> : vector<8xf32>
    %367 = vector.multi_reduction <maximumf>, %366, %cst_291 [1] : vector<8x8xf32> to vector<8xf32>
    %368 = vector.shape_cast %367 : vector<8xf32> to vector<8x1xf32>
    %369 = vector.broadcast %368 : vector<8x1xf32> to vector<8x8xf32>
    %370 = arith.subf %366, %369 : vector<8x8xf32>
    %371 = math.exp %370 : vector<8x8xf32>
    %cst_292 = arith.constant dense<0.000000e+00> : vector<8xf32>
    %372 = vector.multi_reduction <add>, %371, %cst_292 [1] : vector<8x8xf32> to vector<8xf32>
    %373 = vector.shape_cast %372 : vector<8xf32> to vector<8x1xf32>
    %374 = tpu.reciprocal %373 {approx = true} : vector<8x1xf32> -> vector<8x1xf32>
    %375 = vector.broadcast %374 : vector<8x1xf32> to vector<8x8xf32>
    %376 = arith.mulf %371, %375 : vector<8x8xf32>
    %c0_293 = arith.constant 0 : index
    %c0_294 = arith.constant 0 : index
    %377 = vector.load %arg8[%c0_293, %c0_294] : memref<3x3xf32, #tpu.memory_space<vmem>>, vector<3x3xf32>
    %cst_295 = arith.constant dense<0.000000e+00> : vector<8x3xf32>
    %378 = tpu.matmul %351, %377, %cst_295 {dimension_numbers = #tpu.dot_dimension_numbers<[1], [0], [0], [1], [0, 0, 1, 1], [], []>} : vector<8x3xf32>, vector<3x3xf32>, vector<8x3xf32> -> vector<8x3xf32>
    %c0_296 = arith.constant 0 : index
    %c0_297 = arith.constant 0 : index
    %379 = vector.load %arg9[%c0_296, %c0_297] : memref<1x3xf32, #tpu.memory_space<vmem>>, vector<1x3xf32>
    %380 = vector.broadcast %379 : vector<1x3xf32> to vector<8x3xf32>
    %381 = arith.addf %378, %380 : vector<8x3xf32>
    %cst_298 = arith.constant dense<0.000000e+00> : vector<8x3xf32>
    %382 = tpu.matmul %376, %381, %cst_298 {dimension_numbers = #tpu.dot_dimension_numbers<[1], [0], [0], [1], [0, 0, 1, 1], [], []>} : vector<8x8xf32>, vector<8x3xf32>, vector<8x3xf32> -> vector<8x3xf32>
    %c0_299 = arith.constant 0 : index
    %c0_300 = arith.constant 0 : index
    %383 = vector.load %arg10[%c0_299, %c0_300] : memref<3x3xf32, #tpu.memory_space<vmem>>, vector<3x3xf32>
    %cst_301 = arith.constant dense<0.000000e+00> : vector<8x3xf32>
    %384 = tpu.matmul %382, %383, %cst_301 {dimension_numbers = #tpu.dot_dimension_numbers<[1], [0], [0], [1], [0, 0, 1, 1], [], []>} : vector<8x3xf32>, vector<3x3xf32>, vector<8x3xf32> -> vector<8x3xf32>
    %c0_302 = arith.constant 0 : index
    %c0_303 = arith.constant 0 : index
    %385 = vector.load %arg11[%c0_302, %c0_303] : memref<1x3xf32, #tpu.memory_space<vmem>>, vector<1x3xf32>
    %386 = vector.broadcast %385 : vector<1x3xf32> to vector<8x3xf32>
    %387 = arith.addf %384, %386 : vector<8x3xf32>
    %cst_304 = arith.constant 1.000000e-01 : f32
    %388 = vector.broadcast %cst_304 : f32 to vector<8x3xf32>
    %389 = arith.mulf %388, %387 : vector<8x3xf32>
    %390 = arith.addf %351, %389 : vector<8x3xf32>
    %cst_305 = arith.constant 0.000000e+00 : f32
    %391 = vector.broadcast %cst_305 : f32 to vector<8x3xf32>
    %c0_306 = arith.constant 0 : index
    %c0_307 = arith.constant 0 : index
    %392 = vector.load %arg12[%c0_306, %c0_307] : memref<3x512xf32, #tpu.memory_space<vmem>>, vector<3x128xf32>
    %cst_308 = arith.constant dense<0.000000e+00> : vector<8x128xf32>
    %393 = tpu.matmul %390, %392, %cst_308 {dimension_numbers = #tpu.dot_dimension_numbers<[1], [0], [0], [1], [0, 0, 1, 1], [], []>} : vector<8x3xf32>, vector<3x128xf32>, vector<8x128xf32> -> vector<8x128xf32>
    %c0_309 = arith.constant 0 : index
    %c0_310 = arith.constant 0 : index
    %394 = vector.load %arg13[%c0_309, %c0_310] : memref<1x512xf32, #tpu.memory_space<vmem>>, vector<1x128xf32>
    %395 = vector.broadcast %394 : vector<1x128xf32> to vector<8x128xf32>
    %396 = arith.addf %393, %395 : vector<8x128xf32>
    %cst_311 = arith.constant 0.000000e+00 : f32
    %397 = vector.broadcast %cst_311 : f32 to vector<8x128xf32>
    %398 = arith.maximumf %396, %397 : vector<8x128xf32>
    %c0_312 = arith.constant 0 : index
    %c0_313 = arith.constant 0 : index
    %399 = vector.load %arg14[%c0_312, %c0_313] : memref<3x512xf32, #tpu.memory_space<vmem>>, vector<3x128xf32>
    %cst_314 = arith.constant dense<0.000000e+00> : vector<8x3xf32>
    %400 = tpu.matmul %398, %399, %cst_314 {dimension_numbers = #tpu.dot_dimension_numbers<[1], [1], [0], [0], [0, 0, 1, 0], [], []>} : vector<8x128xf32>, vector<3x128xf32>, vector<8x3xf32> -> vector<8x3xf32>
    %401 = arith.addf %391, %400 : vector<8x3xf32>
    %c0_315 = arith.constant 0 : index
    %c128_316 = arith.constant 128 : index
    %402 = vector.load %arg12[%c0_315, %c128_316] : memref<3x512xf32, #tpu.memory_space<vmem>>, vector<3x128xf32>
    %cst_317 = arith.constant dense<0.000000e+00> : vector<8x128xf32>
    %403 = tpu.matmul %390, %402, %cst_317 {dimension_numbers = #tpu.dot_dimension_numbers<[1], [0], [0], [1], [0, 0, 1, 1], [], []>} : vector<8x3xf32>, vector<3x128xf32>, vector<8x128xf32> -> vector<8x128xf32>
    %c0_318 = arith.constant 0 : index
    %c128_319 = arith.constant 128 : index
    %404 = vector.load %arg13[%c0_318, %c128_319] : memref<1x512xf32, #tpu.memory_space<vmem>>, vector<1x128xf32>
    %405 = vector.broadcast %404 : vector<1x128xf32> to vector<8x128xf32>
    %406 = arith.addf %403, %405 : vector<8x128xf32>
    %cst_320 = arith.constant 0.000000e+00 : f32
    %407 = vector.broadcast %cst_320 : f32 to vector<8x128xf32>
    %408 = arith.maximumf %406, %407 : vector<8x128xf32>
    %c0_321 = arith.constant 0 : index
    %c128_322 = arith.constant 128 : index
    %409 = vector.load %arg14[%c0_321, %c128_322] : memref<3x512xf32, #tpu.memory_space<vmem>>, vector<3x128xf32>
    %cst_323 = arith.constant dense<0.000000e+00> : vector<8x3xf32>
    %410 = tpu.matmul %408, %409, %cst_323 {dimension_numbers = #tpu.dot_dimension_numbers<[1], [1], [0], [0], [0, 0, 1, 0], [], []>} : vector<8x128xf32>, vector<3x128xf32>, vector<8x3xf32> -> vector<8x3xf32>
    %411 = arith.addf %401, %410 : vector<8x3xf32>
    %c0_324 = arith.constant 0 : index
    %c256_325 = arith.constant 256 : index
    %412 = vector.load %arg12[%c0_324, %c256_325] : memref<3x512xf32, #tpu.memory_space<vmem>>, vector<3x128xf32>
    %cst_326 = arith.constant dense<0.000000e+00> : vector<8x128xf32>
    %413 = tpu.matmul %390, %412, %cst_326 {dimension_numbers = #tpu.dot_dimension_numbers<[1], [0], [0], [1], [0, 0, 1, 1], [], []>} : vector<8x3xf32>, vector<3x128xf32>, vector<8x128xf32> -> vector<8x128xf32>
    %c0_327 = arith.constant 0 : index
    %c256_328 = arith.constant 256 : index
    %414 = vector.load %arg13[%c0_327, %c256_328] : memref<1x512xf32, #tpu.memory_space<vmem>>, vector<1x128xf32>
    %415 = vector.broadcast %414 : vector<1x128xf32> to vector<8x128xf32>
    %416 = arith.addf %413, %415 : vector<8x128xf32>
    %cst_329 = arith.constant 0.000000e+00 : f32
    %417 = vector.broadcast %cst_329 : f32 to vector<8x128xf32>
    %418 = arith.maximumf %416, %417 : vector<8x128xf32>
    %c0_330 = arith.constant 0 : index
    %c256_331 = arith.constant 256 : index
    %419 = vector.load %arg14[%c0_330, %c256_331] : memref<3x512xf32, #tpu.memory_space<vmem>>, vector<3x128xf32>
    %cst_332 = arith.constant dense<0.000000e+00> : vector<8x3xf32>
    %420 = tpu.matmul %418, %419, %cst_332 {dimension_numbers = #tpu.dot_dimension_numbers<[1], [1], [0], [0], [0, 0, 1, 0], [], []>} : vector<8x128xf32>, vector<3x128xf32>, vector<8x3xf32> -> vector<8x3xf32>
    %421 = arith.addf %411, %420 : vector<8x3xf32>
    %c0_333 = arith.constant 0 : index
    %c384_334 = arith.constant 384 : index
    %422 = vector.load %arg12[%c0_333, %c384_334] : memref<3x512xf32, #tpu.memory_space<vmem>>, vector<3x128xf32>
    %cst_335 = arith.constant dense<0.000000e+00> : vector<8x128xf32>
    %423 = tpu.matmul %390, %422, %cst_335 {dimension_numbers = #tpu.dot_dimension_numbers<[1], [0], [0], [1], [0, 0, 1, 1], [], []>} : vector<8x3xf32>, vector<3x128xf32>, vector<8x128xf32> -> vector<8x128xf32>
    %c0_336 = arith.constant 0 : index
    %c384_337 = arith.constant 384 : index
    %424 = vector.load %arg13[%c0_336, %c384_337] : memref<1x512xf32, #tpu.memory_space<vmem>>, vector<1x128xf32>
    %425 = vector.broadcast %424 : vector<1x128xf32> to vector<8x128xf32>
    %426 = arith.addf %423, %425 : vector<8x128xf32>
    %cst_338 = arith.constant 0.000000e+00 : f32
    %427 = vector.broadcast %cst_338 : f32 to vector<8x128xf32>
    %428 = arith.maximumf %426, %427 : vector<8x128xf32>
    %c0_339 = arith.constant 0 : index
    %c384_340 = arith.constant 384 : index
    %429 = vector.load %arg14[%c0_339, %c384_340] : memref<3x512xf32, #tpu.memory_space<vmem>>, vector<3x128xf32>
    %cst_341 = arith.constant dense<0.000000e+00> : vector<8x3xf32>
    %430 = tpu.matmul %428, %429, %cst_341 {dimension_numbers = #tpu.dot_dimension_numbers<[1], [1], [0], [0], [0, 0, 1, 0], [], []>} : vector<8x128xf32>, vector<3x128xf32>, vector<8x3xf32> -> vector<8x3xf32>
    %431 = arith.addf %421, %430 : vector<8x3xf32>
    %c0_342 = arith.constant 0 : index
    %c0_343 = arith.constant 0 : index
    %432 = vector.load %arg15[%c0_342, %c0_343] : memref<1x3xf32, #tpu.memory_space<vmem>>, vector<1x3xf32>
    %433 = vector.broadcast %432 : vector<1x3xf32> to vector<8x3xf32>
    %434 = arith.addf %431, %433 : vector<8x3xf32>
    %cst_344 = arith.constant 1.000000e-01 : f32
    %435 = vector.broadcast %cst_344 : f32 to vector<8x3xf32>
    %436 = arith.mulf %435, %434 : vector<8x3xf32>
    %437 = arith.addf %390, %436 : vector<8x3xf32>
    %c5_i32 = arith.constant 5 : i32
    %c0_345 = arith.constant 0 : index
    %c0_346 = arith.constant 0 : index
    %438 = vector.load %arg4[%c0_345, %c0_346] : memref<3x3xf32, #tpu.memory_space<vmem>>, vector<3x3xf32>
    %cst_347 = arith.constant dense<0.000000e+00> : vector<8x3xf32>
    %439 = tpu.matmul %437, %438, %cst_347 {dimension_numbers = #tpu.dot_dimension_numbers<[1], [0], [0], [1], [0, 0, 1, 1], [], []>} : vector<8x3xf32>, vector<3x3xf32>, vector<8x3xf32> -> vector<8x3xf32>
    %c0_348 = arith.constant 0 : index
    %c0_349 = arith.constant 0 : index
    %440 = vector.load %arg5[%c0_348, %c0_349] : memref<1x3xf32, #tpu.memory_space<vmem>>, vector<1x3xf32>
    %441 = vector.broadcast %440 : vector<1x3xf32> to vector<8x3xf32>
    %442 = arith.addf %439, %441 : vector<8x3xf32>
    %c0_350 = arith.constant 0 : index
    %c0_351 = arith.constant 0 : index
    %443 = vector.load %arg6[%c0_350, %c0_351] : memref<3x3xf32, #tpu.memory_space<vmem>>, vector<3x3xf32>
    %cst_352 = arith.constant dense<0.000000e+00> : vector<8x3xf32>
    %444 = tpu.matmul %437, %443, %cst_352 {dimension_numbers = #tpu.dot_dimension_numbers<[1], [0], [0], [1], [0, 0, 1, 1], [], []>} : vector<8x3xf32>, vector<3x3xf32>, vector<8x3xf32> -> vector<8x3xf32>
    %c0_353 = arith.constant 0 : index
    %c0_354 = arith.constant 0 : index
    %445 = vector.load %arg7[%c0_353, %c0_354] : memref<1x3xf32, #tpu.memory_space<vmem>>, vector<1x3xf32>
    %446 = vector.broadcast %445 : vector<1x3xf32> to vector<8x3xf32>
    %447 = arith.addf %444, %446 : vector<8x3xf32>
    %cst_355 = arith.constant dense<0.000000e+00> : vector<8x8xf32>
    %448 = tpu.matmul %442, %447, %cst_355 {dimension_numbers = #tpu.dot_dimension_numbers<[1], [1], [0], [0], [0, 0, 1, 0], [], []>} : vector<8x3xf32>, vector<8x3xf32>, vector<8x8xf32> -> vector<8x8xf32>
    %cst_356 = arith.constant 0.577350259 : f32
    %449 = vector.broadcast %cst_356 : f32 to vector<8x8xf32>
    %450 = arith.mulf %448, %449 : vector<8x8xf32>
    %c0_357 = arith.constant 0 : index
    %c0_358 = arith.constant 0 : index
    %451 = vector.load %arg17[%c0_357, %c0_358] : memref<8x8xf32, #tpu.memory_space<vmem>>, vector<8x8xf32>
    %452 = arith.addf %450, %451 : vector<8x8xf32>
    %cst_359 = arith.constant dense<0xFF800000> : vector<8xf32>
    %453 = vector.multi_reduction <maximumf>, %452, %cst_359 [1] : vector<8x8xf32> to vector<8xf32>
    %454 = vector.shape_cast %453 : vector<8xf32> to vector<8x1xf32>
    %455 = vector.broadcast %454 : vector<8x1xf32> to vector<8x8xf32>
    %456 = arith.subf %452, %455 : vector<8x8xf32>
    %457 = math.exp %456 : vector<8x8xf32>
    %cst_360 = arith.constant dense<0.000000e+00> : vector<8xf32>
    %458 = vector.multi_reduction <add>, %457, %cst_360 [1] : vector<8x8xf32> to vector<8xf32>
    %459 = vector.shape_cast %458 : vector<8xf32> to vector<8x1xf32>
    %460 = tpu.reciprocal %459 {approx = true} : vector<8x1xf32> -> vector<8x1xf32>
    %461 = vector.broadcast %460 : vector<8x1xf32> to vector<8x8xf32>
    %462 = arith.mulf %457, %461 : vector<8x8xf32>
    %c0_361 = arith.constant 0 : index
    %c0_362 = arith.constant 0 : index
    %463 = vector.load %arg8[%c0_361, %c0_362] : memref<3x3xf32, #tpu.memory_space<vmem>>, vector<3x3xf32>
    %cst_363 = arith.constant dense<0.000000e+00> : vector<8x3xf32>
    %464 = tpu.matmul %437, %463, %cst_363 {dimension_numbers = #tpu.dot_dimension_numbers<[1], [0], [0], [1], [0, 0, 1, 1], [], []>} : vector<8x3xf32>, vector<3x3xf32>, vector<8x3xf32> -> vector<8x3xf32>
    %c0_364 = arith.constant 0 : index
    %c0_365 = arith.constant 0 : index
    %465 = vector.load %arg9[%c0_364, %c0_365] : memref<1x3xf32, #tpu.memory_space<vmem>>, vector<1x3xf32>
    %466 = vector.broadcast %465 : vector<1x3xf32> to vector<8x3xf32>
    %467 = arith.addf %464, %466 : vector<8x3xf32>
    %cst_366 = arith.constant dense<0.000000e+00> : vector<8x3xf32>
    %468 = tpu.matmul %462, %467, %cst_366 {dimension_numbers = #tpu.dot_dimension_numbers<[1], [0], [0], [1], [0, 0, 1, 1], [], []>} : vector<8x8xf32>, vector<8x3xf32>, vector<8x3xf32> -> vector<8x3xf32>
    %c0_367 = arith.constant 0 : index
    %c0_368 = arith.constant 0 : index
    %469 = vector.load %arg10[%c0_367, %c0_368] : memref<3x3xf32, #tpu.memory_space<vmem>>, vector<3x3xf32>
    %cst_369 = arith.constant dense<0.000000e+00> : vector<8x3xf32>
    %470 = tpu.matmul %468, %469, %cst_369 {dimension_numbers = #tpu.dot_dimension_numbers<[1], [0], [0], [1], [0, 0, 1, 1], [], []>} : vector<8x3xf32>, vector<3x3xf32>, vector<8x3xf32> -> vector<8x3xf32>
    %c0_370 = arith.constant 0 : index
    %c0_371 = arith.constant 0 : index
    %471 = vector.load %arg11[%c0_370, %c0_371] : memref<1x3xf32, #tpu.memory_space<vmem>>, vector<1x3xf32>
    %472 = vector.broadcast %471 : vector<1x3xf32> to vector<8x3xf32>
    %473 = arith.addf %470, %472 : vector<8x3xf32>
    %cst_372 = arith.constant 1.000000e-01 : f32
    %474 = vector.broadcast %cst_372 : f32 to vector<8x3xf32>
    %475 = arith.mulf %474, %473 : vector<8x3xf32>
    %476 = arith.addf %437, %475 : vector<8x3xf32>
    %cst_373 = arith.constant 0.000000e+00 : f32
    %477 = vector.broadcast %cst_373 : f32 to vector<8x3xf32>
    %c0_374 = arith.constant 0 : index
    %c0_375 = arith.constant 0 : index
    %478 = vector.load %arg12[%c0_374, %c0_375] : memref<3x512xf32, #tpu.memory_space<vmem>>, vector<3x128xf32>
    %cst_376 = arith.constant dense<0.000000e+00> : vector<8x128xf32>
    %479 = tpu.matmul %476, %478, %cst_376 {dimension_numbers = #tpu.dot_dimension_numbers<[1], [0], [0], [1], [0, 0, 1, 1], [], []>} : vector<8x3xf32>, vector<3x128xf32>, vector<8x128xf32> -> vector<8x128xf32>
    %c0_377 = arith.constant 0 : index
    %c0_378 = arith.constant 0 : index
    %480 = vector.load %arg13[%c0_377, %c0_378] : memref<1x512xf32, #tpu.memory_space<vmem>>, vector<1x128xf32>
    %481 = vector.broadcast %480 : vector<1x128xf32> to vector<8x128xf32>
    %482 = arith.addf %479, %481 : vector<8x128xf32>
    %cst_379 = arith.constant 0.000000e+00 : f32
    %483 = vector.broadcast %cst_379 : f32 to vector<8x128xf32>
    %484 = arith.maximumf %482, %483 : vector<8x128xf32>
    %c0_380 = arith.constant 0 : index
    %c0_381 = arith.constant 0 : index
    %485 = vector.load %arg14[%c0_380, %c0_381] : memref<3x512xf32, #tpu.memory_space<vmem>>, vector<3x128xf32>
    %cst_382 = arith.constant dense<0.000000e+00> : vector<8x3xf32>
    %486 = tpu.matmul %484, %485, %cst_382 {dimension_numbers = #tpu.dot_dimension_numbers<[1], [1], [0], [0], [0, 0, 1, 0], [], []>} : vector<8x128xf32>, vector<3x128xf32>, vector<8x3xf32> -> vector<8x3xf32>
    %487 = arith.addf %477, %486 : vector<8x3xf32>
    %c0_383 = arith.constant 0 : index
    %c128_384 = arith.constant 128 : index
    %488 = vector.load %arg12[%c0_383, %c128_384] : memref<3x512xf32, #tpu.memory_space<vmem>>, vector<3x128xf32>
    %cst_385 = arith.constant dense<0.000000e+00> : vector<8x128xf32>
    %489 = tpu.matmul %476, %488, %cst_385 {dimension_numbers = #tpu.dot_dimension_numbers<[1], [0], [0], [1], [0, 0, 1, 1], [], []>} : vector<8x3xf32>, vector<3x128xf32>, vector<8x128xf32> -> vector<8x128xf32>
    %c0_386 = arith.constant 0 : index
    %c128_387 = arith.constant 128 : index
    %490 = vector.load %arg13[%c0_386, %c128_387] : memref<1x512xf32, #tpu.memory_space<vmem>>, vector<1x128xf32>
    %491 = vector.broadcast %490 : vector<1x128xf32> to vector<8x128xf32>
    %492 = arith.addf %489, %491 : vector<8x128xf32>
    %cst_388 = arith.constant 0.000000e+00 : f32
    %493 = vector.broadcast %cst_388 : f32 to vector<8x128xf32>
    %494 = arith.maximumf %492, %493 : vector<8x128xf32>
    %c0_389 = arith.constant 0 : index
    %c128_390 = arith.constant 128 : index
    %495 = vector.load %arg14[%c0_389, %c128_390] : memref<3x512xf32, #tpu.memory_space<vmem>>, vector<3x128xf32>
    %cst_391 = arith.constant dense<0.000000e+00> : vector<8x3xf32>
    %496 = tpu.matmul %494, %495, %cst_391 {dimension_numbers = #tpu.dot_dimension_numbers<[1], [1], [0], [0], [0, 0, 1, 0], [], []>} : vector<8x128xf32>, vector<3x128xf32>, vector<8x3xf32> -> vector<8x3xf32>
    %497 = arith.addf %487, %496 : vector<8x3xf32>
    %c0_392 = arith.constant 0 : index
    %c256_393 = arith.constant 256 : index
    %498 = vector.load %arg12[%c0_392, %c256_393] : memref<3x512xf32, #tpu.memory_space<vmem>>, vector<3x128xf32>
    %cst_394 = arith.constant dense<0.000000e+00> : vector<8x128xf32>
    %499 = tpu.matmul %476, %498, %cst_394 {dimension_numbers = #tpu.dot_dimension_numbers<[1], [0], [0], [1], [0, 0, 1, 1], [], []>} : vector<8x3xf32>, vector<3x128xf32>, vector<8x128xf32> -> vector<8x128xf32>
    %c0_395 = arith.constant 0 : index
    %c256_396 = arith.constant 256 : index
    %500 = vector.load %arg13[%c0_395, %c256_396] : memref<1x512xf32, #tpu.memory_space<vmem>>, vector<1x128xf32>
    %501 = vector.broadcast %500 : vector<1x128xf32> to vector<8x128xf32>
    %502 = arith.addf %499, %501 : vector<8x128xf32>
    %cst_397 = arith.constant 0.000000e+00 : f32
    %503 = vector.broadcast %cst_397 : f32 to vector<8x128xf32>
    %504 = arith.maximumf %502, %503 : vector<8x128xf32>
    %c0_398 = arith.constant 0 : index
    %c256_399 = arith.constant 256 : index
    %505 = vector.load %arg14[%c0_398, %c256_399] : memref<3x512xf32, #tpu.memory_space<vmem>>, vector<3x128xf32>
    %cst_400 = arith.constant dense<0.000000e+00> : vector<8x3xf32>
    %506 = tpu.matmul %504, %505, %cst_400 {dimension_numbers = #tpu.dot_dimension_numbers<[1], [1], [0], [0], [0, 0, 1, 0], [], []>} : vector<8x128xf32>, vector<3x128xf32>, vector<8x3xf32> -> vector<8x3xf32>
    %507 = arith.addf %497, %506 : vector<8x3xf32>
    %c0_401 = arith.constant 0 : index
    %c384_402 = arith.constant 384 : index
    %508 = vector.load %arg12[%c0_401, %c384_402] : memref<3x512xf32, #tpu.memory_space<vmem>>, vector<3x128xf32>
    %cst_403 = arith.constant dense<0.000000e+00> : vector<8x128xf32>
    %509 = tpu.matmul %476, %508, %cst_403 {dimension_numbers = #tpu.dot_dimension_numbers<[1], [0], [0], [1], [0, 0, 1, 1], [], []>} : vector<8x3xf32>, vector<3x128xf32>, vector<8x128xf32> -> vector<8x128xf32>
    %c0_404 = arith.constant 0 : index
    %c384_405 = arith.constant 384 : index
    %510 = vector.load %arg13[%c0_404, %c384_405] : memref<1x512xf32, #tpu.memory_space<vmem>>, vector<1x128xf32>
    %511 = vector.broadcast %510 : vector<1x128xf32> to vector<8x128xf32>
    %512 = arith.addf %509, %511 : vector<8x128xf32>
    %cst_406 = arith.constant 0.000000e+00 : f32
    %513 = vector.broadcast %cst_406 : f32 to vector<8x128xf32>
    %514 = arith.maximumf %512, %513 : vector<8x128xf32>
    %c0_407 = arith.constant 0 : index
    %c384_408 = arith.constant 384 : index
    %515 = vector.load %arg14[%c0_407, %c384_408] : memref<3x512xf32, #tpu.memory_space<vmem>>, vector<3x128xf32>
    %cst_409 = arith.constant dense<0.000000e+00> : vector<8x3xf32>
    %516 = tpu.matmul %514, %515, %cst_409 {dimension_numbers = #tpu.dot_dimension_numbers<[1], [1], [0], [0], [0, 0, 1, 0], [], []>} : vector<8x128xf32>, vector<3x128xf32>, vector<8x3xf32> -> vector<8x3xf32>
    %517 = arith.addf %507, %516 : vector<8x3xf32>
    %c0_410 = arith.constant 0 : index
    %c0_411 = arith.constant 0 : index
    %518 = vector.load %arg15[%c0_410, %c0_411] : memref<1x3xf32, #tpu.memory_space<vmem>>, vector<1x3xf32>
    %519 = vector.broadcast %518 : vector<1x3xf32> to vector<8x3xf32>
    %520 = arith.addf %517, %519 : vector<8x3xf32>
    %cst_412 = arith.constant 1.000000e-01 : f32
    %521 = vector.broadcast %cst_412 : f32 to vector<8x3xf32>
    %522 = arith.mulf %521, %520 : vector<8x3xf32>
    %523 = arith.addf %476, %522 : vector<8x3xf32>
    %c6_i32 = arith.constant 6 : i32
    %c0_413 = arith.constant 0 : index
    %c0_414 = arith.constant 0 : index
    %524 = vector.load %arg4[%c0_413, %c0_414] : memref<3x3xf32, #tpu.memory_space<vmem>>, vector<3x3xf32>
    %cst_415 = arith.constant dense<0.000000e+00> : vector<8x3xf32>
    %525 = tpu.matmul %523, %524, %cst_415 {dimension_numbers = #tpu.dot_dimension_numbers<[1], [0], [0], [1], [0, 0, 1, 1], [], []>} : vector<8x3xf32>, vector<3x3xf32>, vector<8x3xf32> -> vector<8x3xf32>
    %c0_416 = arith.constant 0 : index
    %c0_417 = arith.constant 0 : index
    %526 = vector.load %arg5[%c0_416, %c0_417] : memref<1x3xf32, #tpu.memory_space<vmem>>, vector<1x3xf32>
    %527 = vector.broadcast %526 : vector<1x3xf32> to vector<8x3xf32>
    %528 = arith.addf %525, %527 : vector<8x3xf32>
    %c0_418 = arith.constant 0 : index
    %c0_419 = arith.constant 0 : index
    %529 = vector.load %arg6[%c0_418, %c0_419] : memref<3x3xf32, #tpu.memory_space<vmem>>, vector<3x3xf32>
    %cst_420 = arith.constant dense<0.000000e+00> : vector<8x3xf32>
    %530 = tpu.matmul %523, %529, %cst_420 {dimension_numbers = #tpu.dot_dimension_numbers<[1], [0], [0], [1], [0, 0, 1, 1], [], []>} : vector<8x3xf32>, vector<3x3xf32>, vector<8x3xf32> -> vector<8x3xf32>
    %c0_421 = arith.constant 0 : index
    %c0_422 = arith.constant 0 : index
    %531 = vector.load %arg7[%c0_421, %c0_422] : memref<1x3xf32, #tpu.memory_space<vmem>>, vector<1x3xf32>
    %532 = vector.broadcast %531 : vector<1x3xf32> to vector<8x3xf32>
    %533 = arith.addf %530, %532 : vector<8x3xf32>
    %cst_423 = arith.constant dense<0.000000e+00> : vector<8x8xf32>
    %534 = tpu.matmul %528, %533, %cst_423 {dimension_numbers = #tpu.dot_dimension_numbers<[1], [1], [0], [0], [0, 0, 1, 0], [], []>} : vector<8x3xf32>, vector<8x3xf32>, vector<8x8xf32> -> vector<8x8xf32>
    %cst_424 = arith.constant 0.577350259 : f32
    %535 = vector.broadcast %cst_424 : f32 to vector<8x8xf32>
    %536 = arith.mulf %534, %535 : vector<8x8xf32>
    %c0_425 = arith.constant 0 : index
    %c0_426 = arith.constant 0 : index
    %537 = vector.load %arg17[%c0_425, %c0_426] : memref<8x8xf32, #tpu.memory_space<vmem>>, vector<8x8xf32>
    %538 = arith.addf %536, %537 : vector<8x8xf32>
    %cst_427 = arith.constant dense<0xFF800000> : vector<8xf32>
    %539 = vector.multi_reduction <maximumf>, %538, %cst_427 [1] : vector<8x8xf32> to vector<8xf32>
    %540 = vector.shape_cast %539 : vector<8xf32> to vector<8x1xf32>
    %541 = vector.broadcast %540 : vector<8x1xf32> to vector<8x8xf32>
    %542 = arith.subf %538, %541 : vector<8x8xf32>
    %543 = math.exp %542 : vector<8x8xf32>
    %cst_428 = arith.constant dense<0.000000e+00> : vector<8xf32>
    %544 = vector.multi_reduction <add>, %543, %cst_428 [1] : vector<8x8xf32> to vector<8xf32>
    %545 = vector.shape_cast %544 : vector<8xf32> to vector<8x1xf32>
    %546 = tpu.reciprocal %545 {approx = true} : vector<8x1xf32> -> vector<8x1xf32>
    %547 = vector.broadcast %546 : vector<8x1xf32> to vector<8x8xf32>
    %548 = arith.mulf %543, %547 : vector<8x8xf32>
    %c0_429 = arith.constant 0 : index
    %c0_430 = arith.constant 0 : index
    %549 = vector.load %arg8[%c0_429, %c0_430] : memref<3x3xf32, #tpu.memory_space<vmem>>, vector<3x3xf32>
    %cst_431 = arith.constant dense<0.000000e+00> : vector<8x3xf32>
    %550 = tpu.matmul %523, %549, %cst_431 {dimension_numbers = #tpu.dot_dimension_numbers<[1], [0], [0], [1], [0, 0, 1, 1], [], []>} : vector<8x3xf32>, vector<3x3xf32>, vector<8x3xf32> -> vector<8x3xf32>
    %c0_432 = arith.constant 0 : index
    %c0_433 = arith.constant 0 : index
    %551 = vector.load %arg9[%c0_432, %c0_433] : memref<1x3xf32, #tpu.memory_space<vmem>>, vector<1x3xf32>
    %552 = vector.broadcast %551 : vector<1x3xf32> to vector<8x3xf32>
    %553 = arith.addf %550, %552 : vector<8x3xf32>
    %cst_434 = arith.constant dense<0.000000e+00> : vector<8x3xf32>
    %554 = tpu.matmul %548, %553, %cst_434 {dimension_numbers = #tpu.dot_dimension_numbers<[1], [0], [0], [1], [0, 0, 1, 1], [], []>} : vector<8x8xf32>, vector<8x3xf32>, vector<8x3xf32> -> vector<8x3xf32>
    %c0_435 = arith.constant 0 : index
    %c0_436 = arith.constant 0 : index
    %555 = vector.load %arg10[%c0_435, %c0_436] : memref<3x3xf32, #tpu.memory_space<vmem>>, vector<3x3xf32>
    %cst_437 = arith.constant dense<0.000000e+00> : vector<8x3xf32>
    %556 = tpu.matmul %554, %555, %cst_437 {dimension_numbers = #tpu.dot_dimension_numbers<[1], [0], [0], [1], [0, 0, 1, 1], [], []>} : vector<8x3xf32>, vector<3x3xf32>, vector<8x3xf32> -> vector<8x3xf32>
    %c0_438 = arith.constant 0 : index
    %c0_439 = arith.constant 0 : index
    %557 = vector.load %arg11[%c0_438, %c0_439] : memref<1x3xf32, #tpu.memory_space<vmem>>, vector<1x3xf32>
    %558 = vector.broadcast %557 : vector<1x3xf32> to vector<8x3xf32>
    %559 = arith.addf %556, %558 : vector<8x3xf32>
    %cst_440 = arith.constant 1.000000e-01 : f32
    %560 = vector.broadcast %cst_440 : f32 to vector<8x3xf32>
    %561 = arith.mulf %560, %559 : vector<8x3xf32>
    %562 = arith.addf %523, %561 : vector<8x3xf32>
    %cst_441 = arith.constant 0.000000e+00 : f32
    %563 = vector.broadcast %cst_441 : f32 to vector<8x3xf32>
    %c0_442 = arith.constant 0 : index
    %c0_443 = arith.constant 0 : index
    %564 = vector.load %arg12[%c0_442, %c0_443] : memref<3x512xf32, #tpu.memory_space<vmem>>, vector<3x128xf32>
    %cst_444 = arith.constant dense<0.000000e+00> : vector<8x128xf32>
    %565 = tpu.matmul %562, %564, %cst_444 {dimension_numbers = #tpu.dot_dimension_numbers<[1], [0], [0], [1], [0, 0, 1, 1], [], []>} : vector<8x3xf32>, vector<3x128xf32>, vector<8x128xf32> -> vector<8x128xf32>
    %c0_445 = arith.constant 0 : index
    %c0_446 = arith.constant 0 : index
    %566 = vector.load %arg13[%c0_445, %c0_446] : memref<1x512xf32, #tpu.memory_space<vmem>>, vector<1x128xf32>
    %567 = vector.broadcast %566 : vector<1x128xf32> to vector<8x128xf32>
    %568 = arith.addf %565, %567 : vector<8x128xf32>
    %cst_447 = arith.constant 0.000000e+00 : f32
    %569 = vector.broadcast %cst_447 : f32 to vector<8x128xf32>
    %570 = arith.maximumf %568, %569 : vector<8x128xf32>
    %c0_448 = arith.constant 0 : index
    %c0_449 = arith.constant 0 : index
    %571 = vector.load %arg14[%c0_448, %c0_449] : memref<3x512xf32, #tpu.memory_space<vmem>>, vector<3x128xf32>
    %cst_450 = arith.constant dense<0.000000e+00> : vector<8x3xf32>
    %572 = tpu.matmul %570, %571, %cst_450 {dimension_numbers = #tpu.dot_dimension_numbers<[1], [1], [0], [0], [0, 0, 1, 0], [], []>} : vector<8x128xf32>, vector<3x128xf32>, vector<8x3xf32> -> vector<8x3xf32>
    %573 = arith.addf %563, %572 : vector<8x3xf32>
    %c0_451 = arith.constant 0 : index
    %c128_452 = arith.constant 128 : index
    %574 = vector.load %arg12[%c0_451, %c128_452] : memref<3x512xf32, #tpu.memory_space<vmem>>, vector<3x128xf32>
    %cst_453 = arith.constant dense<0.000000e+00> : vector<8x128xf32>
    %575 = tpu.matmul %562, %574, %cst_453 {dimension_numbers = #tpu.dot_dimension_numbers<[1], [0], [0], [1], [0, 0, 1, 1], [], []>} : vector<8x3xf32>, vector<3x128xf32>, vector<8x128xf32> -> vector<8x128xf32>
    %c0_454 = arith.constant 0 : index
    %c128_455 = arith.constant 128 : index
    %576 = vector.load %arg13[%c0_454, %c128_455] : memref<1x512xf32, #tpu.memory_space<vmem>>, vector<1x128xf32>
    %577 = vector.broadcast %576 : vector<1x128xf32> to vector<8x128xf32>
    %578 = arith.addf %575, %577 : vector<8x128xf32>
    %cst_456 = arith.constant 0.000000e+00 : f32
    %579 = vector.broadcast %cst_456 : f32 to vector<8x128xf32>
    %580 = arith.maximumf %578, %579 : vector<8x128xf32>
    %c0_457 = arith.constant 0 : index
    %c128_458 = arith.constant 128 : index
    %581 = vector.load %arg14[%c0_457, %c128_458] : memref<3x512xf32, #tpu.memory_space<vmem>>, vector<3x128xf32>
    %cst_459 = arith.constant dense<0.000000e+00> : vector<8x3xf32>
    %582 = tpu.matmul %580, %581, %cst_459 {dimension_numbers = #tpu.dot_dimension_numbers<[1], [1], [0], [0], [0, 0, 1, 0], [], []>} : vector<8x128xf32>, vector<3x128xf32>, vector<8x3xf32> -> vector<8x3xf32>
    %583 = arith.addf %573, %582 : vector<8x3xf32>
    %c0_460 = arith.constant 0 : index
    %c256_461 = arith.constant 256 : index
    %584 = vector.load %arg12[%c0_460, %c256_461] : memref<3x512xf32, #tpu.memory_space<vmem>>, vector<3x128xf32>
    %cst_462 = arith.constant dense<0.000000e+00> : vector<8x128xf32>
    %585 = tpu.matmul %562, %584, %cst_462 {dimension_numbers = #tpu.dot_dimension_numbers<[1], [0], [0], [1], [0, 0, 1, 1], [], []>} : vector<8x3xf32>, vector<3x128xf32>, vector<8x128xf32> -> vector<8x128xf32>
    %c0_463 = arith.constant 0 : index
    %c256_464 = arith.constant 256 : index
    %586 = vector.load %arg13[%c0_463, %c256_464] : memref<1x512xf32, #tpu.memory_space<vmem>>, vector<1x128xf32>
    %587 = vector.broadcast %586 : vector<1x128xf32> to vector<8x128xf32>
    %588 = arith.addf %585, %587 : vector<8x128xf32>
    %cst_465 = arith.constant 0.000000e+00 : f32
    %589 = vector.broadcast %cst_465 : f32 to vector<8x128xf32>
    %590 = arith.maximumf %588, %589 : vector<8x128xf32>
    %c0_466 = arith.constant 0 : index
    %c256_467 = arith.constant 256 : index
    %591 = vector.load %arg14[%c0_466, %c256_467] : memref<3x512xf32, #tpu.memory_space<vmem>>, vector<3x128xf32>
    %cst_468 = arith.constant dense<0.000000e+00> : vector<8x3xf32>
    %592 = tpu.matmul %590, %591, %cst_468 {dimension_numbers = #tpu.dot_dimension_numbers<[1], [1], [0], [0], [0, 0, 1, 0], [], []>} : vector<8x128xf32>, vector<3x128xf32>, vector<8x3xf32> -> vector<8x3xf32>
    %593 = arith.addf %583, %592 : vector<8x3xf32>
    %c0_469 = arith.constant 0 : index
    %c384_470 = arith.constant 384 : index
    %594 = vector.load %arg12[%c0_469, %c384_470] : memref<3x512xf32, #tpu.memory_space<vmem>>, vector<3x128xf32>
    %cst_471 = arith.constant dense<0.000000e+00> : vector<8x128xf32>
    %595 = tpu.matmul %562, %594, %cst_471 {dimension_numbers = #tpu.dot_dimension_numbers<[1], [0], [0], [1], [0, 0, 1, 1], [], []>} : vector<8x3xf32>, vector<3x128xf32>, vector<8x128xf32> -> vector<8x128xf32>
    %c0_472 = arith.constant 0 : index
    %c384_473 = arith.constant 384 : index
    %596 = vector.load %arg13[%c0_472, %c384_473] : memref<1x512xf32, #tpu.memory_space<vmem>>, vector<1x128xf32>
    %597 = vector.broadcast %596 : vector<1x128xf32> to vector<8x128xf32>
    %598 = arith.addf %595, %597 : vector<8x128xf32>
    %cst_474 = arith.constant 0.000000e+00 : f32
    %599 = vector.broadcast %cst_474 : f32 to vector<8x128xf32>
    %600 = arith.maximumf %598, %599 : vector<8x128xf32>
    %c0_475 = arith.constant 0 : index
    %c384_476 = arith.constant 384 : index
    %601 = vector.load %arg14[%c0_475, %c384_476] : memref<3x512xf32, #tpu.memory_space<vmem>>, vector<3x128xf32>
    %cst_477 = arith.constant dense<0.000000e+00> : vector<8x3xf32>
    %602 = tpu.matmul %600, %601, %cst_477 {dimension_numbers = #tpu.dot_dimension_numbers<[1], [1], [0], [0], [0, 0, 1, 0], [], []>} : vector<8x128xf32>, vector<3x128xf32>, vector<8x3xf32> -> vector<8x3xf32>
    %603 = arith.addf %593, %602 : vector<8x3xf32>
    %c0_478 = arith.constant 0 : index
    %c0_479 = arith.constant 0 : index
    %604 = vector.load %arg15[%c0_478, %c0_479] : memref<1x3xf32, #tpu.memory_space<vmem>>, vector<1x3xf32>
    %605 = vector.broadcast %604 : vector<1x3xf32> to vector<8x3xf32>
    %606 = arith.addf %603, %605 : vector<8x3xf32>
    %cst_480 = arith.constant 1.000000e-01 : f32
    %607 = vector.broadcast %cst_480 : f32 to vector<8x3xf32>
    %608 = arith.mulf %607, %606 : vector<8x3xf32>
    %609 = arith.addf %562, %608 : vector<8x3xf32>
    %c7_i32 = arith.constant 7 : i32
    %c0_481 = arith.constant 0 : index
    %c0_482 = arith.constant 0 : index
    %610 = vector.load %arg4[%c0_481, %c0_482] : memref<3x3xf32, #tpu.memory_space<vmem>>, vector<3x3xf32>
    %cst_483 = arith.constant dense<0.000000e+00> : vector<8x3xf32>
    %611 = tpu.matmul %609, %610, %cst_483 {dimension_numbers = #tpu.dot_dimension_numbers<[1], [0], [0], [1], [0, 0, 1, 1], [], []>} : vector<8x3xf32>, vector<3x3xf32>, vector<8x3xf32> -> vector<8x3xf32>
    %c0_484 = arith.constant 0 : index
    %c0_485 = arith.constant 0 : index
    %612 = vector.load %arg5[%c0_484, %c0_485] : memref<1x3xf32, #tpu.memory_space<vmem>>, vector<1x3xf32>
    %613 = vector.broadcast %612 : vector<1x3xf32> to vector<8x3xf32>
    %614 = arith.addf %611, %613 : vector<8x3xf32>
    %c0_486 = arith.constant 0 : index
    %c0_487 = arith.constant 0 : index
    %615 = vector.load %arg6[%c0_486, %c0_487] : memref<3x3xf32, #tpu.memory_space<vmem>>, vector<3x3xf32>
    %cst_488 = arith.constant dense<0.000000e+00> : vector<8x3xf32>
    %616 = tpu.matmul %609, %615, %cst_488 {dimension_numbers = #tpu.dot_dimension_numbers<[1], [0], [0], [1], [0, 0, 1, 1], [], []>} : vector<8x3xf32>, vector<3x3xf32>, vector<8x3xf32> -> vector<8x3xf32>
    %c0_489 = arith.constant 0 : index
    %c0_490 = arith.constant 0 : index
    %617 = vector.load %arg7[%c0_489, %c0_490] : memref<1x3xf32, #tpu.memory_space<vmem>>, vector<1x3xf32>
    %618 = vector.broadcast %617 : vector<1x3xf32> to vector<8x3xf32>
    %619 = arith.addf %616, %618 : vector<8x3xf32>
    %cst_491 = arith.constant dense<0.000000e+00> : vector<8x8xf32>
    %620 = tpu.matmul %614, %619, %cst_491 {dimension_numbers = #tpu.dot_dimension_numbers<[1], [1], [0], [0], [0, 0, 1, 0], [], []>} : vector<8x3xf32>, vector<8x3xf32>, vector<8x8xf32> -> vector<8x8xf32>
    %cst_492 = arith.constant 0.577350259 : f32
    %621 = vector.broadcast %cst_492 : f32 to vector<8x8xf32>
    %622 = arith.mulf %620, %621 : vector<8x8xf32>
    %c0_493 = arith.constant 0 : index
    %c0_494 = arith.constant 0 : index
    %623 = vector.load %arg17[%c0_493, %c0_494] : memref<8x8xf32, #tpu.memory_space<vmem>>, vector<8x8xf32>
    %624 = arith.addf %622, %623 : vector<8x8xf32>
    %cst_495 = arith.constant dense<0xFF800000> : vector<8xf32>
    %625 = vector.multi_reduction <maximumf>, %624, %cst_495 [1] : vector<8x8xf32> to vector<8xf32>
    %626 = vector.shape_cast %625 : vector<8xf32> to vector<8x1xf32>
    %627 = vector.broadcast %626 : vector<8x1xf32> to vector<8x8xf32>
    %628 = arith.subf %624, %627 : vector<8x8xf32>
    %629 = math.exp %628 : vector<8x8xf32>
    %cst_496 = arith.constant dense<0.000000e+00> : vector<8xf32>
    %630 = vector.multi_reduction <add>, %629, %cst_496 [1] : vector<8x8xf32> to vector<8xf32>
    %631 = vector.shape_cast %630 : vector<8xf32> to vector<8x1xf32>
    %632 = tpu.reciprocal %631 {approx = true} : vector<8x1xf32> -> vector<8x1xf32>
    %633 = vector.broadcast %632 : vector<8x1xf32> to vector<8x8xf32>
    %634 = arith.mulf %629, %633 : vector<8x8xf32>
    %c0_497 = arith.constant 0 : index
    %c0_498 = arith.constant 0 : index
    %635 = vector.load %arg8[%c0_497, %c0_498] : memref<3x3xf32, #tpu.memory_space<vmem>>, vector<3x3xf32>
    %cst_499 = arith.constant dense<0.000000e+00> : vector<8x3xf32>
    %636 = tpu.matmul %609, %635, %cst_499 {dimension_numbers = #tpu.dot_dimension_numbers<[1], [0], [0], [1], [0, 0, 1, 1], [], []>} : vector<8x3xf32>, vector<3x3xf32>, vector<8x3xf32> -> vector<8x3xf32>
    %c0_500 = arith.constant 0 : index
    %c0_501 = arith.constant 0 : index
    %637 = vector.load %arg9[%c0_500, %c0_501] : memref<1x3xf32, #tpu.memory_space<vmem>>, vector<1x3xf32>
    %638 = vector.broadcast %637 : vector<1x3xf32> to vector<8x3xf32>
    %639 = arith.addf %636, %638 : vector<8x3xf32>
    %cst_502 = arith.constant dense<0.000000e+00> : vector<8x3xf32>
    %640 = tpu.matmul %634, %639, %cst_502 {dimension_numbers = #tpu.dot_dimension_numbers<[1], [0], [0], [1], [0, 0, 1, 1], [], []>} : vector<8x8xf32>, vector<8x3xf32>, vector<8x3xf32> -> vector<8x3xf32>
    %c0_503 = arith.constant 0 : index
    %c0_504 = arith.constant 0 : index
    %641 = vector.load %arg10[%c0_503, %c0_504] : memref<3x3xf32, #tpu.memory_space<vmem>>, vector<3x3xf32>
    %cst_505 = arith.constant dense<0.000000e+00> : vector<8x3xf32>
    %642 = tpu.matmul %640, %641, %cst_505 {dimension_numbers = #tpu.dot_dimension_numbers<[1], [0], [0], [1], [0, 0, 1, 1], [], []>} : vector<8x3xf32>, vector<3x3xf32>, vector<8x3xf32> -> vector<8x3xf32>
    %c0_506 = arith.constant 0 : index
    %c0_507 = arith.constant 0 : index
    %643 = vector.load %arg11[%c0_506, %c0_507] : memref<1x3xf32, #tpu.memory_space<vmem>>, vector<1x3xf32>
    %644 = vector.broadcast %643 : vector<1x3xf32> to vector<8x3xf32>
    %645 = arith.addf %642, %644 : vector<8x3xf32>
    %cst_508 = arith.constant 1.000000e-01 : f32
    %646 = vector.broadcast %cst_508 : f32 to vector<8x3xf32>
    %647 = arith.mulf %646, %645 : vector<8x3xf32>
    %648 = arith.addf %609, %647 : vector<8x3xf32>
    %cst_509 = arith.constant 0.000000e+00 : f32
    %649 = vector.broadcast %cst_509 : f32 to vector<8x3xf32>
    %c0_510 = arith.constant 0 : index
    %c0_511 = arith.constant 0 : index
    %650 = vector.load %arg12[%c0_510, %c0_511] : memref<3x512xf32, #tpu.memory_space<vmem>>, vector<3x128xf32>
    %cst_512 = arith.constant dense<0.000000e+00> : vector<8x128xf32>
    %651 = tpu.matmul %648, %650, %cst_512 {dimension_numbers = #tpu.dot_dimension_numbers<[1], [0], [0], [1], [0, 0, 1, 1], [], []>} : vector<8x3xf32>, vector<3x128xf32>, vector<8x128xf32> -> vector<8x128xf32>
    %c0_513 = arith.constant 0 : index
    %c0_514 = arith.constant 0 : index
    %652 = vector.load %arg13[%c0_513, %c0_514] : memref<1x512xf32, #tpu.memory_space<vmem>>, vector<1x128xf32>
    %653 = vector.broadcast %652 : vector<1x128xf32> to vector<8x128xf32>
    %654 = arith.addf %651, %653 : vector<8x128xf32>
    %cst_515 = arith.constant 0.000000e+00 : f32
    %655 = vector.broadcast %cst_515 : f32 to vector<8x128xf32>
    %656 = arith.maximumf %654, %655 : vector<8x128xf32>
    %c0_516 = arith.constant 0 : index
    %c0_517 = arith.constant 0 : index
    %657 = vector.load %arg14[%c0_516, %c0_517] : memref<3x512xf32, #tpu.memory_space<vmem>>, vector<3x128xf32>
    %cst_518 = arith.constant dense<0.000000e+00> : vector<8x3xf32>
    %658 = tpu.matmul %656, %657, %cst_518 {dimension_numbers = #tpu.dot_dimension_numbers<[1], [1], [0], [0], [0, 0, 1, 0], [], []>} : vector<8x128xf32>, vector<3x128xf32>, vector<8x3xf32> -> vector<8x3xf32>
    %659 = arith.addf %649, %658 : vector<8x3xf32>
    %c0_519 = arith.constant 0 : index
    %c128_520 = arith.constant 128 : index
    %660 = vector.load %arg12[%c0_519, %c128_520] : memref<3x512xf32, #tpu.memory_space<vmem>>, vector<3x128xf32>
    %cst_521 = arith.constant dense<0.000000e+00> : vector<8x128xf32>
    %661 = tpu.matmul %648, %660, %cst_521 {dimension_numbers = #tpu.dot_dimension_numbers<[1], [0], [0], [1], [0, 0, 1, 1], [], []>} : vector<8x3xf32>, vector<3x128xf32>, vector<8x128xf32> -> vector<8x128xf32>
    %c0_522 = arith.constant 0 : index
    %c128_523 = arith.constant 128 : index
    %662 = vector.load %arg13[%c0_522, %c128_523] : memref<1x512xf32, #tpu.memory_space<vmem>>, vector<1x128xf32>
    %663 = vector.broadcast %662 : vector<1x128xf32> to vector<8x128xf32>
    %664 = arith.addf %661, %663 : vector<8x128xf32>
    %cst_524 = arith.constant 0.000000e+00 : f32
    %665 = vector.broadcast %cst_524 : f32 to vector<8x128xf32>
    %666 = arith.maximumf %664, %665 : vector<8x128xf32>
    %c0_525 = arith.constant 0 : index
    %c128_526 = arith.constant 128 : index
    %667 = vector.load %arg14[%c0_525, %c128_526] : memref<3x512xf32, #tpu.memory_space<vmem>>, vector<3x128xf32>
    %cst_527 = arith.constant dense<0.000000e+00> : vector<8x3xf32>
    %668 = tpu.matmul %666, %667, %cst_527 {dimension_numbers = #tpu.dot_dimension_numbers<[1], [1], [0], [0], [0, 0, 1, 0], [], []>} : vector<8x128xf32>, vector<3x128xf32>, vector<8x3xf32> -> vector<8x3xf32>
    %669 = arith.addf %659, %668 : vector<8x3xf32>
    %c0_528 = arith.constant 0 : index
    %c256_529 = arith.constant 256 : index
    %670 = vector.load %arg12[%c0_528, %c256_529] : memref<3x512xf32, #tpu.memory_space<vmem>>, vector<3x128xf32>
    %cst_530 = arith.constant dense<0.000000e+00> : vector<8x128xf32>
    %671 = tpu.matmul %648, %670, %cst_530 {dimension_numbers = #tpu.dot_dimension_numbers<[1], [0], [0], [1], [0, 0, 1, 1], [], []>} : vector<8x3xf32>, vector<3x128xf32>, vector<8x128xf32> -> vector<8x128xf32>
    %c0_531 = arith.constant 0 : index
    %c256_532 = arith.constant 256 : index
    %672 = vector.load %arg13[%c0_531, %c256_532] : memref<1x512xf32, #tpu.memory_space<vmem>>, vector<1x128xf32>
    %673 = vector.broadcast %672 : vector<1x128xf32> to vector<8x128xf32>
    %674 = arith.addf %671, %673 : vector<8x128xf32>
    %cst_533 = arith.constant 0.000000e+00 : f32
    %675 = vector.broadcast %cst_533 : f32 to vector<8x128xf32>
    %676 = arith.maximumf %674, %675 : vector<8x128xf32>
    %c0_534 = arith.constant 0 : index
    %c256_535 = arith.constant 256 : index
    %677 = vector.load %arg14[%c0_534, %c256_535] : memref<3x512xf32, #tpu.memory_space<vmem>>, vector<3x128xf32>
    %cst_536 = arith.constant dense<0.000000e+00> : vector<8x3xf32>
    %678 = tpu.matmul %676, %677, %cst_536 {dimension_numbers = #tpu.dot_dimension_numbers<[1], [1], [0], [0], [0, 0, 1, 0], [], []>} : vector<8x128xf32>, vector<3x128xf32>, vector<8x3xf32> -> vector<8x3xf32>
    %679 = arith.addf %669, %678 : vector<8x3xf32>
    %c0_537 = arith.constant 0 : index
    %c384_538 = arith.constant 384 : index
    %680 = vector.load %arg12[%c0_537, %c384_538] : memref<3x512xf32, #tpu.memory_space<vmem>>, vector<3x128xf32>
    %cst_539 = arith.constant dense<0.000000e+00> : vector<8x128xf32>
    %681 = tpu.matmul %648, %680, %cst_539 {dimension_numbers = #tpu.dot_dimension_numbers<[1], [0], [0], [1], [0, 0, 1, 1], [], []>} : vector<8x3xf32>, vector<3x128xf32>, vector<8x128xf32> -> vector<8x128xf32>
    %c0_540 = arith.constant 0 : index
    %c384_541 = arith.constant 384 : index
    %682 = vector.load %arg13[%c0_540, %c384_541] : memref<1x512xf32, #tpu.memory_space<vmem>>, vector<1x128xf32>
    %683 = vector.broadcast %682 : vector<1x128xf32> to vector<8x128xf32>
    %684 = arith.addf %681, %683 : vector<8x128xf32>
    %cst_542 = arith.constant 0.000000e+00 : f32
    %685 = vector.broadcast %cst_542 : f32 to vector<8x128xf32>
    %686 = arith.maximumf %684, %685 : vector<8x128xf32>
    %c0_543 = arith.constant 0 : index
    %c384_544 = arith.constant 384 : index
    %687 = vector.load %arg14[%c0_543, %c384_544] : memref<3x512xf32, #tpu.memory_space<vmem>>, vector<3x128xf32>
    %cst_545 = arith.constant dense<0.000000e+00> : vector<8x3xf32>
    %688 = tpu.matmul %686, %687, %cst_545 {dimension_numbers = #tpu.dot_dimension_numbers<[1], [1], [0], [0], [0, 0, 1, 0], [], []>} : vector<8x128xf32>, vector<3x128xf32>, vector<8x3xf32> -> vector<8x3xf32>
    %689 = arith.addf %679, %688 : vector<8x3xf32>
    %c0_546 = arith.constant 0 : index
    %c0_547 = arith.constant 0 : index
    %690 = vector.load %arg15[%c0_546, %c0_547] : memref<1x3xf32, #tpu.memory_space<vmem>>, vector<1x3xf32>
    %691 = vector.broadcast %690 : vector<1x3xf32> to vector<8x3xf32>
    %692 = arith.addf %689, %691 : vector<8x3xf32>
    %cst_548 = arith.constant 1.000000e-01 : f32
    %693 = vector.broadcast %cst_548 : f32 to vector<8x3xf32>
    %694 = arith.mulf %693, %692 : vector<8x3xf32>
    %695 = arith.addf %648, %694 : vector<8x3xf32>
    %c8_i32 = arith.constant 8 : i32
    %c0_549 = arith.constant 0 : index
    %c0_550 = arith.constant 0 : index
    %696 = vector.load %arg4[%c0_549, %c0_550] : memref<3x3xf32, #tpu.memory_space<vmem>>, vector<3x3xf32>
    %cst_551 = arith.constant dense<0.000000e+00> : vector<8x3xf32>
    %697 = tpu.matmul %695, %696, %cst_551 {dimension_numbers = #tpu.dot_dimension_numbers<[1], [0], [0], [1], [0, 0, 1, 1], [], []>} : vector<8x3xf32>, vector<3x3xf32>, vector<8x3xf32> -> vector<8x3xf32>
    %c0_552 = arith.constant 0 : index
    %c0_553 = arith.constant 0 : index
    %698 = vector.load %arg5[%c0_552, %c0_553] : memref<1x3xf32, #tpu.memory_space<vmem>>, vector<1x3xf32>
    %699 = vector.broadcast %698 : vector<1x3xf32> to vector<8x3xf32>
    %700 = arith.addf %697, %699 : vector<8x3xf32>
    %c0_554 = arith.constant 0 : index
    %c0_555 = arith.constant 0 : index
    %701 = vector.load %arg6[%c0_554, %c0_555] : memref<3x3xf32, #tpu.memory_space<vmem>>, vector<3x3xf32>
    %cst_556 = arith.constant dense<0.000000e+00> : vector<8x3xf32>
    %702 = tpu.matmul %695, %701, %cst_556 {dimension_numbers = #tpu.dot_dimension_numbers<[1], [0], [0], [1], [0, 0, 1, 1], [], []>} : vector<8x3xf32>, vector<3x3xf32>, vector<8x3xf32> -> vector<8x3xf32>
    %c0_557 = arith.constant 0 : index
    %c0_558 = arith.constant 0 : index
    %703 = vector.load %arg7[%c0_557, %c0_558] : memref<1x3xf32, #tpu.memory_space<vmem>>, vector<1x3xf32>
    %704 = vector.broadcast %703 : vector<1x3xf32> to vector<8x3xf32>
    %705 = arith.addf %702, %704 : vector<8x3xf32>
    %cst_559 = arith.constant dense<0.000000e+00> : vector<8x8xf32>
    %706 = tpu.matmul %700, %705, %cst_559 {dimension_numbers = #tpu.dot_dimension_numbers<[1], [1], [0], [0], [0, 0, 1, 0], [], []>} : vector<8x3xf32>, vector<8x3xf32>, vector<8x8xf32> -> vector<8x8xf32>
    %cst_560 = arith.constant 0.577350259 : f32
    %707 = vector.broadcast %cst_560 : f32 to vector<8x8xf32>
    %708 = arith.mulf %706, %707 : vector<8x8xf32>
    %c0_561 = arith.constant 0 : index
    %c0_562 = arith.constant 0 : index
    %709 = vector.load %arg17[%c0_561, %c0_562] : memref<8x8xf32, #tpu.memory_space<vmem>>, vector<8x8xf32>
    %710 = arith.addf %708, %709 : vector<8x8xf32>
    %cst_563 = arith.constant dense<0xFF800000> : vector<8xf32>
    %711 = vector.multi_reduction <maximumf>, %710, %cst_563 [1] : vector<8x8xf32> to vector<8xf32>
    %712 = vector.shape_cast %711 : vector<8xf32> to vector<8x1xf32>
    %713 = vector.broadcast %712 : vector<8x1xf32> to vector<8x8xf32>
    %714 = arith.subf %710, %713 : vector<8x8xf32>
    %715 = math.exp %714 : vector<8x8xf32>
    %cst_564 = arith.constant dense<0.000000e+00> : vector<8xf32>
    %716 = vector.multi_reduction <add>, %715, %cst_564 [1] : vector<8x8xf32> to vector<8xf32>
    %717 = vector.shape_cast %716 : vector<8xf32> to vector<8x1xf32>
    %718 = tpu.reciprocal %717 {approx = true} : vector<8x1xf32> -> vector<8x1xf32>
    %719 = vector.broadcast %718 : vector<8x1xf32> to vector<8x8xf32>
    %720 = arith.mulf %715, %719 : vector<8x8xf32>
    %c0_565 = arith.constant 0 : index
    %c0_566 = arith.constant 0 : index
    %721 = vector.load %arg8[%c0_565, %c0_566] : memref<3x3xf32, #tpu.memory_space<vmem>>, vector<3x3xf32>
    %cst_567 = arith.constant dense<0.000000e+00> : vector<8x3xf32>
    %722 = tpu.matmul %695, %721, %cst_567 {dimension_numbers = #tpu.dot_dimension_numbers<[1], [0], [0], [1], [0, 0, 1, 1], [], []>} : vector<8x3xf32>, vector<3x3xf32>, vector<8x3xf32> -> vector<8x3xf32>
    %c0_568 = arith.constant 0 : index
    %c0_569 = arith.constant 0 : index
    %723 = vector.load %arg9[%c0_568, %c0_569] : memref<1x3xf32, #tpu.memory_space<vmem>>, vector<1x3xf32>
    %724 = vector.broadcast %723 : vector<1x3xf32> to vector<8x3xf32>
    %725 = arith.addf %722, %724 : vector<8x3xf32>
    %cst_570 = arith.constant dense<0.000000e+00> : vector<8x3xf32>
    %726 = tpu.matmul %720, %725, %cst_570 {dimension_numbers = #tpu.dot_dimension_numbers<[1], [0], [0], [1], [0, 0, 1, 1], [], []>} : vector<8x8xf32>, vector<8x3xf32>, vector<8x3xf32> -> vector<8x3xf32>
    %c0_571 = arith.constant 0 : index
    %c0_572 = arith.constant 0 : index
    %727 = vector.load %arg10[%c0_571, %c0_572] : memref<3x3xf32, #tpu.memory_space<vmem>>, vector<3x3xf32>
    %cst_573 = arith.constant dense<0.000000e+00> : vector<8x3xf32>
    %728 = tpu.matmul %726, %727, %cst_573 {dimension_numbers = #tpu.dot_dimension_numbers<[1], [0], [0], [1], [0, 0, 1, 1], [], []>} : vector<8x3xf32>, vector<3x3xf32>, vector<8x3xf32> -> vector<8x3xf32>
    %c0_574 = arith.constant 0 : index
    %c0_575 = arith.constant 0 : index
    %729 = vector.load %arg11[%c0_574, %c0_575] : memref<1x3xf32, #tpu.memory_space<vmem>>, vector<1x3xf32>
    %730 = vector.broadcast %729 : vector<1x3xf32> to vector<8x3xf32>
    %731 = arith.addf %728, %730 : vector<8x3xf32>
    %cst_576 = arith.constant 1.000000e-01 : f32
    %732 = vector.broadcast %cst_576 : f32 to vector<8x3xf32>
    %733 = arith.mulf %732, %731 : vector<8x3xf32>
    %734 = arith.addf %695, %733 : vector<8x3xf32>
    %cst_577 = arith.constant 0.000000e+00 : f32
    %735 = vector.broadcast %cst_577 : f32 to vector<8x3xf32>
    %c0_578 = arith.constant 0 : index
    %c0_579 = arith.constant 0 : index
    %736 = vector.load %arg12[%c0_578, %c0_579] : memref<3x512xf32, #tpu.memory_space<vmem>>, vector<3x128xf32>
    %cst_580 = arith.constant dense<0.000000e+00> : vector<8x128xf32>
    %737 = tpu.matmul %734, %736, %cst_580 {dimension_numbers = #tpu.dot_dimension_numbers<[1], [0], [0], [1], [0, 0, 1, 1], [], []>} : vector<8x3xf32>, vector<3x128xf32>, vector<8x128xf32> -> vector<8x128xf32>
    %c0_581 = arith.constant 0 : index
    %c0_582 = arith.constant 0 : index
    %738 = vector.load %arg13[%c0_581, %c0_582] : memref<1x512xf32, #tpu.memory_space<vmem>>, vector<1x128xf32>
    %739 = vector.broadcast %738 : vector<1x128xf32> to vector<8x128xf32>
    %740 = arith.addf %737, %739 : vector<8x128xf32>
    %cst_583 = arith.constant 0.000000e+00 : f32
    %741 = vector.broadcast %cst_583 : f32 to vector<8x128xf32>
    %742 = arith.maximumf %740, %741 : vector<8x128xf32>
    %c0_584 = arith.constant 0 : index
    %c0_585 = arith.constant 0 : index
    %743 = vector.load %arg14[%c0_584, %c0_585] : memref<3x512xf32, #tpu.memory_space<vmem>>, vector<3x128xf32>
    %cst_586 = arith.constant dense<0.000000e+00> : vector<8x3xf32>
    %744 = tpu.matmul %742, %743, %cst_586 {dimension_numbers = #tpu.dot_dimension_numbers<[1], [1], [0], [0], [0, 0, 1, 0], [], []>} : vector<8x128xf32>, vector<3x128xf32>, vector<8x3xf32> -> vector<8x3xf32>
    %745 = arith.addf %735, %744 : vector<8x3xf32>
    %c0_587 = arith.constant 0 : index
    %c128_588 = arith.constant 128 : index
    %746 = vector.load %arg12[%c0_587, %c128_588] : memref<3x512xf32, #tpu.memory_space<vmem>>, vector<3x128xf32>
    %cst_589 = arith.constant dense<0.000000e+00> : vector<8x128xf32>
    %747 = tpu.matmul %734, %746, %cst_589 {dimension_numbers = #tpu.dot_dimension_numbers<[1], [0], [0], [1], [0, 0, 1, 1], [], []>} : vector<8x3xf32>, vector<3x128xf32>, vector<8x128xf32> -> vector<8x128xf32>
    %c0_590 = arith.constant 0 : index
    %c128_591 = arith.constant 128 : index
    %748 = vector.load %arg13[%c0_590, %c128_591] : memref<1x512xf32, #tpu.memory_space<vmem>>, vector<1x128xf32>
    %749 = vector.broadcast %748 : vector<1x128xf32> to vector<8x128xf32>
    %750 = arith.addf %747, %749 : vector<8x128xf32>
    %cst_592 = arith.constant 0.000000e+00 : f32
    %751 = vector.broadcast %cst_592 : f32 to vector<8x128xf32>
    %752 = arith.maximumf %750, %751 : vector<8x128xf32>
    %c0_593 = arith.constant 0 : index
    %c128_594 = arith.constant 128 : index
    %753 = vector.load %arg14[%c0_593, %c128_594] : memref<3x512xf32, #tpu.memory_space<vmem>>, vector<3x128xf32>
    %cst_595 = arith.constant dense<0.000000e+00> : vector<8x3xf32>
    %754 = tpu.matmul %752, %753, %cst_595 {dimension_numbers = #tpu.dot_dimension_numbers<[1], [1], [0], [0], [0, 0, 1, 0], [], []>} : vector<8x128xf32>, vector<3x128xf32>, vector<8x3xf32> -> vector<8x3xf32>
    %755 = arith.addf %745, %754 : vector<8x3xf32>
    %c0_596 = arith.constant 0 : index
    %c256_597 = arith.constant 256 : index
    %756 = vector.load %arg12[%c0_596, %c256_597] : memref<3x512xf32, #tpu.memory_space<vmem>>, vector<3x128xf32>
    %cst_598 = arith.constant dense<0.000000e+00> : vector<8x128xf32>
    %757 = tpu.matmul %734, %756, %cst_598 {dimension_numbers = #tpu.dot_dimension_numbers<[1], [0], [0], [1], [0, 0, 1, 1], [], []>} : vector<8x3xf32>, vector<3x128xf32>, vector<8x128xf32> -> vector<8x128xf32>
    %c0_599 = arith.constant 0 : index
    %c256_600 = arith.constant 256 : index
    %758 = vector.load %arg13[%c0_599, %c256_600] : memref<1x512xf32, #tpu.memory_space<vmem>>, vector<1x128xf32>
    %759 = vector.broadcast %758 : vector<1x128xf32> to vector<8x128xf32>
    %760 = arith.addf %757, %759 : vector<8x128xf32>
    %cst_601 = arith.constant 0.000000e+00 : f32
    %761 = vector.broadcast %cst_601 : f32 to vector<8x128xf32>
    %762 = arith.maximumf %760, %761 : vector<8x128xf32>
    %c0_602 = arith.constant 0 : index
    %c256_603 = arith.constant 256 : index
    %763 = vector.load %arg14[%c0_602, %c256_603] : memref<3x512xf32, #tpu.memory_space<vmem>>, vector<3x128xf32>
    %cst_604 = arith.constant dense<0.000000e+00> : vector<8x3xf32>
    %764 = tpu.matmul %762, %763, %cst_604 {dimension_numbers = #tpu.dot_dimension_numbers<[1], [1], [0], [0], [0, 0, 1, 0], [], []>} : vector<8x128xf32>, vector<3x128xf32>, vector<8x3xf32> -> vector<8x3xf32>
    %765 = arith.addf %755, %764 : vector<8x3xf32>
    %c0_605 = arith.constant 0 : index
    %c384_606 = arith.constant 384 : index
    %766 = vector.load %arg12[%c0_605, %c384_606] : memref<3x512xf32, #tpu.memory_space<vmem>>, vector<3x128xf32>
    %cst_607 = arith.constant dense<0.000000e+00> : vector<8x128xf32>
    %767 = tpu.matmul %734, %766, %cst_607 {dimension_numbers = #tpu.dot_dimension_numbers<[1], [0], [0], [1], [0, 0, 1, 1], [], []>} : vector<8x3xf32>, vector<3x128xf32>, vector<8x128xf32> -> vector<8x128xf32>
    %c0_608 = arith.constant 0 : index
    %c384_609 = arith.constant 384 : index
    %768 = vector.load %arg13[%c0_608, %c384_609] : memref<1x512xf32, #tpu.memory_space<vmem>>, vector<1x128xf32>
    %769 = vector.broadcast %768 : vector<1x128xf32> to vector<8x128xf32>
    %770 = arith.addf %767, %769 : vector<8x128xf32>
    %cst_610 = arith.constant 0.000000e+00 : f32
    %771 = vector.broadcast %cst_610 : f32 to vector<8x128xf32>
    %772 = arith.maximumf %770, %771 : vector<8x128xf32>
    %c0_611 = arith.constant 0 : index
    %c384_612 = arith.constant 384 : index
    %773 = vector.load %arg14[%c0_611, %c384_612] : memref<3x512xf32, #tpu.memory_space<vmem>>, vector<3x128xf32>
    %cst_613 = arith.constant dense<0.000000e+00> : vector<8x3xf32>
    %774 = tpu.matmul %772, %773, %cst_613 {dimension_numbers = #tpu.dot_dimension_numbers<[1], [1], [0], [0], [0, 0, 1, 0], [], []>} : vector<8x128xf32>, vector<3x128xf32>, vector<8x3xf32> -> vector<8x3xf32>
    %775 = arith.addf %765, %774 : vector<8x3xf32>
    %c0_614 = arith.constant 0 : index
    %c0_615 = arith.constant 0 : index
    %776 = vector.load %arg15[%c0_614, %c0_615] : memref<1x3xf32, #tpu.memory_space<vmem>>, vector<1x3xf32>
    %777 = vector.broadcast %776 : vector<1x3xf32> to vector<8x3xf32>
    %778 = arith.addf %775, %777 : vector<8x3xf32>
    %cst_616 = arith.constant 1.000000e-01 : f32
    %779 = vector.broadcast %cst_616 : f32 to vector<8x3xf32>
    %780 = arith.mulf %779, %778 : vector<8x3xf32>
    %781 = arith.addf %734, %780 : vector<8x3xf32>
    %c9_i32 = arith.constant 9 : i32
    %c0_617 = arith.constant 0 : index
    %c0_618 = arith.constant 0 : index
    %782 = vector.load %arg4[%c0_617, %c0_618] : memref<3x3xf32, #tpu.memory_space<vmem>>, vector<3x3xf32>
    %cst_619 = arith.constant dense<0.000000e+00> : vector<8x3xf32>
    %783 = tpu.matmul %781, %782, %cst_619 {dimension_numbers = #tpu.dot_dimension_numbers<[1], [0], [0], [1], [0, 0, 1, 1], [], []>} : vector<8x3xf32>, vector<3x3xf32>, vector<8x3xf32> -> vector<8x3xf32>
    %c0_620 = arith.constant 0 : index
    %c0_621 = arith.constant 0 : index
    %784 = vector.load %arg5[%c0_620, %c0_621] : memref<1x3xf32, #tpu.memory_space<vmem>>, vector<1x3xf32>
    %785 = vector.broadcast %784 : vector<1x3xf32> to vector<8x3xf32>
    %786 = arith.addf %783, %785 : vector<8x3xf32>
    %c0_622 = arith.constant 0 : index
    %c0_623 = arith.constant 0 : index
    %787 = vector.load %arg6[%c0_622, %c0_623] : memref<3x3xf32, #tpu.memory_space<vmem>>, vector<3x3xf32>
    %cst_624 = arith.constant dense<0.000000e+00> : vector<8x3xf32>
    %788 = tpu.matmul %781, %787, %cst_624 {dimension_numbers = #tpu.dot_dimension_numbers<[1], [0], [0], [1], [0, 0, 1, 1], [], []>} : vector<8x3xf32>, vector<3x3xf32>, vector<8x3xf32> -> vector<8x3xf32>
    %c0_625 = arith.constant 0 : index
    %c0_626 = arith.constant 0 : index
    %789 = vector.load %arg7[%c0_625, %c0_626] : memref<1x3xf32, #tpu.memory_space<vmem>>, vector<1x3xf32>
    %790 = vector.broadcast %789 : vector<1x3xf32> to vector<8x3xf32>
    %791 = arith.addf %788, %790 : vector<8x3xf32>
    %cst_627 = arith.constant dense<0.000000e+00> : vector<8x8xf32>
    %792 = tpu.matmul %786, %791, %cst_627 {dimension_numbers = #tpu.dot_dimension_numbers<[1], [1], [0], [0], [0, 0, 1, 0], [], []>} : vector<8x3xf32>, vector<8x3xf32>, vector<8x8xf32> -> vector<8x8xf32>
    %cst_628 = arith.constant 0.577350259 : f32
    %793 = vector.broadcast %cst_628 : f32 to vector<8x8xf32>
    %794 = arith.mulf %792, %793 : vector<8x8xf32>
    %c0_629 = arith.constant 0 : index
    %c0_630 = arith.constant 0 : index
    %795 = vector.load %arg17[%c0_629, %c0_630] : memref<8x8xf32, #tpu.memory_space<vmem>>, vector<8x8xf32>
    %796 = arith.addf %794, %795 : vector<8x8xf32>
    %cst_631 = arith.constant dense<0xFF800000> : vector<8xf32>
    %797 = vector.multi_reduction <maximumf>, %796, %cst_631 [1] : vector<8x8xf32> to vector<8xf32>
    %798 = vector.shape_cast %797 : vector<8xf32> to vector<8x1xf32>
    %799 = vector.broadcast %798 : vector<8x1xf32> to vector<8x8xf32>
    %800 = arith.subf %796, %799 : vector<8x8xf32>
    %801 = math.exp %800 : vector<8x8xf32>
    %cst_632 = arith.constant dense<0.000000e+00> : vector<8xf32>
    %802 = vector.multi_reduction <add>, %801, %cst_632 [1] : vector<8x8xf32> to vector<8xf32>
    %803 = vector.shape_cast %802 : vector<8xf32> to vector<8x1xf32>
    %804 = tpu.reciprocal %803 {approx = true} : vector<8x1xf32> -> vector<8x1xf32>
    %805 = vector.broadcast %804 : vector<8x1xf32> to vector<8x8xf32>
    %806 = arith.mulf %801, %805 : vector<8x8xf32>
    %c0_633 = arith.constant 0 : index
    %c0_634 = arith.constant 0 : index
    %807 = vector.load %arg8[%c0_633, %c0_634] : memref<3x3xf32, #tpu.memory_space<vmem>>, vector<3x3xf32>
    %cst_635 = arith.constant dense<0.000000e+00> : vector<8x3xf32>
    %808 = tpu.matmul %781, %807, %cst_635 {dimension_numbers = #tpu.dot_dimension_numbers<[1], [0], [0], [1], [0, 0, 1, 1], [], []>} : vector<8x3xf32>, vector<3x3xf32>, vector<8x3xf32> -> vector<8x3xf32>
    %c0_636 = arith.constant 0 : index
    %c0_637 = arith.constant 0 : index
    %809 = vector.load %arg9[%c0_636, %c0_637] : memref<1x3xf32, #tpu.memory_space<vmem>>, vector<1x3xf32>
    %810 = vector.broadcast %809 : vector<1x3xf32> to vector<8x3xf32>
    %811 = arith.addf %808, %810 : vector<8x3xf32>
    %cst_638 = arith.constant dense<0.000000e+00> : vector<8x3xf32>
    %812 = tpu.matmul %806, %811, %cst_638 {dimension_numbers = #tpu.dot_dimension_numbers<[1], [0], [0], [1], [0, 0, 1, 1], [], []>} : vector<8x8xf32>, vector<8x3xf32>, vector<8x3xf32> -> vector<8x3xf32>
    %c0_639 = arith.constant 0 : index
    %c0_640 = arith.constant 0 : index
    %813 = vector.load %arg10[%c0_639, %c0_640] : memref<3x3xf32, #tpu.memory_space<vmem>>, vector<3x3xf32>
    %cst_641 = arith.constant dense<0.000000e+00> : vector<8x3xf32>
    %814 = tpu.matmul %812, %813, %cst_641 {dimension_numbers = #tpu.dot_dimension_numbers<[1], [0], [0], [1], [0, 0, 1, 1], [], []>} : vector<8x3xf32>, vector<3x3xf32>, vector<8x3xf32> -> vector<8x3xf32>
    %c0_642 = arith.constant 0 : index
    %c0_643 = arith.constant 0 : index
    %815 = vector.load %arg11[%c0_642, %c0_643] : memref<1x3xf32, #tpu.memory_space<vmem>>, vector<1x3xf32>
    %816 = vector.broadcast %815 : vector<1x3xf32> to vector<8x3xf32>
    %817 = arith.addf %814, %816 : vector<8x3xf32>
    %cst_644 = arith.constant 1.000000e-01 : f32
    %818 = vector.broadcast %cst_644 : f32 to vector<8x3xf32>
    %819 = arith.mulf %818, %817 : vector<8x3xf32>
    %820 = arith.addf %781, %819 : vector<8x3xf32>
    %cst_645 = arith.constant 0.000000e+00 : f32
    %821 = vector.broadcast %cst_645 : f32 to vector<8x3xf32>
    %c0_646 = arith.constant 0 : index
    %c0_647 = arith.constant 0 : index
    %822 = vector.load %arg12[%c0_646, %c0_647] : memref<3x512xf32, #tpu.memory_space<vmem>>, vector<3x128xf32>
    %cst_648 = arith.constant dense<0.000000e+00> : vector<8x128xf32>
    %823 = tpu.matmul %820, %822, %cst_648 {dimension_numbers = #tpu.dot_dimension_numbers<[1], [0], [0], [1], [0, 0, 1, 1], [], []>} : vector<8x3xf32>, vector<3x128xf32>, vector<8x128xf32> -> vector<8x128xf32>
    %c0_649 = arith.constant 0 : index
    %c0_650 = arith.constant 0 : index
    %824 = vector.load %arg13[%c0_649, %c0_650] : memref<1x512xf32, #tpu.memory_space<vmem>>, vector<1x128xf32>
    %825 = vector.broadcast %824 : vector<1x128xf32> to vector<8x128xf32>
    %826 = arith.addf %823, %825 : vector<8x128xf32>
    %cst_651 = arith.constant 0.000000e+00 : f32
    %827 = vector.broadcast %cst_651 : f32 to vector<8x128xf32>
    %828 = arith.maximumf %826, %827 : vector<8x128xf32>
    %c0_652 = arith.constant 0 : index
    %c0_653 = arith.constant 0 : index
    %829 = vector.load %arg14[%c0_652, %c0_653] : memref<3x512xf32, #tpu.memory_space<vmem>>, vector<3x128xf32>
    %cst_654 = arith.constant dense<0.000000e+00> : vector<8x3xf32>
    %830 = tpu.matmul %828, %829, %cst_654 {dimension_numbers = #tpu.dot_dimension_numbers<[1], [1], [0], [0], [0, 0, 1, 0], [], []>} : vector<8x128xf32>, vector<3x128xf32>, vector<8x3xf32> -> vector<8x3xf32>
    %831 = arith.addf %821, %830 : vector<8x3xf32>
    %c0_655 = arith.constant 0 : index
    %c128_656 = arith.constant 128 : index
    %832 = vector.load %arg12[%c0_655, %c128_656] : memref<3x512xf32, #tpu.memory_space<vmem>>, vector<3x128xf32>
    %cst_657 = arith.constant dense<0.000000e+00> : vector<8x128xf32>
    %833 = tpu.matmul %820, %832, %cst_657 {dimension_numbers = #tpu.dot_dimension_numbers<[1], [0], [0], [1], [0, 0, 1, 1], [], []>} : vector<8x3xf32>, vector<3x128xf32>, vector<8x128xf32> -> vector<8x128xf32>
    %c0_658 = arith.constant 0 : index
    %c128_659 = arith.constant 128 : index
    %834 = vector.load %arg13[%c0_658, %c128_659] : memref<1x512xf32, #tpu.memory_space<vmem>>, vector<1x128xf32>
    %835 = vector.broadcast %834 : vector<1x128xf32> to vector<8x128xf32>
    %836 = arith.addf %833, %835 : vector<8x128xf32>
    %cst_660 = arith.constant 0.000000e+00 : f32
    %837 = vector.broadcast %cst_660 : f32 to vector<8x128xf32>
    %838 = arith.maximumf %836, %837 : vector<8x128xf32>
    %c0_661 = arith.constant 0 : index
    %c128_662 = arith.constant 128 : index
    %839 = vector.load %arg14[%c0_661, %c128_662] : memref<3x512xf32, #tpu.memory_space<vmem>>, vector<3x128xf32>
    %cst_663 = arith.constant dense<0.000000e+00> : vector<8x3xf32>
    %840 = tpu.matmul %838, %839, %cst_663 {dimension_numbers = #tpu.dot_dimension_numbers<[1], [1], [0], [0], [0, 0, 1, 0], [], []>} : vector<8x128xf32>, vector<3x128xf32>, vector<8x3xf32> -> vector<8x3xf32>
    %841 = arith.addf %831, %840 : vector<8x3xf32>
    %c0_664 = arith.constant 0 : index
    %c256_665 = arith.constant 256 : index
    %842 = vector.load %arg12[%c0_664, %c256_665] : memref<3x512xf32, #tpu.memory_space<vmem>>, vector<3x128xf32>
    %cst_666 = arith.constant dense<0.000000e+00> : vector<8x128xf32>
    %843 = tpu.matmul %820, %842, %cst_666 {dimension_numbers = #tpu.dot_dimension_numbers<[1], [0], [0], [1], [0, 0, 1, 1], [], []>} : vector<8x3xf32>, vector<3x128xf32>, vector<8x128xf32> -> vector<8x128xf32>
    %c0_667 = arith.constant 0 : index
    %c256_668 = arith.constant 256 : index
    %844 = vector.load %arg13[%c0_667, %c256_668] : memref<1x512xf32, #tpu.memory_space<vmem>>, vector<1x128xf32>
    %845 = vector.broadcast %844 : vector<1x128xf32> to vector<8x128xf32>
    %846 = arith.addf %843, %845 : vector<8x128xf32>
    %cst_669 = arith.constant 0.000000e+00 : f32
    %847 = vector.broadcast %cst_669 : f32 to vector<8x128xf32>
    %848 = arith.maximumf %846, %847 : vector<8x128xf32>
    %c0_670 = arith.constant 0 : index
    %c256_671 = arith.constant 256 : index
    %849 = vector.load %arg14[%c0_670, %c256_671] : memref<3x512xf32, #tpu.memory_space<vmem>>, vector<3x128xf32>
    %cst_672 = arith.constant dense<0.000000e+00> : vector<8x3xf32>
    %850 = tpu.matmul %848, %849, %cst_672 {dimension_numbers = #tpu.dot_dimension_numbers<[1], [1], [0], [0], [0, 0, 1, 0], [], []>} : vector<8x128xf32>, vector<3x128xf32>, vector<8x3xf32> -> vector<8x3xf32>
    %851 = arith.addf %841, %850 : vector<8x3xf32>
    %c0_673 = arith.constant 0 : index
    %c384_674 = arith.constant 384 : index
    %852 = vector.load %arg12[%c0_673, %c384_674] : memref<3x512xf32, #tpu.memory_space<vmem>>, vector<3x128xf32>
    %cst_675 = arith.constant dense<0.000000e+00> : vector<8x128xf32>
    %853 = tpu.matmul %820, %852, %cst_675 {dimension_numbers = #tpu.dot_dimension_numbers<[1], [0], [0], [1], [0, 0, 1, 1], [], []>} : vector<8x3xf32>, vector<3x128xf32>, vector<8x128xf32> -> vector<8x128xf32>
    %c0_676 = arith.constant 0 : index
    %c384_677 = arith.constant 384 : index
    %854 = vector.load %arg13[%c0_676, %c384_677] : memref<1x512xf32, #tpu.memory_space<vmem>>, vector<1x128xf32>
    %855 = vector.broadcast %854 : vector<1x128xf32> to vector<8x128xf32>
    %856 = arith.addf %853, %855 : vector<8x128xf32>
    %cst_678 = arith.constant 0.000000e+00 : f32
    %857 = vector.broadcast %cst_678 : f32 to vector<8x128xf32>
    %858 = arith.maximumf %856, %857 : vector<8x128xf32>
    %c0_679 = arith.constant 0 : index
    %c384_680 = arith.constant 384 : index
    %859 = vector.load %arg14[%c0_679, %c384_680] : memref<3x512xf32, #tpu.memory_space<vmem>>, vector<3x128xf32>
    %cst_681 = arith.constant dense<0.000000e+00> : vector<8x3xf32>
    %860 = tpu.matmul %858, %859, %cst_681 {dimension_numbers = #tpu.dot_dimension_numbers<[1], [1], [0], [0], [0, 0, 1, 0], [], []>} : vector<8x128xf32>, vector<3x128xf32>, vector<8x3xf32> -> vector<8x3xf32>
    %861 = arith.addf %851, %860 : vector<8x3xf32>
    %c0_682 = arith.constant 0 : index
    %c0_683 = arith.constant 0 : index
    %862 = vector.load %arg15[%c0_682, %c0_683] : memref<1x3xf32, #tpu.memory_space<vmem>>, vector<1x3xf32>
    %863 = vector.broadcast %862 : vector<1x3xf32> to vector<8x3xf32>
    %864 = arith.addf %861, %863 : vector<8x3xf32>
    %cst_684 = arith.constant 1.000000e-01 : f32
    %865 = vector.broadcast %cst_684 : f32 to vector<8x3xf32>
    %866 = arith.mulf %865, %864 : vector<8x3xf32>
    %867 = arith.addf %820, %866 : vector<8x3xf32>
    %c0_685 = arith.constant 0 : index
    %c0_686 = arith.constant 0 : index
    %868 = vector.load %arg16[%c0_685, %c0_686] : memref<8x3xf32, #tpu.memory_space<vmem>>, vector<8x3xf32>
    tpu.vector_store %arg16[%c0_685, %c0_686], %867 {strides = array<i32>} : memref<8x3xf32, #tpu.memory_space<vmem>>, vector<8x3xf32>,
    return
  }
  func.func @transform_0(%arg0: i32) -> (i32, i32) {
    %c0_i32 = arith.constant 0 : i32
    %c0_i32_0 = arith.constant 0 : i32
    return %arg0, %c0_i32 : i32, i32
  }
  func.func @transform_1(%arg0: i32) -> (i32, i32, i32) {
    %c0_i32 = arith.constant 0 : i32
    %c0_i32_0 = arith.constant 0 : i32
    %c0_i32_1 = arith.constant 0 : i32
    return %arg0, %c0_i32, %c0_i32_0 : i32, i32, i32
  }
  func.func @transform_2(%arg0: i32) -> (i32, i32, i32) {
    %c0_i32 = arith.constant 0 : i32
    %c0_i32_0 = arith.constant 0 : i32
    %c0_i32_1 = arith.constant 0 : i32
    %c0_i32_2 = arith.constant 0 : i32
    return %c0_i32, %c0_i32_0, %c0_i32_1 : i32, i32, i32
  }
  func.func @transform_3(%arg0: i32) -> (i32, i32) {
    %c0_i32 = arith.constant 0 : i32
    %c0_i32_0 = arith.constant 0 : i32
    %c0_i32_1 = arith.constant 0 : i32
    return %c0_i32, %c0_i32_0 : i32, i32
  }
  func.func @transform_4(%arg0: i32) -> (i32, i32) {
    %c0_i32 = arith.constant 0 : i32
    %c0_i32_0 = arith.constant 0 : i32
    %c0_i32_1 = arith.constant 0 : i32
    return %c0_i32, %c0_i32_0 : i32, i32
  }
  func.func @transform_5(%arg0: i32) -> (i32, i32) {
    %c0_i32 = arith.constant 0 : i32
    %c0_i32_0 = arith.constant 0 : i32
    %c0_i32_1 = arith.constant 0 : i32
    return %c0_i32, %c0_i32_0 : i32, i32
  }
  func.func @transform_6(%arg0: i32) -> (i32, i32) {
    %c0_i32 = arith.constant 0 : i32
    %c0_i32_0 = arith.constant 0 : i32
    %c0_i32_1 = arith.constant 0 : i32
    return %c0_i32, %c0_i32_0 : i32, i32
  }
  func.func @transform_7(%arg0: i32) -> (i32, i32) {
    %c0_i32 = arith.constant 0 : i32
    %c0_i32_0 = arith.constant 0 : i32
    %c0_i32_1 = arith.constant 0 : i32
    return %c0_i32, %c0_i32_0 : i32, i32
  }
  func.func @transform_8(%arg0: i32) -> (i32, i32) {
    %c0_i32 = arith.constant 0 : i32
    %c0_i32_0 = arith.constant 0 : i32
    %c0_i32_1 = arith.constant 0 : i32
    return %c0_i32, %c0_i32_0 : i32, i32
  }
  func.func @transform_9(%arg0: i32) -> (i32, i32) {
    %c0_i32 = arith.constant 0 : i32
    %c0_i32_0 = arith.constant 0 : i32
    %c0_i32_1 = arith.constant 0 : i32
    return %c0_i32, %c0_i32_0 : i32, i32
  }
  func.func @transform_10(%arg0: i32) -> (i32, i32) {
    %c0_i32 = arith.constant 0 : i32
    %c0_i32_0 = arith.constant 0 : i32
    %c0_i32_1 = arith.constant 0 : i32
    return %c0_i32, %c0_i32_0 : i32, i32
  }
  func.func @transform_11(%arg0: i32) -> (i32, i32) {
    %c0_i32 = arith.constant 0 : i32
    %c0_i32_0 = arith.constant 0 : i32
    %c0_i32_1 = arith.constant 0 : i32
    return %c0_i32, %c0_i32_0 : i32, i32
  }
  func.func @transform_12(%arg0: i32) -> (i32, i32) {
    %c0_i32 = arith.constant 0 : i32
    %c0_i32_0 = arith.constant 0 : i32
    %c0_i32_1 = arith.constant 0 : i32
    return %c0_i32, %c0_i32_0 : i32, i32
  }
  func.func @transform_13(%arg0: i32) -> (i32, i32) {
    %c0_i32 = arith.constant 0 : i32
    %c0_i32_0 = arith.constant 0 : i32
    %c0_i32_1 = arith.constant 0 : i32
    return %c0_i32, %c0_i32_0 : i32, i32
  }
  func.func @transform_14(%arg0: i32) -> (i32, i32) {
    %c0_i32 = arith.constant 0 : i32
    %c0_i32_0 = arith.constant 0 : i32
    %c0_i32_1 = arith.constant 0 : i32
    return %c0_i32, %c0_i32_0 : i32, i32
  }
  func.func @transform_15(%arg0: i32) -> (i32, i32) {
    %c0_i32 = arith.constant 0 : i32
    %c0_i32_0 = arith.constant 0 : i32
    return %arg0, %c0_i32 : i32, i32
  }
}

</mosaic_0001>

<bundles_post_ra>
// kernel: tpu_custom_call.1
= control target key start
LH: loop header
LB: loop body
LE: loop exit
PB: predicated region body
PF: predicated region fallthrough
CT: control target
= control target key end

     0   :  { %s13843_s0 = inlined_call_operand.vmem [shape: f32[16,3], index: 0, kind: input, shape index: {}]   ;;  %s13844_s1 = inlined_call_operand.vmem [shape: f32[2,1,8], index: 1, kind: input, shape index: {}]   ;;  %s13845_s2 = inlined_call_operand.hbm [shape: f32[1,8,8], index: 2, kind: input, shape index: {}]   ;;  %s13846_s3 = inlined_call_operand.hbm [shape: f32[3,3], index: 3, kind: input, shape index: {}]   ;;  %s13847_s4 = inlined_call_operand.hbm [shape: f32[1,3], index: 4, kind: input, shape index: {}]   ;;  %s13848_s5 = inlined_call_operand.vmem [shape: f32[3,3], index: 5, kind: input, shape index: {}]   ;;  %s13849_s6 = inlined_call_operand.hbm [shape: f32[1,3], index: 6, kind: input, shape index: {}]   ;;  %s13850_s7 = inlined_call_operand.vmem [shape: f32[3,3], index: 7, kind: input, shape index: {}]   ;;  %s13851_s8 = inlined_call_operand.hbm [shape: f32[1,3], index: 8, kind: input, shape index: {}]   ;;  %s13852_s9 = inlined_call_operand.vmem [shape: f32[3,3], index: 9, kind: input, shape index: {}]   ;;  %s13853_s10 = inlined_call_operand.vmem [shape: f32[1,3], index: 10, kind: input, shape index: {}]   ;;  %s13854_s11 = inlined_call_operand.vmem [shape: f32[3,512], index: 11, kind: input, shape index: {}]   ;;  %s13855_s12 = inlined_call_operand.vmem [shape: f32[1,512], index: 12, kind: input, shape index: {}]   ;;  %s13856_s13 = inlined_call_operand.vmem [shape: f32[3,512], index: 13, kind: input, shape index: {}]   ;;  %s13857_s14 = inlined_call_operand.vmem [shape: f32[1,3], index: 14, kind: input, shape index: {}]   ;;  %s13858_s15 = inlined_call_operand.vmem [shape: f32[16,3], index: 15, kind: output, shape index: {}]  }
   0x1   :  { %13863 = sst [smem:[#allocation15_spill]] %s13857_s14 }
   0x2   :  { %13864 = sst [smem:[#allocation16_spill]] %s13858_s15 }
   0x3   :  { %20 = vsyncpa [#allocation4], 0 }
   0x4   :  { %21 = vsyncpa [#allocation6], 0 }
   0x5   :  { %22 = vsyncpa [#allocation9], 0  ;;  %s12583_s18 = smov 0  }
   0x6 LB: > { %13865 = sst [smem:[#allocation14_spill]] %s12494_s18  ;;  %s12496_s19 = smov [#allocation5]   ;;  %s12494_s18 = sphi %s12583_s18, %s28_s18  }
   0x7   : > { %s408_s20 = sshll.u32 %s12496_s19, 4  ;;  %s12589_s21 = sadd.s32 4294967295, %s12494_s18   ;;  %s12594_s20 = int_to_ptr.vmem [resolvable:$true] %s408_s20 }
   0x8   : > { %p11016_p0 = scmp.ge.s32.totalorder %s12494_s18, 1  ;;  %p384_p1 = scmp.lt.s32.totalorder %s12494_s18, 3 }
   0x9   : > { %p13861_p2 = scmp.eq.s32.totalorder %s12589_s21, 0  ;;  %s12497_s23 = smov [#allocation8]  }
   0xa   : > { %p12596_p3 = pnand %p11016_p0, %p384_p1  ;;  %s433_s24 = sshll.u32 %s12497_s23, 4  ;;  %s12602_s24 = int_to_ptr.vmem [resolvable:$true] %s433_s24 }
   0xb   : > { %s12498_s25 = smov [#allocation3]   ;;  %s12499_s28 = smov [#allocation7]  }
   0xc   : > { %s13866_s22 = scalar_select %p12596_p3, 1, 0 }
   0xd   : > { %p12233_p4 = pneg %p12596_p3  ;;  %s397_s26 = sshll.u32 %s12498_s25, 4  ;;  %s12610_s26 = int_to_ptr.vmem [resolvable:$true] %s397_s26 }
   0xe   : > { %s419_s29 = sshll.u32 %s12499_s28, 4  ;;  %s12336_s17 = scalar_lea.hbm %s13846_s3, 64  ;;  %s12612_s29 = int_to_ptr.vmem [resolvable:$true] %s419_s29 }
   0xf   : > { %p12606_p5 = pnand %p13861_p2, %p12233_p4  ;;  %p12337_p6 = scmp.ne.s32.totalorder %s13846_s3, %s12336_s17 }
  0x10   : > { %p12343_p10 = scmp.lt.u32.totalorder %s12336_s17, %s13846_s3 }
  0x11   : > { %p12622_p7 = pneg %p12606_p5 }
  0x13   : > { %p12339_p8 = pnand %p12622_p7, %p12337_p6 }
  0x15   : > { %p12340_p9 = pneg %p12339_p8 }
  0x17   : > { %p12345_p11 = pnand %p12343_p10, %p12340_p9 }
  0x19   : > { %12348 = shalt.err (!%p12345_p11)
}
  0x1a   : > { %s12349_s30 = scalar_lea.vmem %s12594_s20, 64  ;;  %p12357_p1 = scmp.lt.s32.totalorder %s12594_s20, %s12594_s20 }
  0x1b   : > { %p12350_p12 = scmp.ne.s32.totalorder %s12594_s20, %s12349_s30  ;;  %p12358_p4 = scmp.lt.s32.totalorder %s12349_s30, %s12349_s30 }
  0x1d   : > { %p12352_p13 = pnand %p12350_p12, %p12622_p7  ;;  %p12359_p6 = por %p12358_p4, %p12357_p1 }
  0x1f   : > { %p12353_p0 = pneg %p12352_p13 }
  0x21   : > { %p12360_p8 = pnand %p12359_p6, %p12353_p0 }
  0x23   : > { %12363 = shalt.err (!%p12360_p8)
}
  0x24   : > { %12239 = dma.hbm_to_vmem [thread:$0]  (!%p12606_p5), %s13846_s3, 64, %s12594_s20, [#allocation6]  }
  0x25   : > { %s12364_s23 = scalar_lea.hbm %s13849_s6, 16 }
  0x26   : > { %p12365_p9 = scmp.ne.s32.totalorder %s13849_s6, %s12364_s23  ;;  %p12371_p12 = scmp.lt.u32.totalorder %s12364_s23, %s13849_s6 }
  0x28   : > { %p12367_p10 = pnand %p12365_p9, %p12622_p7 }
  0x2a   : > { %p12368_p11 = pneg %p12367_p10 }
  0x2c   : > { %p12373_p13 = pnand %p12371_p12, %p12368_p11 }
  0x2e   : > { %12376 = shalt.err (!%p12373_p13)
}
  0x2f   : > { %s12377_s20 = scalar_lea.vmem %s12602_s24, 16  ;;  %s12384_s15 = scalar_lea.vmem %s12602_s24, 32 }
  0x30   : > { %p12378_p0 = scmp.ne.s32.totalorder %s12602_s24, %s12377_s20  ;;  %p12385_p6 = scmp.lt.s32.totalorder %s12602_s24, %s12602_s24 }
  0x31   : > { %p12386_p8 = scmp.lt.s32.totalorder %s12384_s15, %s12377_s20 }
  0x32   : > { %p12380_p1 = pnand %p12378_p0, %p12622_p7 }
  0x33   : > { %p12387_p9 = por %p12386_p8, %p12385_p6 }
  0x34   : > { %p12381_p4 = pneg %p12380_p1 }
  0x36   : > { %p12388_p10 = pnand %p12387_p9, %p12381_p4 }
  0x38   : > { %12391 = shalt.err (!%p12388_p10)
}
  0x39   : > { %12245 = dma.hbm_to_vmem [thread:$0]  (!%p12606_p5), %s13849_s6, 16, %s12602_s24, [#allocation9]  }
  0x3a   : > { %s12392_s19 = scalar_lea.hbm %s13845_s2, 128 }
  0x3b   : > { %p12393_p11 = scmp.ne.s32.totalorder %s13845_s2, %s12392_s19  ;;  %p12399_p0 = scmp.lt.u32.totalorder %s12392_s19, %s13845_s2 }
  0x3d   : > { %p12395_p12 = pnand %p12393_p11, %p12622_p7 }
  0x3f   : > { %p12396_p13 = pneg %p12395_p12 }
  0x41   : > { %p12401_p1 = pnand %p12399_p0, %p12396_p13 }
  0x43   : > { %12404 = shalt.err (!%p12401_p1)
}
  0x44   : > { %s12405_s24 = scalar_lea.vmem %s12610_s26, 128  ;;  %p12413_p9 = scmp.lt.s32.totalorder %s12610_s26, %s12610_s26 }
  0x45   : > { %p12406_p4 = scmp.ne.s32.totalorder %s12610_s26, %s12405_s24  ;;  %p12414_p10 = scmp.lt.s32.totalorder %s12405_s24, %s12405_s24 }
  0x47   : > { %p12408_p6 = pnand %p12406_p4, %p12622_p7  ;;  %p12415_p11 = por %p12414_p10, %p12413_p9 }
  0x49   : > { %p12409_p8 = pneg %p12408_p6 }
  0x4b   : > { %p12416_p12 = pnand %p12415_p11, %p12409_p8 }
  0x4d   : > { %12419 = shalt.err (!%p12416_p12)
}
  0x4e   : > { %12236 = dma.hbm_to_vmem [thread:$0]  (!%p12606_p5), %s13845_s2, 128, %s12610_s26, [#allocation4]  }
  0x4f   : > { %s12420_s17 = scalar_lea.hbm %s13847_s4, 16 }
  0x50   : > { %p12421_p13 = scmp.ne.s32.totalorder %s13847_s4, %s12420_s17  ;;  %p12427_p4 = scmp.lt.u32.totalorder %s12420_s17, %s13847_s4 }
  0x52   : > { %p12423_p0 = pnand %p12421_p13, %p12622_p7 }
  0x54   : > { %p12424_p1 = pneg %p12423_p0 }
  0x56   : > { %p12429_p6 = pnand %p12427_p4, %p12424_p1 }
  0x58   : > { %12432 = shalt.err (!%p12429_p6)
}
  0x59   : > { %s12433_s26 = scalar_lea.vmem %s12612_s29, 16  ;;  %s12440_s20 = scalar_lea.vmem %s12612_s29, 32 }
  0x5a   : > { %p12434_p8 = scmp.ne.s32.totalorder %s12612_s29, %s12433_s26  ;;  %p12441_p11 = scmp.lt.s32.totalorder %s12612_s29, %s12612_s29 }
  0x5b   : > { %p12442_p12 = scmp.lt.s32.totalorder %s12440_s20, %s12433_s26 }
  0x5c   : > { %p12436_p9 = pnand %p12434_p8, %p12622_p7 }
  0x5d   : > { %p12443_p13 = por %p12442_p12, %p12441_p11 }
  0x5e   : > { %p12437_p10 = pneg %p12436_p9 }
  0x60   : > { %p12444_p0 = pnand %p12443_p13, %p12437_p10 }
  0x62   : > { %12447 = shalt.err (!%p12444_p0)
}
  0x63   : > { %12242 = dma.hbm_to_vmem [thread:$0]  (!%p12606_p5), %s13847_s4, 16, %s12612_s29, [#allocation6]  }
  0x64   : > { %s12500_s14 = smov [#allocation10]   ;;  %s12448_s19 = scalar_lea.hbm %s13851_s8, 16 }
  0x65   : > { %s447_s18 = sshll.u32 %s12500_s14, 4  ;;  %p12449_p1 = scmp.ne.s32.totalorder %s13851_s8, %s12448_s19  ;;  %s448_s18 = int_to_ptr.vmem [resolvable:$true] %s447_s18 }
  0x66   : > { %p12455_p8 = scmp.lt.u32.totalorder %s12448_s19, %s13851_s8 }
  0x67   : > { %p12451_p4 = pnand %p12449_p1, %p12622_p7 }
  0x69   : > { %p12452_p6 = pneg %p12451_p4 }
  0x6b   : > { %p12457_p9 = pnand %p12455_p8, %p12452_p6 }
  0x6d   : > { %12460 = shalt.err (!%p12457_p9)
}
  0x6e   : > { %s12461_s29 = scalar_lea.vmem %s448_s18, 16  ;;  %s12468_s20 = scalar_lea.vmem %s448_s18, 32 }
  0x6f   : > { %p12462_p10 = scmp.ne.s32.totalorder %s448_s18, %s12461_s29  ;;  %p12469_p13 = scmp.lt.s32.totalorder %s448_s18, %s448_s18 }
  0x70   : > { %p12470_p0 = scmp.lt.s32.totalorder %s12468_s20, %s12461_s29 }
  0x71   : > { %p12464_p11 = pnand %p12462_p10, %p12622_p7 }
  0x72   : > { %p12471_p2 = por %p12470_p0, %p12469_p13 }
  0x73   : > { %p12465_p12 = pneg %p12464_p11 }
  0x75   : > { %p12472_p3 = pnand %p12471_p2, %p12465_p12 }
  0x77   : > { %12475 = shalt.err (!%p12472_p3)
}
  0x78   : > { %12248 = dma.hbm_to_vmem [thread:$0]  (!%p12606_p5), %s13851_s8, 16, %s448_s18, [#allocation9]  }
  0x79   : > { %p13869_p1 = scmp.ne.s32.totalorder %s13866_s22, 0 }
  0x7a   : > { %p13870_p4 = scmp.eq.s32.totalorder (!%p13869_p1), %s12589_s21, 0 }
  0x7b   : > { %491 = sbr.rel (%p13869_p1) target bundleno = 18515 (0x4853), region = 80 }
  0x82   : > { %12481 = dma.done.wait (%p13870_p4), [#allocation4], 128   ;;  %p13871_p7 = pmov %p13870_p4 }
  0x83   : > { %p13872_p6 = pmov %p13870_p4 }
  0x84   : > { %12483 = vsyncadd (%p13871_p7), [#allocation4], 4294967168 }
  0x85   : > { %12485 = dma.done.wait (%p13872_p6), [#allocation6], 80   ;;  %p13873_p2 = pmov %p13870_p4 }
  0x87   : > { %12487 = vsyncadd (%p13873_p2), [#allocation6], 4294967216  ;;  %p13874_p3 = pmov %p13873_p2 }
  0x88   : > { %p13875_p5 = pmov %p13873_p2 }
  0x89   : > { %12489 = dma.done.wait (%p13874_p3), [#allocation9], 32  }
  0x8a   : > { %12491 = vsyncadd (%p13875_p5), [#allocation9], 4294967264  ;;  %p556_p8 = scmp.lt.s32.totalorder %s12589_s21, 1  ;;  %v12501_v0 = vmov 0.0   ;;  %vm12502_vm0 = vmmov 0   ;;  %vm591_vm1 = vcmask 1042432  }
  0x8b   : > { %11518 = vmatprep.subr.mxu1 %v12501_v0  ;;  %11520 = vmatprep.mubr.msk.f32.mxu1 %vm12502_vm0, %v12501_v0  ;;  %vm587_vm2 = vcmask 23552   ;;  %v12769_v1 = vld [vmem:[%s13848_s5] sm:$0x7]  ;;  %v567_v2 = vld [vmem:[#allocation3] sm:$0xff]  ;;  %vm576_vm3 = vcmask 64512   ;;  %s13876_s26 = sld [smem:[#allocation15_spill]] }
  0x8c   : > { %11513 = vmatprep.subr.mxu0 %v12501_v0  ;;  %s13880_s21 = smov (!%p556_p8, %s12589_s21), 1  ;;  %11515 = vmatprep.mubr.msk.f32.mxu0 %vm12502_vm0, %v12501_v0  ;;  %v12775_v6 = vld [vmem:[#allocation5] sm:$0x7]  ;;  %v12790_v7 = vld [vmem:[#allocation8] ss:$0 sm:$0xff]  ;;  %s13877_s16 = sld [smem:[#allocation16_spill]] }
  0x8d   : > { %s11029_s22 = sshll.u32 %s13880_s21, 3  ;;  %s562_s14 = scalar_lea.vmem %s13844_s1, %s13880_s21  ;;  %11519 = vmatpush3.msk.msra.mxu1 %vm591_vm1, %v12769_v1  ;;  %11514 = vmatpush3.msk.msra.mxu0 %vm591_vm1, %v12775_v6  ;;  %v12792_v8 = vld [vmem:[#allocation7] ss:$0 sm:$0xff]  ;;  %v12804_v15 = vld [vmem:[%s13850_s7] sm:$0x7] }
  0x8e   : > { %s559_s17 = scalar_lea.vmem %s13843_s0, %s11029_s22  ;;  %v11031_v3 = vld [vmem:[%s562_s14] ss:$0 sm:$0xff]  ;;  %11523 = vmatprep.subr.mxu0 %v12501_v0  ;;  %11528 = vmatprep.subr.mxu1 %v12501_v0  ;;  %v12818_v28 = vld [vmem:[#allocation10] ss:$0 sm:$0xff]  ;;  %v12839_v37 = vld [vmem:[%s13854_s11 + $0x4] sm:$0x7] }
  0x8f   : > { %v575_v4 = vadd.f32 %v11031_v3, %v567_v2  ;;  %v12773_v5 = vld [vmem:[%s559_s17] sm:$0xff]  ;;  %v12898_v57 = vld [vmem:[%s13854_s11 + $0x8] sm:$0x7]  ;;  %v12908_v58 = vld [vmem:[%s13854_s11 + $0xc] sm:$0x7] }
  0x90   : > { %11521 = vmatmul.mubr.msk.f32.vlgmr.msra.gmra.mrb[0].mxu1 %vm587_vm2, %v12773_v5  ;;  %11516 = vmatmul.mubr.msk.f32.vlgmr.msra.gmra.mrb[0].mxu0 %vm587_vm2, %v12773_v5  ;;  %v12824_v31 = vld [vmem:[%s13852_s9] sm:$0x7]  ;;  %v12872_v45 = vld [vmem:[%s13856_s13 + $0x4] sm:$0x7]  ;;  %v12929_v59 = vld [vmem:[%s13856_s13 + $0x8] sm:$0x7] }
  0x91   : > { %577 = vst.msk [vmem:[#allocation2] sm:$0xff] %vm576_vm3, %v575_v4  ;;  %11525 = vmatprep.mubr.msk.f32.mxu0 %vm12502_vm0, %v12501_v0  ;;  %11530 = vmatprep.mubr.msk.f32.mxu1 %vm12502_vm0, %v12501_v0  ;;  %v12844_v38 = vld [vmem:[%s13854_s11] sm:$0x7] }
  0x92   : > { %11529 = vmatpush3.msk.msra.mxu1 %vm591_vm1, %v12804_v15  ;;  %v12855_v39 = vld [vmem:[%s13853_s10] ss:$0 sm:$0xff]  ;;  %v12891_v48 = vld [vmem:[%s13855_s12 + $0x1] ss:$0 sm:$0xff]  ;;  %v12936_v3 = vld [vmem:[%s13855_s12 + $0x2] ss:$0 sm:$0xff]  ;;  %s566_s17 = scalar_lea.vmem %s13877_s16, %s11029_s22 }
  0x93   : > { %11538 = vmatprep.subr.mxu1 %v12501_v0  ;;  %v12877_v46 = vld [vmem:[%s13856_s13] sm:$0x7] }
  0x94   : > { %11531 = vmatmul.mubr.msk.f32.vlgmr.msra.gmra.mrb[2].mxu1 %vm587_vm2, %v12773_v5  ;;  %v12886_v47 = vld [vmem:[%s13855_s12] ss:$0 sm:$0xff] }
  0x95   : > { %11540 = vmatprep.mubr.msk.f32.mxu1 %vm12502_vm0, %v12501_v0  ;;  %11539 = vmatpush3.msk.msra.mxu1 %vm591_vm1, %v12824_v31 }
  0x96   : > { %11548 = vmatprep.subr.mxu1 %v12501_v0 }
  0x98   : > { %v12813_v17 = vld [vmem:[#allocation2] sm:$0xff] }
 0x163   : > { %v742_v9 = vpop.f32.mrb[0].mxu1  ;;  %v661_v12 = vpop.f32.mrb[0].mxu0 }
 0x164   : > { %v743_v10 = vadd.f32 %v12790_v7, %v742_v9  ;;  %v11522_v11 = vpop.f32.mrb[1].mxu1  ;;  %v662_v13 = vadd.f32 %v12792_v8, %v661_v12  ;;  %v11517_v14 = vpop.f32.mrb[1].mxu0  ;;  %v12947_v12 = vld [vmem:[%s13856_s13 + $0xc] sm:$0x7] }
 0x166   : > { %11524 = vmatpush3.xpose.msk.msra.mxu0 %vm587_vm2, %v743_v10  ;;  %v12942_v10 = vld [vmem:[%s13855_s12 + $0x3] ss:$0 sm:$0xff] }
 0x167   : > { %11533 = vmatprep.subr.mxu0 %v12501_v0  ;;  %v913_v27 = vpop.f32.mrb[2].mxu1 }
 0x168   : > { %v11532_v29 = vpop.f32.mrb[3].mxu1  ;;  %v914_v30 = vadd.f32 %v12818_v28, %v913_v27 }
 0x169   : > { %11526 = vmatmul.mubr.msk.f32.vlgmr.msra.gmra.mrb[2].mxu0 %vm587_vm2, %v662_v13 }
 0x16a   : > { %11535 = vmatprep.mubr.msk.f32.mxu0 %vm12502_vm0, %v12501_v0  ;;  %11534 = vmatpush3.msra.mxu0 %v914_v30 }
 0x16b   : > { %11543 = vmatprep.subr.mxu0 %v12501_v0 }
 0x23c   : > { %v818_v16 = vpop.f32.mrb[2].mxu0 }
 0x23d   : > { %v822_v18 = vmul.f32 0.57735026, %v818_v16  ;;  %v11527_v19 = vpop.f32.mrb[3].mxu0 }
 0x23f   : > { %v824_v20 = vadd.f32 %v12813_v17, %v822_v18 }
 0x241   : > { %v825_v21 = vsel %vm576_vm3, %v824_v20, -inf }
 0x242   : > { %826 = vmax.xlane.f32.xlu0 %v825_v21 }
 0x2cf   : > { %v827_v22 = vpop.xlane.xlu0 %826 }
 0x2d0   : > { %v828_v23 = vsub.f32 %v824_v20, %v827_v22 }
 0x2d2   : > { %v829_v24 = vmul.f32 1.442695, %v828_v23  ;;  %v12962_v23 = vld [vmem:[%s13876_s26] ss:$0 sm:$0xff] }
 0x2d4   : > { %12274 = vpow2.f32 %v829_v24 }
 0x2de   : > { %v12275_v25 = vpop.eup %12274 }
 0x2df   : > { %v831_v26 = vsel %vm576_vm3, %v12275_v25, 0.0 }
 0x2e0   : > { %832 = vadd.xlane.f32.xlu0 %v831_v26 }
 0x36d   : > { %v833_v32 = vpop.xlane.xlu0 %832 }
 0x36e   : > { %12276 = vrcp.f32 %v833_v32 }
 0x378   : > { %v12277_v33 = vpop.eup %12276 }
 0x379   : > { %v835_v34 = vmul.f32 %v12277_v33, %v12275_v25 }
 0x37b   : > { %11536 = vmatmul.mubr.msk.f32.vlgmr.msra.gmra.mrb[4].mxu0 %vm576_vm3, %v835_v34 }
 0x37c   : > { %11545 = vmatprep.mubr.msk.f32.mxu0 %vm12502_vm0, %v12501_v0  ;;  %11544 = vmatpush3.msk.msra.mxu0 %vm591_vm1, %v12844_v38 }
 0x37d   : > { %11553 = vmatprep.subr.mxu0 %v12501_v0 }
 0x44e   : > { %v986_v35 = vpop.f32.mrb[4].mxu0 }
 0x44f   : > { %v11537_v36 = vpop.f32.mrb[5].mxu0  ;;  %11541 = vmatmul.mubr.msk.f32.vlgmr.msra.gmra.mrb[4].mxu1 %vm587_vm2, %v986_v35 }
 0x450   : > { %11550 = vmatprep.mubr.msk.f32.mxu1 %vm12502_vm0, %v12501_v0  ;;  %11549 = vmatpush3.msk.msra.mxu1 %vm591_vm1, %v12839_v37 }
 0x451   : > { %11558 = vmatprep.subr.mxu1 %v12501_v0 }
 0x522   : > { %v1070_v40 = vpop.f32.mrb[4].mxu1 }
 0x523   : > { %v1071_v41 = vadd.f32 %v12855_v39, %v1070_v40  ;;  %v11542_v42 = vpop.f32.mrb[5].mxu1 }
 0x525   : > { %v1074_v43 = vmul.f32 0.1, %v1071_v41 }
 0x527   : > { %v12859_v44 = vadd.f32 %v1074_v43, %v12773_v5 }
 0x529   : > { %11546 = vmatmul.mubr.msk.f32.vlgmr.msra.gmra.mrb[6].mxu0 %vm587_vm2, %v12859_v44  ;;  %11551 = vmatmul.mubr.msk.f32.vlgmr.msra.gmra.mrb[6].mxu1 %vm587_vm2, %v12859_v44 }
 0x52a   : > { %11555 = vmatprep.mubr.msk.f32.mxu0 %vm12502_vm0, %v12501_v0  ;;  %11560 = vmatprep.mubr.msk.f32.mxu1 %vm12502_vm0, %v12501_v0 }
 0x52b   : > { %11554 = vmatpush3.xpose.msra.mxu0 %v12872_v45  ;;  %11559 = vmatpush3.xpose.msra.mxu1 %v12877_v46 }
 0x52c   : > { %11563 = vmatprep.subr.mxu0 %v12501_v0  ;;  %11568 = vmatprep.subr.mxu1 %v12501_v0 }
 0x5fc   : > { %v1156_v49 = vpop.f32.mrb[6].mxu0  ;;  %v1239_v50 = vpop.f32.mrb[6].mxu1 }
 0x5fd   : > { %v1157_v51 = vadd.f32 %v12886_v47, %v1156_v49  ;;  %v1240_v52 = vadd.f32 %v12891_v48, %v1239_v50  ;;  %v11547_v53 = vpop.f32.mrb[7].mxu0  ;;  %v11552_v54 = vpop.f32.mrb[7].mxu1 }
 0x5ff   : > { %v1160_v55 = vmax.f32 %v1157_v51, 0.0  ;;  %v1243_v56 = vmax.f32 %v1240_v52, 0.0 }
 0x601   : > { %11556 = vmatmul.mubr.f32.vlgmr.msra.gmra.mrb[8].mxu0 %v1243_v56  ;;  %11561 = vmatmul.mubr.f32.vlgmr.msra.gmra.mrb[8].mxu1 %v1160_v55 }
 0x602   : > { %11564 = vmatpush3.msk.msra.mxu0 %vm591_vm1, %v12898_v57  ;;  %11565 = vmatprep.mubr.msk.f32.mxu0 %vm12502_vm0, %v12501_v0 }
 0x603   : > { %11573 = vmatprep.subr.mxu0 %v12501_v0  ;;  %11570 = vmatprep.mubr.msk.f32.mxu1 %vm12502_vm0, %v12501_v0 }
 0x604   : > { %11569 = vmatpush3.xpose.msra.mxu1 %v12929_v59 }
 0x605   : > { %11566 = vmatmul.mubr.msk.f32.vlgmr.msra.gmra.mrb[10].mxu0 %vm587_vm2, %v12859_v44  ;;  %11578 = vmatprep.subr.mxu1 %v12501_v0 }
 0x606   : > { %11574 = vmatpush3.msk.msra.mxu0 %vm591_vm1, %v12908_v58  ;;  %11575 = vmatprep.mubr.msk.f32.mxu0 %vm12502_vm0, %v12501_v0 }
 0x607   : > { %11583 = vmatprep.subr.mxu0 %v12501_v0 }
 0x609   : > { %11576 = vmatmul.mubr.msk.f32.vlgmr.msra.gmra.mrb[12].mxu0 %vm587_vm2, %v12859_v44 }
 0x60a   : > { %11584 = vmatpush3.msk.msra.mxu0 %vm591_vm1, %v12775_v6  ;;  %11585 = vmatprep.mubr.msk.f32.mxu0 %vm12502_vm0, %v12501_v0 }
 0x60b   : > { %11593 = vmatprep.subr.mxu0 %v12501_v0 }
 0x6d4   : > { %v1311_v60 = vpop.f32.mrb[8].mxu0  ;;  %v1381_v61 = vpop.f32.mrb[8].mxu1 }
 0x6d5   : > { %v1382_v62 = vadd.f32 %v1381_v61, %v1311_v60  ;;  %v11557_v63 = vpop.f32.mrb[9].mxu0  ;;  %v11562_v2 = vpop.f32.mrb[9].mxu1 }
 0x6d8   : > { %v1462_v4 = vpop.f32.mrb[10].mxu0 }
 0x6d9   : > { %v1463_v5 = vadd.f32 %v12936_v3, %v1462_v4  ;;  %v11567_v9 = vpop.f32.mrb[11].mxu0 }
 0x6db   : > { %v1466_v11 = vmax.f32 %v1463_v5, 0.0 }
 0x6dc   : > { %v1616_v13 = vpop.f32.mrb[12].mxu0 }
 0x6dd   : > { %v1617_v14 = vadd.f32 %v12942_v10, %v1616_v13  ;;  %11571 = vmatmul.mubr.f32.vlgmr.msra.gmra.mrb[10].mxu1 %v1466_v11  ;;  %v11577_v16 = vpop.f32.mrb[13].mxu0 }
 0x6de   : > { %11579 = vmatpush3.xpose.msra.mxu1 %v12947_v12  ;;  %11580 = vmatprep.mubr.msk.f32.mxu1 %vm12502_vm0, %v12501_v0 }
 0x6df   : > { %v1620_v18 = vmax.f32 %v1617_v14, 0.0  ;;  %11588 = vmatprep.subr.mxu1 %v12501_v0 }
 0x6e1   : > { %11581 = vmatmul.mubr.f32.vlgmr.msra.gmra.mrb[12].mxu1 %v1620_v18 }
 0x6e2   : > { %11589 = vmatpush3.msk.msra.mxu1 %vm591_vm1, %v12769_v1  ;;  %11590 = vmatprep.mubr.msk.f32.mxu1 %vm12502_vm0, %v12501_v0 }
 0x6e3   : > { %11598 = vmatprep.subr.mxu1 %v12501_v0 }
 0x7b0   : > { %v1534_v19 = vpop.f32.mrb[10].mxu1 }
 0x7b1   : > { %v1538_v20 = vadd.f32 %v1534_v19, %v1382_v62  ;;  %v11572_v21 = vpop.f32.mrb[11].mxu1 }
 0x7b4   : > { %v1688_v22 = vpop.f32.mrb[12].mxu1 }
 0x7b5   : > { %v1692_v24 = vadd.f32 %v1688_v22, %v1538_v20  ;;  %v11582_v25 = vpop.f32.mrb[13].mxu1 }
 0x7b7   : > { %v1700_v26 = vadd.f32 %v12962_v23, %v1692_v24 }
 0x7b9   : > { %v1701_v27 = vmul.f32 0.1, %v1700_v26 }
 0x7bb   : > { %v1702_v29 = vadd.f32 %v1701_v27, %v12859_v44 }
 0x7bd   : > { %11586 = vmatmul.mubr.msk.f32.vlgmr.msra.gmra.mrb[14].mxu0 %vm587_vm2, %v1702_v29  ;;  %11591 = vmatmul.mubr.msk.f32.vlgmr.msra.gmra.mrb[14].mxu1 %vm587_vm2, %v1702_v29 }
 0x7be   : > { %11599 = vmatpush3.msk.msra.mxu1 %vm591_vm1, %v12804_v15  ;;  %11600 = vmatprep.mubr.msk.f32.mxu1 %vm12502_vm0, %v12501_v0 }
 0x7bf   : > { %11595 = vmatprep.mubr.msk.f32.mxu0 %vm12502_vm0, %v12501_v0  ;;  %11608 = vmatprep.subr.mxu1 %v12501_v0 }
 0x7c1   : > { %11601 = vmatmul.mubr.msk.f32.vlgmr.msra.gmra.mrb[16].mxu1 %vm587_vm2, %v1702_v29 }
 0x7c2   : > { %11609 = vmatpush3.msk.msra.mxu1 %vm591_vm1, %v12824_v31  ;;  %11610 = vmatprep.mubr.msk.f32.mxu1 %vm12502_vm0, %v12501_v0 }
 0x7c3   : > { %11618 = vmatprep.subr.mxu1 %v12501_v0 }
 0x890   : > { %v1772_v30 = vpop.f32.mrb[14].mxu0  ;;  %v1842_v32 = vpop.f32.mrb[14].mxu1 }
 0x891   : > { %v1843_v33 = vadd.f32 %v12790_v7, %v1842_v32  ;;  %v11587_v34 = vpop.f32.mrb[15].mxu0  ;;  %v11592_v35 = vpop.f32.mrb[15].mxu1  ;;  %v1773_v36 = vadd.f32 %v12792_v8, %v1772_v30 }
 0x893   : > { %11594 = vmatpush3.xpose.msk.msra.mxu0 %vm587_vm2, %v1843_v33 }
 0x894   : > { %v2001_v40 = vpop.f32.mrb[16].mxu1  ;;  %11603 = vmatprep.subr.mxu0 %v12501_v0 }
 0x895   : > { %v2002_v41 = vadd.f32 %v12818_v28, %v2001_v40  ;;  %v11602_v42 = vpop.f32.mrb[17].mxu1 }
 0x896   : > { %11596 = vmatmul.mubr.msk.f32.vlgmr.msra.gmra.mrb[16].mxu0 %vm587_vm2, %v1773_v36 }
 0x897   : > { %11604 = vmatpush3.msra.mxu0 %v2002_v41  ;;  %11605 = vmatprep.mubr.msk.f32.mxu0 %vm12502_vm0, %v12501_v0 }
 0x898   : > { %11613 = vmatprep.subr.mxu0 %v12501_v0 }
 0x969   : > { %v1918_v43 = vpop.f32.mrb[16].mxu0 }
 0x96a   : > { %v1922_v44 = vmul.f32 0.57735026, %v1918_v43  ;;  %v11597_v49 = vpop.f32.mrb[17].mxu0 }
 0x96c   : > { %v1923_v50 = vadd.f32 %v1922_v44, %v12813_v17 }
 0x96e   : > { %v1924_v51 = vsel %vm576_vm3, %v1923_v50, -inf }
 0x96f   : > { %1925 = vmax.xlane.f32.xlu1 %v1924_v51 }
 0x9fc   : > { %v1926_v52 = vpop.xlane.xlu1 %1925 }
 0x9fd   : > { %v1927_v53 = vsub.f32 %v1923_v50, %v1926_v52 }
 0x9ff   : > { %v1928_v54 = vmul.f32 1.442695, %v1927_v53 }
 0xa01   : > { %12278 = vpow2.f32 %v1928_v54 }
 0xa0b   : > { %v12279_v55 = vpop.eup %12278 }
 0xa0c   : > { %v1930_v56 = vsel %vm576_vm3, %v12279_v55, 0.0 }
 0xa0d   : > { %1931 = vadd.xlane.f32.xlu1 %v1930_v56 }
 0xa9a   : > { %v1932_v60 = vpop.xlane.xlu1 %1931 }
 0xa9b   : > { %12280 = vrcp.f32 %v1932_v60 }
 0xaa5   : > { %v12281_v61 = vpop.eup %12280 }
 0xaa6   : > { %v1934_v62 = vmul.f32 %v12281_v61, %v12279_v55 }
 0xaa8   : > { %11606 = vmatmul.mubr.msk.f32.vlgmr.msra.gmra.mrb[18].mxu0 %vm576_vm3, %v1934_v62 }
 0xaa9   : > { %11614 = vmatpush3.msk.msra.mxu0 %vm591_vm1, %v12844_v38  ;;  %11615 = vmatprep.mubr.msk.f32.mxu0 %vm12502_vm0, %v12501_v0 }
 0xaaa   : > { %11623 = vmatprep.subr.mxu0 %v12501_v0 }
 0xb7b   : > { %v2074_v63 = vpop.f32.mrb[18].mxu0 }
 0xb7c   : > { %v11607_v2 = vpop.f32.mrb[19].mxu0  ;;  %11611 = vmatmul.mubr.msk.f32.vlgmr.msra.gmra.mrb[18].mxu1 %vm587_vm2, %v2074_v63 }
 0xb7d   : > { %11619 = vmatpush3.msk.msra.mxu1 %vm591_vm1, %v12839_v37  ;;  %11620 = vmatprep.mubr.msk.f32.mxu1 %vm12502_vm0, %v12501_v0 }
 0xb7e   : > { %11628 = vmatprep.subr.mxu1 %v12501_v0 }
 0xc4f   : > { %v2147_v4 = vpop.f32.mrb[18].mxu1 }
 0xc50   : > { %v2148_v5 = vadd.f32 %v12855_v39, %v2147_v4  ;;  %v11612_v9 = vpop.f32.mrb[19].mxu1 }
 0xc52   : > { %v2151_v11 = vmul.f32 0.1, %v2148_v5 }
 0xc54   : > { %v2152_v13 = vadd.f32 %v2151_v11, %v1702_v29 }
 0xc56   : > { %11616 = vmatmul.mubr.msk.f32.vlgmr.msra.gmra.mrb[20].mxu0 %vm587_vm2, %v2152_v13  ;;  %11621 = vmatmul.mubr.msk.f32.vlgmr.msra.gmra.mrb[20].mxu1 %vm587_vm2, %v2152_v13 }
 0xc57   : > { %11624 = vmatpush3.xpose.msra.mxu0 %v12872_v45  ;;  %11629 = vmatpush3.xpose.msra.mxu1 %v12877_v46 }
 0xc58   : > { %11625 = vmatprep.mubr.msk.f32.mxu0 %vm12502_vm0, %v12501_v0  ;;  %11630 = vmatprep.mubr.msk.f32.mxu1 %vm12502_vm0, %v12501_v0 }
 0xc59   : > { %11633 = vmatprep.subr.mxu0 %v12501_v0  ;;  %11638 = vmatprep.subr.mxu1 %v12501_v0 }
 0xd29   : > { %v2222_v14 = vpop.f32.mrb[20].mxu0  ;;  %v2293_v16 = vpop.f32.mrb[20].mxu1 }
 0xd2a   : > { %v2223_v18 = vadd.f32 %v12886_v47, %v2222_v14  ;;  %v2294_v19 = vadd.f32 %v12891_v48, %v2293_v16  ;;  %v11617_v20 = vpop.f32.mrb[21].mxu0  ;;  %v11622_v21 = vpop.f32.mrb[21].mxu1 }
 0xd2c   : > { %v2226_v22 = vmax.f32 %v2223_v18, 0.0  ;;  %v2297_v24 = vmax.f32 %v2294_v19, 0.0 }
 0xd2e   : > { %11626 = vmatmul.mubr.f32.vlgmr.msra.gmra.mrb[22].mxu0 %v2297_v24  ;;  %11631 = vmatmul.mubr.f32.vlgmr.msra.gmra.mrb[22].mxu1 %v2226_v22 }
 0xd2f   : > { %11634 = vmatpush3.msk.msra.mxu0 %vm591_vm1, %v12898_v57  ;;  %11635 = vmatprep.mubr.msk.f32.mxu0 %vm12502_vm0, %v12501_v0 }
 0xd30   : > { %11643 = vmatprep.subr.mxu0 %v12501_v0  ;;  %11639 = vmatpush3.xpose.msra.mxu1 %v12929_v59 }
 0xd31   : > { %11640 = vmatprep.mubr.msk.f32.mxu1 %vm12502_vm0, %v12501_v0  ;;  %11648 = vmatprep.subr.mxu1 %v12501_v0 }
 0xd32   : > { %11636 = vmatmul.mubr.msk.f32.vlgmr.msra.gmra.mrb[24].mxu0 %vm587_vm2, %v2152_v13 }
 0xd33   : > { %11644 = vmatpush3.msk.msra.mxu0 %vm591_vm1, %v12908_v58  ;;  %11645 = vmatprep.mubr.msk.f32.mxu0 %vm12502_vm0, %v12501_v0 }
 0xd34   : > { %11653 = vmatprep.subr.mxu0 %v12501_v0 }
 0xd36   : > { %11646 = vmatmul.mubr.msk.f32.vlgmr.msra.gmra.mrb[26].mxu0 %vm587_vm2, %v2152_v13 }
 0xd37   : > { %11654 = vmatpush3.msk.msra.mxu0 %vm591_vm1, %v12775_v6  ;;  %11655 = vmatprep.mubr.msk.f32.mxu0 %vm12502_vm0, %v12501_v0 }
 0xd38   : > { %11663 = vmatprep.subr.mxu0 %v12501_v0 }
 0xe01   : > { %v2364_v25 = vpop.f32.mrb[22].mxu0  ;;  %v2434_v26 = vpop.f32.mrb[22].mxu1 }
 0xe02   : > { %v2435_v27 = vadd.f32 %v2434_v26, %v2364_v25  ;;  %v11627_v29 = vpop.f32.mrb[23].mxu0  ;;  %v11632_v30 = vpop.f32.mrb[23].mxu1 }
 0xe05   : > { %v2504_v32 = vpop.f32.mrb[24].mxu0 }
 0xe06   : > { %v2505_v33 = vadd.f32 %v12936_v3, %v2504_v32  ;;  %v11637_v34 = vpop.f32.mrb[25].mxu0 }
 0xe08   : > { %v2508_v35 = vmax.f32 %v2505_v33, 0.0 }
 0xe09   : > { %v2646_v36 = vpop.f32.mrb[26].mxu0 }
 0xe0a   : > { %v2647_v40 = vadd.f32 %v12942_v10, %v2646_v36  ;;  %11641 = vmatmul.mubr.f32.vlgmr.msra.gmra.mrb[24].mxu1 %v2508_v35  ;;  %v11647_v41 = vpop.f32.mrb[27].mxu0 }
 0xe0b   : > { %11649 = vmatpush3.xpose.msra.mxu1 %v12947_v12  ;;  %11650 = vmatprep.mubr.msk.f32.mxu1 %vm12502_vm0, %v12501_v0 }
 0xe0c   : > { %v2650_v42 = vmax.f32 %v2647_v40, 0.0  ;;  %11658 = vmatprep.subr.mxu1 %v12501_v0 }
 0xe0e   : > { %11651 = vmatmul.mubr.f32.vlgmr.msra.gmra.mrb[26].mxu1 %v2650_v42 }
 0xe0f   : > { %11659 = vmatpush3.msk.msra.mxu1 %vm591_vm1, %v12769_v1  ;;  %11660 = vmatprep.mubr.msk.f32.mxu1 %vm12502_vm0, %v12501_v0 }
 0xe10   : > { %11668 = vmatprep.subr.mxu1 %v12501_v0 }
 0xedd   : > { %v2575_v43 = vpop.f32.mrb[24].mxu1 }
 0xede   : > { %v2579_v44 = vadd.f32 %v2575_v43, %v2435_v27  ;;  %v11642_v49 = vpop.f32.mrb[25].mxu1 }
 0xee1   : > { %v2717_v50 = vpop.f32.mrb[26].mxu1 }
 0xee2   : > { %v2721_v51 = vadd.f32 %v2717_v50, %v2579_v44  ;;  %v11652_v52 = vpop.f32.mrb[27].mxu1 }
 0xee4   : > { %v2722_v53 = vadd.f32 %v12962_v23, %v2721_v51 }
 0xee6   : > { %v2723_v54 = vmul.f32 0.1, %v2722_v53 }
 0xee8   : > { %v2724_v55 = vadd.f32 %v2723_v54, %v2152_v13 }
 0xeea   : > { %11656 = vmatmul.mubr.msk.f32.vlgmr.msra.gmra.mrb[28].mxu0 %vm587_vm2, %v2724_v55  ;;  %11661 = vmatmul.mubr.msk.f32.vlgmr.msra.gmra.mrb[28].mxu1 %vm587_vm2, %v2724_v55 }
 0xeeb   : > { %11669 = vmatpush3.msk.msra.mxu1 %vm591_vm1, %v12804_v15  ;;  %11670 = vmatprep.mubr.msk.f32.mxu1 %vm12502_vm0, %v12501_v0 }
 0xeec   : > { %11665 = vmatprep.mubr.msk.f32.mxu0 %vm12502_vm0, %v12501_v0  ;;  %11678 = vmatprep.subr.mxu1 %v12501_v0 }
 0xeee   : > { %11671 = vmatmul.mubr.msk.f32.vlgmr.msra.gmra.mrb[30].mxu1 %vm587_vm2, %v2724_v55 }
 0xeef   : > { %11679 = vmatpush3.msk.msra.mxu1 %vm591_vm1, %v12824_v31  ;;  %11680 = vmatprep.mubr.msk.f32.mxu1 %vm12502_vm0, %v12501_v0 }
 0xef0   : > { %11688 = vmatprep.subr.mxu1 %v12501_v0 }
 0xfbd   : > { %v2794_v56 = vpop.f32.mrb[28].mxu0  ;;  %v2864_v60 = vpop.f32.mrb[28].mxu1 }
 0xfbe   : > { %v2865_v61 = vadd.f32 %v12790_v7, %v2864_v60  ;;  %v11657_v62 = vpop.f32.mrb[29].mxu0  ;;  %v11662_v63 = vpop.f32.mrb[29].mxu1  ;;  %v2795_v2 = vadd.f32 %v12792_v8, %v2794_v56 }
 0xfc0   : > { %11664 = vmatpush3.xpose.msk.msra.mxu0 %vm587_vm2, %v2865_v61 }
 0xfc1   : > { %v3023_v4 = vpop.f32.mrb[30].mxu1  ;;  %11673 = vmatprep.subr.mxu0 %v12501_v0 }
 0xfc2   : > { %v3024_v5 = vadd.f32 %v12818_v28, %v3023_v4  ;;  %v11672_v9 = vpop.f32.mrb[31].mxu1 }
 0xfc3   : > { %11666 = vmatmul.mubr.msk.f32.vlgmr.msra.gmra.mrb[30].mxu0 %vm587_vm2, %v2795_v2 }
 0xfc4   : > { %11674 = vmatpush3.msra.mxu0 %v3024_v5  ;;  %11675 = vmatprep.mubr.msk.f32.mxu0 %vm12502_vm0, %v12501_v0 }
 0xfc5   : > { %11683 = vmatprep.subr.mxu0 %v12501_v0 }
0x1096   : > { %v2940_v11 = vpop.f32.mrb[30].mxu0 }
0x1097   : > { %v2944_v13 = vmul.f32 0.57735026, %v2940_v11  ;;  %v11667_v14 = vpop.f32.mrb[31].mxu0 }
0x1099   : > { %v2945_v16 = vadd.f32 %v2944_v13, %v12813_v17 }
0x109b   : > { %v2946_v18 = vsel %vm576_vm3, %v2945_v16, -inf }
0x109c   : > { %2947 = vmax.xlane.f32.xlu0 %v2946_v18 }
0x1129   : > { %v2948_v19 = vpop.xlane.xlu0 %2947 }
0x112a   : > { %v2949_v20 = vsub.f32 %v2945_v16, %v2948_v19 }
0x112c   : > { %v2950_v21 = vmul.f32 1.442695, %v2949_v20 }
0x112e   : > { %12282 = vpow2.f32 %v2950_v21 }
0x1138   : > { %v12283_v22 = vpop.eup %12282 }
0x1139   : > { %v2952_v24 = vsel %vm576_vm3, %v12283_v22, 0.0 }
0x113a   : > { %2953 = vadd.xlane.f32.xlu1 %v2952_v24 }
0x11c7   : > { %v2954_v25 = vpop.xlane.xlu1 %2953 }
0x11c8   : > { %12284 = vrcp.f32 %v2954_v25 }
0x11d2   : > { %v12285_v26 = vpop.eup %12284 }
0x11d3   : > { %v2956_v27 = vmul.f32 %v12285_v26, %v12283_v22 }
0x11d5   : > { %11676 = vmatmul.mubr.msk.f32.vlgmr.msra.gmra.mrb[32].mxu0 %vm576_vm3, %v2956_v27 }
0x11d6   : > { %11684 = vmatpush3.msk.msra.mxu0 %vm591_vm1, %v12844_v38  ;;  %11685 = vmatprep.mubr.msk.f32.mxu0 %vm12502_vm0, %v12501_v0 }
0x11d7   : > { %11693 = vmatprep.subr.mxu0 %v12501_v0 }
0x12a8   : > { %v3096_v29 = vpop.f32.mrb[32].mxu0 }
0x12a9   : > { %v11677_v30 = vpop.f32.mrb[33].mxu0  ;;  %11681 = vmatmul.mubr.msk.f32.vlgmr.msra.gmra.mrb[32].mxu1 %vm587_vm2, %v3096_v29 }
0x12aa   : > { %11689 = vmatpush3.msk.msra.mxu1 %vm591_vm1, %v12839_v37  ;;  %11690 = vmatprep.mubr.msk.f32.mxu1 %vm12502_vm0, %v12501_v0 }
0x12ab   : > { %11698 = vmatprep.subr.mxu1 %v12501_v0 }
0x137c   : > { %v3169_v32 = vpop.f32.mrb[32].mxu1 }
0x137d   : > { %v3170_v33 = vadd.f32 %v12855_v39, %v3169_v32  ;;  %v11682_v34 = vpop.f32.mrb[33].mxu1 }
0x137f   : > { %v3173_v35 = vmul.f32 0.1, %v3170_v33 }
0x1381   : > { %v3174_v36 = vadd.f32 %v3173_v35, %v2724_v55 }
0x1383   : > { %11686 = vmatmul.mubr.msk.f32.vlgmr.msra.gmra.mrb[34].mxu0 %vm587_vm2, %v3174_v36  ;;  %11691 = vmatmul.mubr.msk.f32.vlgmr.msra.gmra.mrb[34].mxu1 %vm587_vm2, %v3174_v36 }
0x1384   : > { %11694 = vmatpush3.xpose.msra.mxu0 %v12872_v45  ;;  %11699 = vmatpush3.xpose.msra.mxu1 %v12877_v46 }
0x1385   : > { %11695 = vmatprep.mubr.msk.f32.mxu0 %vm12502_vm0, %v12501_v0  ;;  %11700 = vmatprep.mubr.msk.f32.mxu1 %vm12502_vm0, %v12501_v0 }
0x1386   : > { %11703 = vmatprep.subr.mxu0 %v12501_v0  ;;  %11708 = vmatprep.subr.mxu1 %v12501_v0 }
0x1456   : > { %v3244_v40 = vpop.f32.mrb[34].mxu0  ;;  %v3315_v41 = vpop.f32.mrb[34].mxu1 }
0x1457   : > { %v3245_v42 = vadd.f32 %v12886_v47, %v3244_v40  ;;  %v3316_v43 = vadd.f32 %v12891_v48, %v3315_v41  ;;  %v11687_v44 = vpop.f32.mrb[35].mxu0  ;;  %v11692_v49 = vpop.f32.mrb[35].mxu1 }
0x1459   : > { %v3248_v50 = vmax.f32 %v3245_v42, 0.0  ;;  %v3319_v51 = vmax.f32 %v3316_v43, 0.0 }
0x145b   : > { %11696 = vmatmul.mubr.f32.vlgmr.msra.gmra.mrb[36].mxu0 %v3319_v51  ;;  %11701 = vmatmul.mubr.f32.vlgmr.msra.gmra.mrb[36].mxu1 %v3248_v50 }
0x145c   : > { %11704 = vmatpush3.msk.msra.mxu0 %vm591_vm1, %v12898_v57  ;;  %11705 = vmatprep.mubr.msk.f32.mxu0 %vm12502_vm0, %v12501_v0 }
0x145d   : > { %11713 = vmatprep.subr.mxu0 %v12501_v0  ;;  %11709 = vmatpush3.xpose.msra.mxu1 %v12929_v59 }
0x145e   : > { %11710 = vmatprep.mubr.msk.f32.mxu1 %vm12502_vm0, %v12501_v0  ;;  %11718 = vmatprep.subr.mxu1 %v12501_v0 }
0x145f   : > { %11706 = vmatmul.mubr.msk.f32.vlgmr.msra.gmra.mrb[38].mxu0 %vm587_vm2, %v3174_v36 }
0x1460   : > { %11714 = vmatpush3.msk.msra.mxu0 %vm591_vm1, %v12908_v58  ;;  %11715 = vmatprep.mubr.msk.f32.mxu0 %vm12502_vm0, %v12501_v0 }
0x1461   : > { %11723 = vmatprep.subr.mxu0 %v12501_v0 }
0x1463   : > { %11716 = vmatmul.mubr.msk.f32.vlgmr.msra.gmra.mrb[40].mxu0 %vm587_vm2, %v3174_v36 }
0x1464   : > { %11724 = vmatpush3.msk.msra.mxu0 %vm591_vm1, %v12775_v6  ;;  %11725 = vmatprep.mubr.msk.f32.mxu0 %vm12502_vm0, %v12501_v0 }
0x1465   : > { %11733 = vmatprep.subr.mxu0 %v12501_v0 }
0x152e   : > { %v3386_v52 = vpop.f32.mrb[36].mxu0  ;;  %v3456_v53 = vpop.f32.mrb[36].mxu1 }
0x152f   : > { %v3457_v54 = vadd.f32 %v3456_v53, %v3386_v52  ;;  %v11697_v55 = vpop.f32.mrb[37].mxu0  ;;  %v11702_v56 = vpop.f32.mrb[37].mxu1 }
0x1532   : > { %v3526_v60 = vpop.f32.mrb[38].mxu0 }
0x1533   : > { %v3527_v61 = vadd.f32 %v12936_v3, %v3526_v60  ;;  %v11707_v62 = vpop.f32.mrb[39].mxu0 }
0x1535   : > { %v3530_v63 = vmax.f32 %v3527_v61, 0.0 }
0x1536   : > { %v3668_v2 = vpop.f32.mrb[40].mxu0 }
0x1537   : > { %v3669_v4 = vadd.f32 %v12942_v10, %v3668_v2  ;;  %11711 = vmatmul.mubr.f32.vlgmr.msra.gmra.mrb[38].mxu1 %v3530_v63  ;;  %v11717_v5 = vpop.f32.mrb[41].mxu0 }
0x1538   : > { %11719 = vmatpush3.xpose.msra.mxu1 %v12947_v12  ;;  %11720 = vmatprep.mubr.msk.f32.mxu1 %vm12502_vm0, %v12501_v0 }
0x1539   : > { %v3672_v9 = vmax.f32 %v3669_v4, 0.0  ;;  %11728 = vmatprep.subr.mxu1 %v12501_v0 }
0x153b   : > { %11721 = vmatmul.mubr.f32.vlgmr.msra.gmra.mrb[40].mxu1 %v3672_v9 }
0x153c   : > { %11729 = vmatpush3.msk.msra.mxu1 %vm591_vm1, %v12769_v1  ;;  %11730 = vmatprep.mubr.msk.f32.mxu1 %vm12502_vm0, %v12501_v0 }
0x153d   : > { %11738 = vmatprep.subr.mxu1 %v12501_v0 }
0x160a   : > { %v3597_v11 = vpop.f32.mrb[38].mxu1 }
0x160b   : > { %v3601_v13 = vadd.f32 %v3597_v11, %v3457_v54  ;;  %v11712_v14 = vpop.f32.mrb[39].mxu1 }
0x160e   : > { %v3739_v16 = vpop.f32.mrb[40].mxu1 }
0x160f   : > { %v3743_v18 = vadd.f32 %v3739_v16, %v3601_v13  ;;  %v11722_v19 = vpop.f32.mrb[41].mxu1 }
0x1611   : > { %v3744_v20 = vadd.f32 %v12962_v23, %v3743_v18 }
0x1613   : > { %v3745_v21 = vmul.f32 0.1, %v3744_v20 }
0x1615   : > { %v3746_v22 = vadd.f32 %v3745_v21, %v3174_v36 }
0x1617   : > { %11726 = vmatmul.mubr.msk.f32.vlgmr.msra.gmra.mrb[42].mxu0 %vm587_vm2, %v3746_v22  ;;  %11731 = vmatmul.mubr.msk.f32.vlgmr.msra.gmra.mrb[42].mxu1 %vm587_vm2, %v3746_v22 }
0x1618   : > { %11739 = vmatpush3.msk.msra.mxu1 %vm591_vm1, %v12804_v15  ;;  %11740 = vmatprep.mubr.msk.f32.mxu1 %vm12502_vm0, %v12501_v0 }
0x1619   : > { %11735 = vmatprep.mubr.msk.f32.mxu0 %vm12502_vm0, %v12501_v0  ;;  %11748 = vmatprep.subr.mxu1 %v12501_v0 }
0x161b   : > { %11741 = vmatmul.mubr.msk.f32.vlgmr.msra.gmra.mrb[44].mxu1 %vm587_vm2, %v3746_v22 }
0x161c   : > { %11749 = vmatpush3.msk.msra.mxu1 %vm591_vm1, %v12824_v31  ;;  %11750 = vmatprep.mubr.msk.f32.mxu1 %vm12502_vm0, %v12501_v0 }
0x161d   : > { %11758 = vmatprep.subr.mxu1 %v12501_v0 }
0x16ea   : > { %v3816_v24 = vpop.f32.mrb[42].mxu0  ;;  %v3886_v25 = vpop.f32.mrb[42].mxu1 }
0x16eb   : > { %v3887_v26 = vadd.f32 %v12790_v7, %v3886_v25  ;;  %v11727_v27 = vpop.f32.mrb[43].mxu0  ;;  %v11732_v29 = vpop.f32.mrb[43].mxu1  ;;  %v3817_v30 = vadd.f32 %v12792_v8, %v3816_v24 }
0x16ed   : > { %11734 = vmatpush3.xpose.msk.msra.mxu0 %vm587_vm2, %v3887_v26 }
0x16ee   : > { %v4045_v32 = vpop.f32.mrb[44].mxu1  ;;  %11743 = vmatprep.subr.mxu0 %v12501_v0 }
0x16ef   : > { %v4046_v33 = vadd.f32 %v12818_v28, %v4045_v32  ;;  %v11742_v34 = vpop.f32.mrb[45].mxu1 }
0x16f0   : > { %11736 = vmatmul.mubr.msk.f32.vlgmr.msra.gmra.mrb[44].mxu0 %vm587_vm2, %v3817_v30 }
0x16f1   : > { %11744 = vmatpush3.msra.mxu0 %v4046_v33  ;;  %11745 = vmatprep.mubr.msk.f32.mxu0 %vm12502_vm0, %v12501_v0 }
0x16f2   : > { %11753 = vmatprep.subr.mxu0 %v12501_v0 }
0x17c3   : > { %v3962_v35 = vpop.f32.mrb[44].mxu0 }
0x17c4   : > { %v3966_v36 = vmul.f32 0.57735026, %v3962_v35  ;;  %v11737_v40 = vpop.f32.mrb[45].mxu0 }
0x17c6   : > { %v3967_v41 = vadd.f32 %v3966_v36, %v12813_v17 }
0x17c8   : > { %v3968_v42 = vsel %vm576_vm3, %v3967_v41, -inf }
0x17c9   : > { %3969 = vmax.xlane.f32.xlu0 %v3968_v42 }
0x1856   : > { %v3970_v43 = vpop.xlane.xlu0 %3969 }
0x1857   : > { %v3971_v44 = vsub.f32 %v3967_v41, %v3970_v43 }
0x1859   : > { %v3972_v49 = vmul.f32 1.442695, %v3971_v44 }
0x185b   : > { %12286 = vpow2.f32 %v3972_v49 }
0x1865   : > { %v12287_v50 = vpop.eup %12286 }
0x1866   : > { %v3974_v51 = vsel %vm576_vm3, %v12287_v50, 0.0 }
0x1867   : > { %3975 = vadd.xlane.f32.xlu1 %v3974_v51 }
0x18f4   : > { %v3976_v52 = vpop.xlane.xlu1 %3975 }
0x18f5   : > { %12288 = vrcp.f32 %v3976_v52 }
0x18ff   : > { %v12289_v53 = vpop.eup %12288 }
0x1900   : > { %v3978_v54 = vmul.f32 %v12289_v53, %v12287_v50 }
0x1902   : > { %11746 = vmatmul.mubr.msk.f32.vlgmr.msra.gmra.mrb[46].mxu0 %vm576_vm3, %v3978_v54 }
0x1903   : > { %11754 = vmatpush3.msk.msra.mxu0 %vm591_vm1, %v12844_v38  ;;  %11755 = vmatprep.mubr.msk.f32.mxu0 %vm12502_vm0, %v12501_v0 }
0x1904   : > { %11763 = vmatprep.subr.mxu0 %v12501_v0 }
0x19d5   : > { %v4118_v55 = vpop.f32.mrb[46].mxu0 }
0x19d6   : > { %v11747_v56 = vpop.f32.mrb[47].mxu0  ;;  %11751 = vmatmul.mubr.msk.f32.vlgmr.msra.gmra.mrb[46].mxu1 %vm587_vm2, %v4118_v55 }
0x19d7   : > { %11759 = vmatpush3.msk.msra.mxu1 %vm591_vm1, %v12839_v37  ;;  %11760 = vmatprep.mubr.msk.f32.mxu1 %vm12502_vm0, %v12501_v0 }
0x19d8   : > { %11768 = vmatprep.subr.mxu1 %v12501_v0 }
0x1aa9   : > { %v4191_v60 = vpop.f32.mrb[46].mxu1 }
0x1aaa   : > { %v4192_v61 = vadd.f32 %v12855_v39, %v4191_v60  ;;  %v11752_v62 = vpop.f32.mrb[47].mxu1 }
0x1aac   : > { %v4195_v63 = vmul.f32 0.1, %v4192_v61 }
0x1aae   : > { %v4196_v2 = vadd.f32 %v4195_v63, %v3746_v22 }
0x1ab0   : > { %11756 = vmatmul.mubr.msk.f32.vlgmr.msra.gmra.mrb[48].mxu0 %vm587_vm2, %v4196_v2  ;;  %11761 = vmatmul.mubr.msk.f32.vlgmr.msra.gmra.mrb[48].mxu1 %vm587_vm2, %v4196_v2 }
0x1ab1   : > { %11764 = vmatpush3.xpose.msra.mxu0 %v12872_v45  ;;  %11769 = vmatpush3.xpose.msra.mxu1 %v12877_v46 }
0x1ab2   : > { %11765 = vmatprep.mubr.msk.f32.mxu0 %vm12502_vm0, %v12501_v0  ;;  %11770 = vmatprep.mubr.msk.f32.mxu1 %vm12502_vm0, %v12501_v0 }
0x1ab3   : > { %11773 = vmatprep.subr.mxu0 %v12501_v0  ;;  %11778 = vmatprep.subr.mxu1 %v12501_v0 }
0x1b83   : > { %v4266_v4 = vpop.f32.mrb[48].mxu0  ;;  %v4337_v5 = vpop.f32.mrb[48].mxu1 }
0x1b84   : > { %v4267_v9 = vadd.f32 %v12886_v47, %v4266_v4  ;;  %v4338_v11 = vadd.f32 %v12891_v48, %v4337_v5  ;;  %v11757_v13 = vpop.f32.mrb[49].mxu0  ;;  %v11762_v14 = vpop.f32.mrb[49].mxu1 }
0x1b86   : > { %v4270_v16 = vmax.f32 %v4267_v9, 0.0  ;;  %v4341_v18 = vmax.f32 %v4338_v11, 0.0 }
0x1b88   : > { %11766 = vmatmul.mubr.f32.vlgmr.msra.gmra.mrb[50].mxu0 %v4341_v18  ;;  %11771 = vmatmul.mubr.f32.vlgmr.msra.gmra.mrb[50].mxu1 %v4270_v16 }
0x1b89   : > { %11774 = vmatpush3.msk.msra.mxu0 %vm591_vm1, %v12898_v57  ;;  %11775 = vmatprep.mubr.msk.f32.mxu0 %vm12502_vm0, %v12501_v0 }
0x1b8a   : > { %11783 = vmatprep.subr.mxu0 %v12501_v0  ;;  %11779 = vmatpush3.xpose.msra.mxu1 %v12929_v59 }
0x1b8b   : > { %11780 = vmatprep.mubr.msk.f32.mxu1 %vm12502_vm0, %v12501_v0  ;;  %11788 = vmatprep.subr.mxu1 %v12501_v0 }
0x1b8c   : > { %11776 = vmatmul.mubr.msk.f32.vlgmr.msra.gmra.mrb[52].mxu0 %vm587_vm2, %v4196_v2 }
0x1b8d   : > { %11784 = vmatpush3.msk.msra.mxu0 %vm591_vm1, %v12908_v58  ;;  %11785 = vmatprep.mubr.msk.f32.mxu0 %vm12502_vm0, %v12501_v0 }
0x1b8e   : > { %11793 = vmatprep.subr.mxu0 %v12501_v0 }
0x1b90   : > { %11786 = vmatmul.mubr.msk.f32.vlgmr.msra.gmra.mrb[54].mxu0 %vm587_vm2, %v4196_v2 }
0x1b91   : > { %11794 = vmatpush3.msk.msra.mxu0 %vm591_vm1, %v12775_v6  ;;  %11795 = vmatprep.mubr.msk.f32.mxu0 %vm12502_vm0, %v12501_v0 }
0x1b92   : > { %11803 = vmatprep.subr.mxu0 %v12501_v0 }
0x1c5b   : > { %v4408_v19 = vpop.f32.mrb[50].mxu0  ;;  %v4478_v20 = vpop.f32.mrb[50].mxu1 }
0x1c5c   : > { %v4479_v21 = vadd.f32 %v4478_v20, %v4408_v19  ;;  %v11767_v22 = vpop.f32.mrb[51].mxu0  ;;  %v11772_v24 = vpop.f32.mrb[51].mxu1 }
0x1c5f   : > { %v4548_v25 = vpop.f32.mrb[52].mxu0 }
0x1c60   : > { %v4549_v26 = vadd.f32 %v12936_v3, %v4548_v25  ;;  %v11777_v27 = vpop.f32.mrb[53].mxu0 }
0x1c62   : > { %v4552_v29 = vmax.f32 %v4549_v26, 0.0 }
0x1c63   : > { %v4690_v30 = vpop.f32.mrb[54].mxu0 }
0x1c64   : > { %v4691_v32 = vadd.f32 %v12942_v10, %v4690_v30  ;;  %11781 = vmatmul.mubr.f32.vlgmr.msra.gmra.mrb[52].mxu1 %v4552_v29  ;;  %v11787_v6 = vpop.f32.mrb[55].mxu0 }
0x1c65   : > { %11789 = vmatpush3.xpose.msra.mxu1 %v12947_v12  ;;  %11790 = vmatprep.mubr.msk.f32.mxu1 %vm12502_vm0, %v12501_v0 }
0x1c66   : > { %v4694_v33 = vmax.f32 %v4691_v32, 0.0  ;;  %11798 = vmatprep.subr.mxu1 %v12501_v0 }
0x1c68   : > { %11791 = vmatmul.mubr.f32.vlgmr.msra.gmra.mrb[54].mxu1 %v4694_v33 }
0x1c69   : > { %11799 = vmatpush3.msk.msra.mxu1 %vm591_vm1, %v12769_v1  ;;  %11800 = vmatprep.mubr.msk.f32.mxu1 %vm12502_vm0, %v12501_v0 }
0x1c6a   : > { %11808 = vmatprep.subr.mxu1 %v12501_v0 }
0x1d37   : > { %v4619_v34 = vpop.f32.mrb[52].mxu1 }
0x1d38   : > { %v4623_v35 = vadd.f32 %v4619_v34, %v4479_v21  ;;  %v11782_v36 = vpop.f32.mrb[53].mxu1 }
0x1d3b   : > { %v4761_v40 = vpop.f32.mrb[54].mxu1 }
0x1d3c   : > { %v4765_v41 = vadd.f32 %v4761_v40, %v4623_v35  ;;  %v11792_v42 = vpop.f32.mrb[55].mxu1 }
0x1d3e   : > { %v4766_v43 = vadd.f32 %v12962_v23, %v4765_v41 }
0x1d40   : > { %v4767_v44 = vmul.f32 0.1, %v4766_v43 }
0x1d42   : > { %v4768_v49 = vadd.f32 %v4767_v44, %v4196_v2 }
0x1d44   : > { %11796 = vmatmul.mubr.msk.f32.vlgmr.msra.gmra.mrb[56].mxu0 %vm587_vm2, %v4768_v49  ;;  %11801 = vmatmul.mubr.msk.f32.vlgmr.msra.gmra.mrb[56].mxu1 %vm587_vm2, %v4768_v49 }
0x1d45   : > { %11809 = vmatpush3.msk.msra.mxu1 %vm591_vm1, %v12804_v15  ;;  %11810 = vmatprep.mubr.msk.f32.mxu1 %vm12502_vm0, %v12501_v0 }
0x1d46   : > { %11805 = vmatprep.mubr.msk.f32.mxu0 %vm12502_vm0, %v12501_v0  ;;  %11818 = vmatprep.subr.mxu1 %v12501_v0 }
0x1d48   : > { %11811 = vmatmul.mubr.msk.f32.vlgmr.msra.gmra.mrb[58].mxu1 %vm587_vm2, %v4768_v49 }
0x1d49   : > { %11819 = vmatpush3.msk.msra.mxu1 %vm591_vm1, %v12824_v31  ;;  %11820 = vmatprep.mubr.msk.f32.mxu1 %vm12502_vm0, %v12501_v0 }
0x1d4a   : > { %11828 = vmatprep.subr.mxu1 %v12501_v0 }
0x1e17   : > { %v4838_v1 = vpop.f32.mrb[56].mxu0  ;;  %v4908_v15 = vpop.f32.mrb[56].mxu1 }
0x1e18   : > { %v4909_v50 = vadd.f32 %v12790_v7, %v4908_v15  ;;  %v11797_v51 = vpop.f32.mrb[57].mxu0  ;;  %v11802_v52 = vpop.f32.mrb[57].mxu1  ;;  %v4839_v53 = vadd.f32 %v12792_v8, %v4838_v1 }
0x1e1a   : > { %11804 = vmatpush3.xpose.msk.msra.mxu0 %vm587_vm2, %v4909_v50  ;;  %v13350_v50 = vld [vmem:[#allocation8] ss:$0 sm:$0xff] }
0x1e1b   : > { %v5067_v54 = vpop.f32.mrb[58].mxu1  ;;  %11813 = vmatprep.subr.mxu0 %v12501_v0 }
0x1e1c   : > { %v5068_v31 = vadd.f32 %v12818_v28, %v5067_v54  ;;  %v11812_v55 = vpop.f32.mrb[59].mxu1  ;;  %v13354_v54 = vld [vmem:[#allocation7] ss:$0 sm:$0xff] }
0x1e1d   : > { %11806 = vmatmul.mubr.msk.f32.vlgmr.msra.gmra.mrb[58].mxu0 %vm587_vm2, %v4839_v53 }
0x1e1e   : > { %11814 = vmatpush3.msra.mxu0 %v5068_v31  ;;  %11815 = vmatprep.mubr.msk.f32.mxu0 %vm12502_vm0, %v12501_v0 }
0x1e1f   : > { %11823 = vmatprep.subr.mxu0 %v12501_v0 }
0x1ef0   : > { %v4984_v7 = vpop.f32.mrb[58].mxu0 }
0x1ef1   : > { %v4988_v56 = vmul.f32 0.57735026, %v4984_v7  ;;  %v11807_v60 = vpop.f32.mrb[59].mxu0  ;;  %v13358_v7 = vld [vmem:[#allocation10] ss:$0 sm:$0xff] }
0x1ef3   : > { %v4989_v61 = vadd.f32 %v4988_v56, %v12813_v17 }
0x1ef5   : > { %v4990_v8 = vsel %vm576_vm3, %v4989_v61, -inf }
0x1ef6   : > { %4991 = vmax.xlane.f32.xlu0 %v4990_v8 }
0x1f83   : > { %v4992_v62 = vpop.xlane.xlu0 %4991 }
0x1f84   : > { %v4993_v63 = vsub.f32 %v4989_v61, %v4992_v62 }
0x1f86   : > { %v4994_v28 = vmul.f32 1.442695, %v4993_v63  ;;  %v13365_v63 = vld [vmem:[#allocation2] sm:$0xff] }
0x1f88   : > { %12290 = vpow2.f32 %v4994_v28 }
0x1f92   : > { %v12291_v2 = vpop.eup %12290 }
0x1f93   : > { %v4996_v4 = vsel %vm576_vm3, %v12291_v2, 0.0 }
0x1f94   : > { %4997 = vadd.xlane.f32.xlu1 %v4996_v4 }
0x2021   : > { %v4998_v5 = vpop.xlane.xlu1 %4997 }
0x2022   : > { %12292 = vrcp.f32 %v4998_v5 }
0x202c   : > { %v12293_v9 = vpop.eup %12292 }
0x202d   : > { %v5000_v11 = vmul.f32 %v12293_v9, %v12291_v2 }
0x202f   : > { %11816 = vmatmul.mubr.msk.f32.vlgmr.msra.gmra.mrb[60].mxu0 %vm576_vm3, %v5000_v11 }
0x2030   : > { %11824 = vmatpush3.msk.msra.mxu0 %vm591_vm1, %v12844_v38  ;;  %11825 = vmatprep.mubr.msk.f32.mxu0 %vm12502_vm0, %v12501_v0 }
0x2031   : > { %11833 = vmatprep.subr.mxu0 %v12501_v0 }
0x2102   : > { %v5140_v17 = vpop.f32.mrb[60].mxu0 }
0x2103   : > { %v11817_v13 = vpop.f32.mrb[61].mxu0  ;;  %11821 = vmatmul.mubr.msk.f32.vlgmr.msra.gmra.mrb[60].mxu1 %vm587_vm2, %v5140_v17 }
0x2104   : > { %11829 = vmatpush3.msk.msra.mxu1 %vm591_vm1, %v12839_v37  ;;  %11830 = vmatprep.mubr.msk.f32.mxu1 %vm12502_vm0, %v12501_v0 }
0x2105   : > { %11838 = vmatprep.subr.mxu1 %v12501_v0 }
0x21d6   : > { %v5213_v14 = vpop.f32.mrb[60].mxu1 }
0x21d7   : > { %v5214_v38 = vadd.f32 %v12855_v39, %v5213_v14  ;;  %v11822_v16 = vpop.f32.mrb[61].mxu1 }
0x21d8   : > { %v13374_v16 = vld [vmem:[%s13854_s11] sm:$0x7] }
0x21d9   : > { %v5217_v18 = vmul.f32 0.1, %v5214_v38 }
0x21db   : > { %v13261_v19 = vadd.f32 %v5217_v18, %v4768_v49  ;;  %v13329_v49 = vld [vmem:[%s13850_s7] sm:$0x7] }
0x21dd   : > { %11826 = vmatmul.mubr.msk.f32.vlgmr.msra.gmra.mrb[62].mxu0 %vm587_vm2, %v13261_v19  ;;  %11831 = vmatmul.mubr.msk.f32.vlgmr.msra.gmra.mrb[62].mxu1 %vm587_vm2, %v13261_v19 }
0x21de   : > { %11834 = vmatpush3.xpose.msra.mxu0 %v12872_v45  ;;  %11839 = vmatpush3.xpose.msra.mxu1 %v12877_v46 }
0x21df   : > { %11835 = vmatprep.mubr.msk.f32.mxu0 %vm12502_vm0, %v12501_v0  ;;  %11840 = vmatprep.mubr.msk.f32.mxu1 %vm12502_vm0, %v12501_v0 }
0x21e0   : > { %11843 = vmatprep.subr.mxu0 %v12501_v0  ;;  %11848 = vmatprep.subr.mxu1 %v12501_v0 }
0x22b0   : > { %v5288_v37 = vpop.f32.mrb[62].mxu0  ;;  %v5359_v39 = vpop.f32.mrb[62].mxu1 }
0x22b1   : > { %v5289_v20 = vadd.f32 %v12886_v47, %v5288_v37  ;;  %v5360_v21 = vadd.f32 %v12891_v48, %v5359_v39  ;;  %v11827_v22 = vpop.f32.mrb[63].mxu0  ;;  %v11832_v45 = vpop.f32.mrb[63].mxu1  ;;  %v13295_v47 = vld [vmem:[#allocation5] sm:$0x7]  ;;  %v13385_v37 = vld [vmem:[%s13854_s11 + $0x4] sm:$0x7] }
0x22b3   : > { %v5292_v24 = vmax.f32 %v5289_v20, 0.0  ;;  %v5363_v46 = vmax.f32 %v5360_v21, 0.0  ;;  %v13395_v20 = vld [vmem:[%s13853_s10] ss:$0 sm:$0xff] }
0x22b5   : > { %11836 = vmatmul.mubr.f32.vlgmr.msra.gmra.mrb[64].mxu0 %v5363_v46  ;;  %11841 = vmatmul.mubr.f32.vlgmr.msra.gmra.mrb[64].mxu1 %v5292_v24  ;;  %v13408_v46 = vld [vmem:[%s13856_s13 + $0x4] sm:$0x7] }
0x22b6   : > { %11844 = vmatpush3.msk.msra.mxu0 %vm591_vm1, %v12898_v57  ;;  %11845 = vmatprep.mubr.msk.f32.mxu0 %vm12502_vm0, %v12501_v0 }
0x22b7   : > { %11853 = vmatprep.subr.mxu0 %v12501_v0  ;;  %11849 = vmatpush3.xpose.msra.mxu1 %v12929_v59 }
0x22b8   : > { %11850 = vmatprep.mubr.msk.f32.mxu1 %vm12502_vm0, %v12501_v0  ;;  %11858 = vmatprep.subr.mxu1 %v12501_v0 }
0x22b9   : > { %11846 = vmatmul.mubr.msk.f32.vlgmr.msra.gmra.mrb[66].mxu0 %vm587_vm2, %v13261_v19 }
0x22ba   : > { %11854 = vmatpush3.msk.msra.mxu0 %vm591_vm1, %v12908_v58  ;;  %11855 = vmatprep.mubr.msk.f32.mxu0 %vm12502_vm0, %v12501_v0 }
0x22bb   : > { %11863 = vmatprep.subr.mxu0 %v12501_v0 }
0x22bd   : > { %11856 = vmatmul.mubr.msk.f32.vlgmr.msra.gmra.mrb[68].mxu0 %vm587_vm2, %v13261_v19 }
0x22be   : > { %11864 = vmatpush3.msk.msra.mxu0 %vm591_vm1, %v13295_v47  ;;  %11865 = vmatprep.mubr.msk.f32.mxu0 %vm12502_vm0, %v12501_v0 }
0x22bf   : > { %11873 = vmatprep.subr.mxu0 %v12501_v0 }
0x2388   : > { %v5430_v48 = vpop.f32.mrb[64].mxu0  ;;  %v5500_v57 = vpop.f32.mrb[64].mxu1 }
0x2389   : > { %v5501_v58 = vadd.f32 %v5500_v57, %v5430_v48  ;;  %v11837_v59 = vpop.f32.mrb[65].mxu0  ;;  %v11842_v25 = vpop.f32.mrb[65].mxu1  ;;  %v13414_v48 = vld [vmem:[%s13856_s13] sm:$0x7] }
0x238a   : > { %v13426_v59 = vld [vmem:[%s13855_s12] ss:$0 sm:$0xff] }
0x238c   : > { %v5570_v26 = vpop.f32.mrb[66].mxu0 }
0x238d   : > { %v5571_v27 = vadd.f32 %v12936_v3, %v5570_v26  ;;  %v11847_v29 = vpop.f32.mrb[67].mxu0  ;;  %v13311_v3 = vld [vmem:[%s13848_s5] sm:$0x7] }
0x238e   : > { %v13432_v26 = vld [vmem:[%s13855_s12 + $0x1] ss:$0 sm:$0xff] }
0x238f   : > { %v5574_v30 = vmax.f32 %v5571_v27, 0.0 }
0x2390   : > { %v5712_v32 = vpop.f32.mrb[68].mxu0 }
0x2391   : > { %v5713_v6 = vadd.f32 %v12942_v10, %v5712_v32  ;;  %11851 = vmatmul.mubr.f32.vlgmr.msra.gmra.mrb[66].mxu1 %v5574_v30  ;;  %v11857_v33 = vpop.f32.mrb[69].mxu0 }
0x2392   : > { %11859 = vmatpush3.xpose.msra.mxu1 %v12947_v12  ;;  %11860 = vmatprep.mubr.msk.f32.mxu1 %vm12502_vm0, %v12501_v0  ;;  %v13438_v33 = vld [vmem:[%s13854_s11 + $0x8] sm:$0x7] }
0x2393   : > { %v5716_v34 = vmax.f32 %v5713_v6, 0.0  ;;  %11868 = vmatprep.subr.mxu1 %v12501_v0 }
0x2395   : > { %11861 = vmatmul.mubr.f32.vlgmr.msra.gmra.mrb[68].mxu1 %v5716_v34  ;;  %v13448_v34 = vld [vmem:[%s13856_s13 + $0x8] sm:$0x7] }
0x2396   : > { %11869 = vmatpush3.msk.msra.mxu1 %vm591_vm1, %v13311_v3  ;;  %11870 = vmatprep.mubr.msk.f32.mxu1 %vm12502_vm0, %v12501_v0 }
0x2397   : > { %11878 = vmatprep.subr.mxu1 %v12501_v0 }
0x2464   : > { %v5641_v10 = vpop.f32.mrb[66].mxu1 }
0x2465   : > { %v5645_v12 = vadd.f32 %v5641_v10, %v5501_v58  ;;  %v11852_v35 = vpop.f32.mrb[67].mxu1  ;;  %v13459_v10 = vld [vmem:[%s13854_s11 + $0xc] sm:$0x7] }
0x2468   : > { %v5783_v36 = vpop.f32.mrb[68].mxu1 }
0x2469   : > { %v5787_v40 = vadd.f32 %v5783_v36, %v5645_v12  ;;  %v11862_v41 = vpop.f32.mrb[69].mxu1 }
0x246b   : > { %v5788_v42 = vadd.f32 %v12962_v23, %v5787_v40  ;;  %v13343_v23 = vld [vmem:[%s13852_s9] sm:$0x7] }
0x246d   : > { %v5789_v43 = vmul.f32 0.1, %v5788_v42 }
0x246f   : > { %v13320_v44 = vadd.f32 %v5789_v43, %v13261_v19  ;;  %v13476_v43 = vld [vmem:[%s13855_s12 + $0x2] ss:$0 sm:$0xff] }
0x2471   : > { %11866 = vmatmul.mubr.msk.f32.vlgmr.msra.gmra.mrb[70].mxu0 %vm587_vm2, %v13320_v44  ;;  %11871 = vmatmul.mubr.msk.f32.vlgmr.msra.gmra.mrb[70].mxu1 %vm587_vm2, %v13320_v44 }
0x2472   : > { %11879 = vmatpush3.msk.msra.mxu1 %vm591_vm1, %v13329_v49  ;;  %11880 = vmatprep.mubr.msk.f32.mxu1 %vm12502_vm0, %v12501_v0 }
0x2473   : > { %11875 = vmatprep.mubr.msk.f32.mxu0 %vm12502_vm0, %v12501_v0  ;;  %11888 = vmatprep.subr.mxu1 %v12501_v0 }
0x2475   : > { %11881 = vmatmul.mubr.msk.f32.vlgmr.msra.gmra.mrb[72].mxu1 %vm587_vm2, %v13320_v44 }
0x2476   : > { %11889 = vmatpush3.msk.msra.mxu1 %vm591_vm1, %v13343_v23  ;;  %11890 = vmatprep.mubr.msk.f32.mxu1 %vm12502_vm0, %v12501_v0 }
0x2477   : > { %11898 = vmatprep.subr.mxu1 %v12501_v0 }
0x2544   : > { %v5860_v1 = vpop.f32.mrb[70].mxu0  ;;  %v5930_v15 = vpop.f32.mrb[70].mxu1 }
0x2545   : > { %v5931_v51 = vadd.f32 %v13350_v50, %v5930_v15  ;;  %v11867_v52 = vpop.f32.mrb[71].mxu0  ;;  %v11872_v53 = vpop.f32.mrb[71].mxu1  ;;  %v5861_v31 = vadd.f32 %v13354_v54, %v5860_v1 }
0x2546   : > { %v13482_v52 = vld [vmem:[%s13855_s12 + $0x3] ss:$0 sm:$0xff] }
0x2547   : > { %11874 = vmatpush3.xpose.msk.msra.mxu0 %vm587_vm2, %v5931_v51 }
0x2548   : > { %v6089_v55 = vpop.f32.mrb[72].mxu1  ;;  %11883 = vmatprep.subr.mxu0 %v12501_v0 }
0x2549   : > { %v6090_v56 = vadd.f32 %v13358_v7, %v6089_v55  ;;  %v11882_v60 = vpop.f32.mrb[73].mxu1  ;;  %v13488_v55 = vld [vmem:[%s13856_s13 + $0xc] sm:$0x7] }
0x254a   : > { %11876 = vmatmul.mubr.msk.f32.vlgmr.msra.gmra.mrb[72].mxu0 %vm587_vm2, %v5861_v31 }
0x254b   : > { %11884 = vmatpush3.msra.mxu0 %v6090_v56  ;;  %11885 = vmatprep.mubr.msk.f32.mxu0 %vm12502_vm0, %v12501_v0 }
0x254c   : > { %11893 = vmatprep.subr.mxu0 %v12501_v0 }
0x261d   : > { %v6006_v61 = vpop.f32.mrb[72].mxu0 }
0x261e   : > { %v6010_v8 = vmul.f32 0.57735026, %v6006_v61  ;;  %v11877_v62 = vpop.f32.mrb[73].mxu0 }
0x2620   : > { %v6011_v28 = vadd.f32 %v13365_v63, %v6010_v8 }
0x2622   : > { %v6012_v2 = vsel %vm576_vm3, %v6011_v28, -inf }
0x2623   : > { %6013 = vmax.xlane.f32.xlu0 %v6012_v2 }
0x26b0   : > { %v6014_v4 = vpop.xlane.xlu0 %6013 }
0x26b1   : > { %v6015_v5 = vsub.f32 %v6011_v28, %v6014_v4  ;;  %v13502_v4 = vld [vmem:[%s13876_s26] ss:$0 sm:$0xff] }
0x26b3   : > { %v6016_v9 = vmul.f32 1.442695, %v6015_v5 }
0x26b5   : > { %12294 = vpow2.f32 %v6016_v9 }
0x26bf   : > { %v12295_v11 = vpop.eup %12294 }
0x26c0   : > { %v6018_v17 = vsel %vm576_vm3, %v12295_v11, 0.0 }
0x26c1   : > { %6019 = vadd.xlane.f32.xlu1 %v6018_v17 }
0x274e   : > { %v6020_v13 = vpop.xlane.xlu1 %6019 }
0x274f   : > { %12296 = vrcp.f32 %v6020_v13 }
0x2759   : > { %v12297_v14 = vpop.eup %12296 }
0x275a   : > { %v6022_v38 = vmul.f32 %v12297_v14, %v12295_v11 }
0x275c   : > { %11886 = vmatmul.mubr.msk.f32.vlgmr.msra.gmra.mrb[74].mxu0 %vm576_vm3, %v6022_v38 }
0x275d   : > { %11894 = vmatpush3.msk.msra.mxu0 %vm591_vm1, %v13374_v16  ;;  %11895 = vmatprep.mubr.msk.f32.mxu0 %vm12502_vm0, %v12501_v0 }
0x275e   : > { %11903 = vmatprep.subr.mxu0 %v12501_v0 }
0x282f   : > { %v6162_v18 = vpop.f32.mrb[74].mxu0 }
0x2830   : > { %v11887_v19 = vpop.f32.mrb[75].mxu0  ;;  %11891 = vmatmul.mubr.msk.f32.vlgmr.msra.gmra.mrb[74].mxu1 %vm587_vm2, %v6162_v18 }
0x2831   : > { %11899 = vmatpush3.msk.msra.mxu1 %vm591_vm1, %v13385_v37  ;;  %11900 = vmatprep.mubr.msk.f32.mxu1 %vm12502_vm0, %v12501_v0 }
0x2832   : > { %11908 = vmatprep.subr.mxu1 %v12501_v0 }
0x2903   : > { %v6235_v39 = vpop.f32.mrb[74].mxu1 }
0x2904   : > { %v6236_v21 = vadd.f32 %v13395_v20, %v6235_v39  ;;  %v11892_v22 = vpop.f32.mrb[75].mxu1 }
0x2906   : > { %v6239_v45 = vmul.f32 0.1, %v6236_v21 }
0x2908   : > { %v13399_v24 = vadd.f32 %v6239_v45, %v13320_v44 }
0x290a   : > { %11896 = vmatmul.mubr.msk.f32.vlgmr.msra.gmra.mrb[76].mxu0 %vm587_vm2, %v13399_v24  ;;  %11901 = vmatmul.mubr.msk.f32.vlgmr.msra.gmra.mrb[76].mxu1 %vm587_vm2, %v13399_v24 }
0x290b   : > { %11904 = vmatpush3.xpose.msra.mxu0 %v13408_v46  ;;  %11909 = vmatpush3.xpose.msra.mxu1 %v13414_v48 }
0x290c   : > { %11905 = vmatprep.mubr.msk.f32.mxu0 %vm12502_vm0, %v12501_v0  ;;  %11910 = vmatprep.mubr.msk.f32.mxu1 %vm12502_vm0, %v12501_v0 }
0x290d   : > { %11913 = vmatprep.subr.mxu0 %v12501_v0  ;;  %11918 = vmatprep.subr.mxu1 %v12501_v0 }
0x29dd   : > { %v6310_v57 = vpop.f32.mrb[76].mxu0  ;;  %v6381_v58 = vpop.f32.mrb[76].mxu1 }
0x29de   : > { %v6311_v25 = vadd.f32 %v13426_v59, %v6310_v57  ;;  %v6382_v27 = vadd.f32 %v13432_v26, %v6381_v58  ;;  %v11897_v29 = vpop.f32.mrb[77].mxu0  ;;  %v11902_v30 = vpop.f32.mrb[77].mxu1 }
0x29e0   : > { %v6314_v32 = vmax.f32 %v6311_v25, 0.0  ;;  %v6385_v6 = vmax.f32 %v6382_v27, 0.0 }
0x29e2   : > { %11906 = vmatmul.mubr.f32.vlgmr.msra.gmra.mrb[78].mxu0 %v6385_v6  ;;  %11911 = vmatmul.mubr.f32.vlgmr.msra.gmra.mrb[78].mxu1 %v6314_v32 }
0x29e3   : > { %11914 = vmatpush3.msk.msra.mxu0 %vm591_vm1, %v13438_v33  ;;  %11915 = vmatprep.mubr.msk.f32.mxu0 %vm12502_vm0, %v12501_v0 }
0x29e4   : > { %11923 = vmatprep.subr.mxu0 %v12501_v0  ;;  %11919 = vmatpush3.xpose.msra.mxu1 %v13448_v34 }
0x29e5   : > { %11920 = vmatprep.mubr.msk.f32.mxu1 %vm12502_vm0, %v12501_v0  ;;  %11928 = vmatprep.subr.mxu1 %v12501_v0 }
0x29e6   : > { %11916 = vmatmul.mubr.msk.f32.vlgmr.msra.gmra.mrb[80].mxu0 %vm587_vm2, %v13399_v24 }
0x29e7   : > { %11924 = vmatpush3.msk.msra.mxu0 %vm591_vm1, %v13459_v10  ;;  %11925 = vmatprep.mubr.msk.f32.mxu0 %vm12502_vm0, %v12501_v0 }
0x29e8   : > { %11933 = vmatprep.subr.mxu0 %v12501_v0 }
0x29ea   : > { %11926 = vmatmul.mubr.msk.f32.vlgmr.msra.gmra.mrb[82].mxu0 %vm587_vm2, %v13399_v24 }
0x29eb   : > { %11934 = vmatpush3.msk.msra.mxu0 %vm591_vm1, %v13295_v47  ;;  %11935 = vmatprep.mubr.msk.f32.mxu0 %vm12502_vm0, %v12501_v0 }
0x29ec   : > { %11943 = vmatprep.subr.mxu0 %v12501_v0 }
0x2ab5   : > { %v6452_v12 = vpop.f32.mrb[78].mxu0  ;;  %v6522_v35 = vpop.f32.mrb[78].mxu1 }
0x2ab6   : > { %v6523_v36 = vadd.f32 %v6522_v35, %v6452_v12  ;;  %v11907_v40 = vpop.f32.mrb[79].mxu0  ;;  %v11912_v41 = vpop.f32.mrb[79].mxu1 }
0x2ab9   : > { %v6592_v42 = vpop.f32.mrb[80].mxu0 }
0x2aba   : > { %v6593_v44 = vadd.f32 %v13476_v43, %v6592_v42  ;;  %v11917_v1 = vpop.f32.mrb[81].mxu0 }
0x2abc   : > { %v6596_v15 = vmax.f32 %v6593_v44, 0.0 }
0x2abd   : > { %v6734_v51 = vpop.f32.mrb[82].mxu0 }
0x2abe   : > { %v6735_v53 = vadd.f32 %v13482_v52, %v6734_v51  ;;  %11921 = vmatmul.mubr.f32.vlgmr.msra.gmra.mrb[80].mxu1 %v6596_v15  ;;  %v11927_v31 = vpop.f32.mrb[83].mxu0 }
0x2abf   : > { %11929 = vmatpush3.xpose.msra.mxu1 %v13488_v55  ;;  %11930 = vmatprep.mubr.msk.f32.mxu1 %vm12502_vm0, %v12501_v0 }
0x2ac0   : > { %v6738_v56 = vmax.f32 %v6735_v53, 0.0  ;;  %11938 = vmatprep.subr.mxu1 %v12501_v0 }
0x2ac2   : > { %11931 = vmatmul.mubr.f32.vlgmr.msra.gmra.mrb[82].mxu1 %v6738_v56 }
0x2ac3   : > { %11939 = vmatpush3.msk.msra.mxu1 %vm591_vm1, %v13311_v3  ;;  %11940 = vmatprep.mubr.msk.f32.mxu1 %vm12502_vm0, %v12501_v0 }
0x2ac4   : > { %11948 = vmatprep.subr.mxu1 %v12501_v0 }
0x2b91   : > { %v6663_v60 = vpop.f32.mrb[80].mxu1 }
0x2b92   : > { %v6667_v61 = vadd.f32 %v6663_v60, %v6523_v36  ;;  %v11922_v8 = vpop.f32.mrb[81].mxu1 }
0x2b95   : > { %v6805_v62 = vpop.f32.mrb[82].mxu1 }
0x2b96   : > { %v6809_v28 = vadd.f32 %v6805_v62, %v6667_v61  ;;  %v11932_v2 = vpop.f32.mrb[83].mxu1 }
0x2b98   : > { %v6810_v5 = vadd.f32 %v13502_v4, %v6809_v28 }
0x2b9a   : > { %v6811_v9 = vmul.f32 0.1, %v6810_v5 }
0x2b9c   : > { %v6812_v11 = vadd.f32 %v6811_v9, %v13399_v24 }
0x2b9e   : > { %11936 = vmatmul.mubr.msk.f32.vlgmr.msra.gmra.mrb[84].mxu0 %vm587_vm2, %v6812_v11  ;;  %11941 = vmatmul.mubr.msk.f32.vlgmr.msra.gmra.mrb[84].mxu1 %vm587_vm2, %v6812_v11 }
0x2b9f   : > { %11949 = vmatpush3.msk.msra.mxu1 %vm591_vm1, %v13329_v49  ;;  %11950 = vmatprep.mubr.msk.f32.mxu1 %vm12502_vm0, %v12501_v0 }
0x2ba0   : > { %11945 = vmatprep.mubr.msk.f32.mxu0 %vm12502_vm0, %v12501_v0  ;;  %11958 = vmatprep.subr.mxu1 %v12501_v0 }
0x2ba2   : > { %11951 = vmatmul.mubr.msk.f32.vlgmr.msra.gmra.mrb[86].mxu1 %vm587_vm2, %v6812_v11 }
0x2ba3   : > { %11959 = vmatpush3.msk.msra.mxu1 %vm591_vm1, %v13343_v23  ;;  %11960 = vmatprep.mubr.msk.f32.mxu1 %vm12502_vm0, %v12501_v0 }
0x2ba4   : > { %11968 = vmatprep.subr.mxu1 %v12501_v0 }
0x2c71   : > { %v6882_v17 = vpop.f32.mrb[84].mxu0  ;;  %v6952_v13 = vpop.f32.mrb[84].mxu1 }
0x2c72   : > { %v6953_v14 = vadd.f32 %v13350_v50, %v6952_v13  ;;  %v11937_v38 = vpop.f32.mrb[85].mxu0  ;;  %v11942_v18 = vpop.f32.mrb[85].mxu1  ;;  %v6883_v19 = vadd.f32 %v13354_v54, %v6882_v17 }
0x2c74   : > { %11944 = vmatpush3.xpose.msk.msra.mxu0 %vm587_vm2, %v6953_v14 }
0x2c75   : > { %v7111_v39 = vpop.f32.mrb[86].mxu1  ;;  %11953 = vmatprep.subr.mxu0 %v12501_v0 }
0x2c76   : > { %v7112_v21 = vadd.f32 %v13358_v7, %v7111_v39  ;;  %v11952_v22 = vpop.f32.mrb[87].mxu1 }
0x2c77   : > { %11946 = vmatmul.mubr.msk.f32.vlgmr.msra.gmra.mrb[86].mxu0 %vm587_vm2, %v6883_v19 }
0x2c78   : > { %11954 = vmatpush3.msra.mxu0 %v7112_v21  ;;  %11955 = vmatprep.mubr.msk.f32.mxu0 %vm12502_vm0, %v12501_v0 }
0x2c79   : > { %11963 = vmatprep.subr.mxu0 %v12501_v0 }
0x2d4a   : > { %v7028_v45 = vpop.f32.mrb[86].mxu0 }
0x2d4b   : > { %v7032_v24 = vmul.f32 0.57735026, %v7028_v45  ;;  %v11947_v57 = vpop.f32.mrb[87].mxu0 }
0x2d4d   : > { %v7033_v58 = vadd.f32 %v13365_v63, %v7032_v24 }
0x2d4f   : > { %v7034_v25 = vsel %vm576_vm3, %v7033_v58, -inf }
0x2d50   : > { %7035 = vmax.xlane.f32.xlu0 %v7034_v25 }
0x2ddd   : > { %v7036_v27 = vpop.xlane.xlu0 %7035 }
0x2dde   : > { %v7037_v29 = vsub.f32 %v7033_v58, %v7036_v27 }
0x2de0   : > { %v7038_v30 = vmul.f32 1.442695, %v7037_v29 }
0x2de2   : > { %12298 = vpow2.f32 %v7038_v30 }
0x2dec   : > { %v12299_v32 = vpop.eup %12298 }
0x2ded   : > { %v7040_v6 = vsel %vm576_vm3, %v12299_v32, 0.0 }
0x2dee   : > { %7041 = vadd.xlane.f32.xlu1 %v7040_v6 }
0x2e7b   : > { %v7042_v12 = vpop.xlane.xlu1 %7041 }
0x2e7c   : > { %12300 = vrcp.f32 %v7042_v12 }
0x2e86   : > { %v12301_v35 = vpop.eup %12300 }
0x2e87   : > { %v7044_v36 = vmul.f32 %v12301_v35, %v12299_v32 }
0x2e89   : > { %11956 = vmatmul.mubr.msk.f32.vlgmr.msra.gmra.mrb[88].mxu0 %vm576_vm3, %v7044_v36 }
0x2e8a   : > { %11964 = vmatpush3.msk.msra.mxu0 %vm591_vm1, %v13374_v16  ;;  %11965 = vmatprep.mubr.msk.f32.mxu0 %vm12502_vm0, %v12501_v0 }
0x2e8b   : > { %11973 = vmatprep.subr.mxu0 %v12501_v0 }
0x2f5c   : > { %v7184_v40 = vpop.f32.mrb[88].mxu0 }
0x2f5d   : > { %v11957_v41 = vpop.f32.mrb[89].mxu0  ;;  %11961 = vmatmul.mubr.msk.f32.vlgmr.msra.gmra.mrb[88].mxu1 %vm587_vm2, %v7184_v40 }
0x2f5e   : > { %11969 = vmatpush3.msk.msra.mxu1 %vm591_vm1, %v13385_v37  ;;  %11970 = vmatprep.mubr.msk.f32.mxu1 %vm12502_vm0, %v12501_v0 }
0x2f5f   : > { %11978 = vmatprep.subr.mxu1 %v12501_v0 }
0x3030   : > { %v7257_v42 = vpop.f32.mrb[88].mxu1 }
0x3031   : > { %v7258_v44 = vadd.f32 %v13395_v20, %v7257_v42  ;;  %v11962_v1 = vpop.f32.mrb[89].mxu1 }
0x3033   : > { %v7261_v15 = vmul.f32 0.1, %v7258_v44 }
0x3035   : > { %v7262_v51 = vadd.f32 %v7261_v15, %v6812_v11 }
0x3037   : > { %11966 = vmatmul.mubr.msk.f32.vlgmr.msra.gmra.mrb[90].mxu0 %vm587_vm2, %v7262_v51  ;;  %11971 = vmatmul.mubr.msk.f32.vlgmr.msra.gmra.mrb[90].mxu1 %vm587_vm2, %v7262_v51 }
0x3038   : > { %11974 = vmatpush3.xpose.msra.mxu0 %v13408_v46  ;;  %11979 = vmatpush3.xpose.msra.mxu1 %v13414_v48 }
0x3039   : > { %11975 = vmatprep.mubr.msk.f32.mxu0 %vm12502_vm0, %v12501_v0  ;;  %11980 = vmatprep.mubr.msk.f32.mxu1 %vm12502_vm0, %v12501_v0 }
0x303a   : > { %11983 = vmatprep.subr.mxu0 %v12501_v0  ;;  %11988 = vmatprep.subr.mxu1 %v12501_v0 }
0x310a   : > { %v7332_v53 = vpop.f32.mrb[90].mxu0  ;;  %v7403_v31 = vpop.f32.mrb[90].mxu1 }
0x310b   : > { %v7333_v56 = vadd.f32 %v13426_v59, %v7332_v53  ;;  %v7404_v60 = vadd.f32 %v13432_v26, %v7403_v31  ;;  %v11967_v61 = vpop.f32.mrb[91].mxu0  ;;  %v11972_v8 = vpop.f32.mrb[91].mxu1 }
0x310d   : > { %v7336_v62 = vmax.f32 %v7333_v56, 0.0  ;;  %v7407_v28 = vmax.f32 %v7404_v60, 0.0 }
0x310f   : > { %11976 = vmatmul.mubr.f32.vlgmr.msra.gmra.mrb[92].mxu0 %v7407_v28  ;;  %11981 = vmatmul.mubr.f32.vlgmr.msra.gmra.mrb[92].mxu1 %v7336_v62 }
0x3110   : > { %11984 = vmatpush3.msk.msra.mxu0 %vm591_vm1, %v13438_v33  ;;  %11985 = vmatprep.mubr.msk.f32.mxu0 %vm12502_vm0, %v12501_v0 }
0x3111   : > { %11993 = vmatprep.subr.mxu0 %v12501_v0  ;;  %11989 = vmatpush3.xpose.msra.mxu1 %v13448_v34 }
0x3112   : > { %11990 = vmatprep.mubr.msk.f32.mxu1 %vm12502_vm0, %v12501_v0  ;;  %11998 = vmatprep.subr.mxu1 %v12501_v0 }
0x3113   : > { %11986 = vmatmul.mubr.msk.f32.vlgmr.msra.gmra.mrb[94].mxu0 %vm587_vm2, %v7262_v51 }
0x3114   : > { %11994 = vmatpush3.msk.msra.mxu0 %vm591_vm1, %v13459_v10  ;;  %11995 = vmatprep.mubr.msk.f32.mxu0 %vm12502_vm0, %v12501_v0 }
0x3115   : > { %12003 = vmatprep.subr.mxu0 %v12501_v0 }
0x3117   : > { %11996 = vmatmul.mubr.msk.f32.vlgmr.msra.gmra.mrb[96].mxu0 %vm587_vm2, %v7262_v51 }
0x3118   : > { %12004 = vmatpush3.msk.msra.mxu0 %vm591_vm1, %v13295_v47  ;;  %12005 = vmatprep.mubr.msk.f32.mxu0 %vm12502_vm0, %v12501_v0 }
0x3119   : > { %12013 = vmatprep.subr.mxu0 %v12501_v0 }
0x31e2   : > { %v7474_v2 = vpop.f32.mrb[92].mxu0  ;;  %v7544_v5 = vpop.f32.mrb[92].mxu1 }
0x31e3   : > { %v7545_v9 = vadd.f32 %v7544_v5, %v7474_v2  ;;  %v11977_v11 = vpop.f32.mrb[93].mxu0  ;;  %v11982_v17 = vpop.f32.mrb[93].mxu1 }
0x31e6   : > { %v7614_v13 = vpop.f32.mrb[94].mxu0 }
0x31e7   : > { %v7615_v14 = vadd.f32 %v13476_v43, %v7614_v13  ;;  %v11987_v38 = vpop.f32.mrb[95].mxu0 }
0x31e9   : > { %v7618_v18 = vmax.f32 %v7615_v14, 0.0 }
0x31ea   : > { %v7756_v19 = vpop.f32.mrb[96].mxu0 }
0x31eb   : > { %v7757_v39 = vadd.f32 %v13482_v52, %v7756_v19  ;;  %11991 = vmatmul.mubr.f32.vlgmr.msra.gmra.mrb[94].mxu1 %v7618_v18  ;;  %v11997_v21 = vpop.f32.mrb[97].mxu0 }
0x31ec   : > { %11999 = vmatpush3.xpose.msra.mxu1 %v13488_v55  ;;  %12000 = vmatprep.mubr.msk.f32.mxu1 %vm12502_vm0, %v12501_v0 }
0x31ed   : > { %v7760_v22 = vmax.f32 %v7757_v39, 0.0  ;;  %12008 = vmatprep.subr.mxu1 %v12501_v0 }
0x31ef   : > { %12001 = vmatmul.mubr.f32.vlgmr.msra.gmra.mrb[96].mxu1 %v7760_v22 }
0x31f0   : > { %12009 = vmatpush3.msk.msra.mxu1 %vm591_vm1, %v13311_v3  ;;  %12010 = vmatprep.mubr.msk.f32.mxu1 %vm12502_vm0, %v12501_v0 }
0x31f1   : > { %12018 = vmatprep.subr.mxu1 %v12501_v0 }
0x32be   : > { %v7685_v45 = vpop.f32.mrb[94].mxu1 }
0x32bf   : > { %v7689_v24 = vadd.f32 %v7685_v45, %v7545_v9  ;;  %v11992_v57 = vpop.f32.mrb[95].mxu1 }
0x32c2   : > { %v7827_v58 = vpop.f32.mrb[96].mxu1 }
0x32c3   : > { %v7831_v25 = vadd.f32 %v7827_v58, %v7689_v24  ;;  %v12002_v27 = vpop.f32.mrb[97].mxu1 }
0x32c5   : > { %v7832_v29 = vadd.f32 %v13502_v4, %v7831_v25 }
0x32c7   : > { %v7833_v30 = vmul.f32 0.1, %v7832_v29 }
0x32c9   : > { %v7834_v32 = vadd.f32 %v7833_v30, %v7262_v51 }
0x32cb   : > { %12006 = vmatmul.mubr.msk.f32.vlgmr.msra.gmra.mrb[98].mxu0 %vm587_vm2, %v7834_v32  ;;  %12011 = vmatmul.mubr.msk.f32.vlgmr.msra.gmra.mrb[98].mxu1 %vm587_vm2, %v7834_v32 }
0x32cc   : > { %12019 = vmatpush3.msk.msra.mxu1 %vm591_vm1, %v13329_v49  ;;  %12020 = vmatprep.mubr.msk.f32.mxu1 %vm12502_vm0, %v12501_v0 }
0x32cd   : > { %12015 = vmatprep.mubr.msk.f32.mxu0 %vm12502_vm0, %v12501_v0  ;;  %12028 = vmatprep.subr.mxu1 %v12501_v0 }
0x32cf   : > { %12021 = vmatmul.mubr.msk.f32.vlgmr.msra.gmra.mrb[100].mxu1 %vm587_vm2, %v7834_v32 }
0x32d0   : > { %12029 = vmatpush3.msk.msra.mxu1 %vm591_vm1, %v13343_v23  ;;  %12030 = vmatprep.mubr.msk.f32.mxu1 %vm12502_vm0, %v12501_v0 }
0x32d1   : > { %12038 = vmatprep.subr.mxu1 %v12501_v0 }
0x339e   : > { %v7904_v6 = vpop.f32.mrb[98].mxu0  ;;  %v7974_v12 = vpop.f32.mrb[98].mxu1 }
0x339f   : > { %v7975_v35 = vadd.f32 %v13350_v50, %v7974_v12  ;;  %v12007_v36 = vpop.f32.mrb[99].mxu0  ;;  %v12012_v40 = vpop.f32.mrb[99].mxu1  ;;  %v7905_v41 = vadd.f32 %v13354_v54, %v7904_v6 }
0x33a1   : > { %12014 = vmatpush3.xpose.msk.msra.mxu0 %vm587_vm2, %v7975_v35 }
0x33a2   : > { %v8133_v42 = vpop.f32.mrb[100].mxu1  ;;  %12023 = vmatprep.subr.mxu0 %v12501_v0 }
0x33a3   : > { %v8134_v44 = vadd.f32 %v13358_v7, %v8133_v42  ;;  %v12022_v1 = vpop.f32.mrb[101].mxu1 }
0x33a4   : > { %12016 = vmatmul.mubr.msk.f32.vlgmr.msra.gmra.mrb[100].mxu0 %vm587_vm2, %v7905_v41 }
0x33a5   : > { %12024 = vmatpush3.msra.mxu0 %v8134_v44  ;;  %12025 = vmatprep.mubr.msk.f32.mxu0 %vm12502_vm0, %v12501_v0 }
0x33a6   : > { %12033 = vmatprep.subr.mxu0 %v12501_v0 }
0x3477   : > { %v8050_v15 = vpop.f32.mrb[100].mxu0 }
0x3478   : > { %v8054_v51 = vmul.f32 0.57735026, %v8050_v15  ;;  %v12017_v53 = vpop.f32.mrb[101].mxu0 }
0x347a   : > { %v8055_v31 = vadd.f32 %v13365_v63, %v8054_v51 }
0x347c   : > { %v8056_v56 = vsel %vm576_vm3, %v8055_v31, -inf }
0x347d   : > { %8057 = vmax.xlane.f32.xlu0 %v8056_v56 }
0x350a   : > { %v8058_v60 = vpop.xlane.xlu0 %8057 }
0x350b   : > { %v8059_v61 = vsub.f32 %v8055_v31, %v8058_v60 }
0x350d   : > { %v8060_v8 = vmul.f32 1.442695, %v8059_v61 }
0x350f   : > { %12302 = vpow2.f32 %v8060_v8 }
0x3519   : > { %v12303_v62 = vpop.eup %12302 }
0x351a   : > { %v8062_v28 = vsel %vm576_vm3, %v12303_v62, 0.0 }
0x351b   : > { %8063 = vadd.xlane.f32.xlu1 %v8062_v28 }
0x35a8   : > { %v8064_v2 = vpop.xlane.xlu1 %8063 }
0x35a9   : > { %12304 = vrcp.f32 %v8064_v2 }
0x35b3   : > { %v12305_v5 = vpop.eup %12304 }
0x35b4   : > { %v8066_v9 = vmul.f32 %v12305_v5, %v12303_v62 }
0x35b6   : > { %12026 = vmatmul.mubr.msk.f32.vlgmr.msra.gmra.mrb[102].mxu0 %vm576_vm3, %v8066_v9 }
0x35b7   : > { %12034 = vmatpush3.msk.msra.mxu0 %vm591_vm1, %v13374_v16  ;;  %12035 = vmatprep.mubr.msk.f32.mxu0 %vm12502_vm0, %v12501_v0 }
0x35b8   : > { %12043 = vmatprep.subr.mxu0 %v12501_v0 }
0x3689   : > { %v8206_v11 = vpop.f32.mrb[102].mxu0 }
0x368a   : > { %v12027_v17 = vpop.f32.mrb[103].mxu0  ;;  %12031 = vmatmul.mubr.msk.f32.vlgmr.msra.gmra.mrb[102].mxu1 %vm587_vm2, %v8206_v11 }
0x368b   : > { %12039 = vmatpush3.msk.msra.mxu1 %vm591_vm1, %v13385_v37  ;;  %12040 = vmatprep.mubr.msk.f32.mxu1 %vm12502_vm0, %v12501_v0 }
0x368c   : > { %12048 = vmatprep.subr.mxu1 %v12501_v0 }
0x375d   : > { %v8279_v13 = vpop.f32.mrb[102].mxu1 }
0x375e   : > { %v8280_v14 = vadd.f32 %v13395_v20, %v8279_v13  ;;  %v12032_v38 = vpop.f32.mrb[103].mxu1 }
0x3760   : > { %v8283_v18 = vmul.f32 0.1, %v8280_v14 }
0x3762   : > { %v8284_v19 = vadd.f32 %v8283_v18, %v7834_v32 }
0x3764   : > { %12036 = vmatmul.mubr.msk.f32.vlgmr.msra.gmra.mrb[104].mxu0 %vm587_vm2, %v8284_v19  ;;  %12041 = vmatmul.mubr.msk.f32.vlgmr.msra.gmra.mrb[104].mxu1 %vm587_vm2, %v8284_v19 }
0x3765   : > { %12044 = vmatpush3.xpose.msra.mxu0 %v13408_v46  ;;  %12049 = vmatpush3.xpose.msra.mxu1 %v13414_v48 }
0x3766   : > { %12045 = vmatprep.mubr.msk.f32.mxu0 %vm12502_vm0, %v12501_v0  ;;  %12050 = vmatprep.mubr.msk.f32.mxu1 %vm12502_vm0, %v12501_v0 }
0x3767   : > { %12053 = vmatprep.subr.mxu0 %v12501_v0  ;;  %12058 = vmatprep.subr.mxu1 %v12501_v0 }
0x3837   : > { %v8354_v39 = vpop.f32.mrb[104].mxu0  ;;  %v8425_v21 = vpop.f32.mrb[104].mxu1 }
0x3838   : > { %v8355_v22 = vadd.f32 %v13426_v59, %v8354_v39  ;;  %v8426_v45 = vadd.f32 %v13432_v26, %v8425_v21  ;;  %v12037_v24 = vpop.f32.mrb[105].mxu0  ;;  %v12042_v57 = vpop.f32.mrb[105].mxu1 }
0x383a   : > { %v8358_v58 = vmax.f32 %v8355_v22, 0.0  ;;  %v8429_v25 = vmax.f32 %v8426_v45, 0.0 }
0x383c   : > { %12046 = vmatmul.mubr.f32.vlgmr.msra.gmra.mrb[106].mxu0 %v8429_v25  ;;  %12051 = vmatmul.mubr.f32.vlgmr.msra.gmra.mrb[106].mxu1 %v8358_v58 }
0x383d   : > { %12054 = vmatpush3.msk.msra.mxu0 %vm591_vm1, %v13438_v33  ;;  %12055 = vmatprep.mubr.msk.f32.mxu0 %vm12502_vm0, %v12501_v0 }
0x383e   : > { %12063 = vmatprep.subr.mxu0 %v12501_v0  ;;  %12059 = vmatpush3.xpose.msra.mxu1 %v13448_v34 }
0x383f   : > { %12060 = vmatprep.mubr.msk.f32.mxu1 %vm12502_vm0, %v12501_v0  ;;  %12068 = vmatprep.subr.mxu1 %v12501_v0 }
0x3840   : > { %12056 = vmatmul.mubr.msk.f32.vlgmr.msra.gmra.mrb[108].mxu0 %vm587_vm2, %v8284_v19 }
0x3841   : > { %12064 = vmatpush3.msk.msra.mxu0 %vm591_vm1, %v13459_v10  ;;  %12065 = vmatprep.mubr.msk.f32.mxu0 %vm12502_vm0, %v12501_v0 }
0x3842   : > { %12073 = vmatprep.subr.mxu0 %v12501_v0 }
0x3844   : > { %12066 = vmatmul.mubr.msk.f32.vlgmr.msra.gmra.mrb[110].mxu0 %vm587_vm2, %v8284_v19 }
0x3845   : > { %12074 = vmatpush3.msk.msra.mxu0 %vm591_vm1, %v13295_v47  ;;  %12075 = vmatprep.mubr.msk.f32.mxu0 %vm12502_vm0, %v12501_v0 }
0x3846   : > { %12083 = vmatprep.subr.mxu0 %v12501_v0 }
0x390f   : > { %v8496_v27 = vpop.f32.mrb[106].mxu0  ;;  %v8566_v29 = vpop.f32.mrb[106].mxu1 }
0x3910   : > { %v8567_v30 = vadd.f32 %v8566_v29, %v8496_v27  ;;  %v12047_v32 = vpop.f32.mrb[107].mxu0  ;;  %v12052_v6 = vpop.f32.mrb[107].mxu1 }
0x3913   : > { %v8636_v12 = vpop.f32.mrb[108].mxu0 }
0x3914   : > { %v8637_v35 = vadd.f32 %v13476_v43, %v8636_v12  ;;  %v12057_v36 = vpop.f32.mrb[109].mxu0 }
0x3916   : > { %v8640_v40 = vmax.f32 %v8637_v35, 0.0 }
0x3917   : > { %v8778_v41 = vpop.f32.mrb[110].mxu0 }
0x3918   : > { %v8779_v42 = vadd.f32 %v13482_v52, %v8778_v41  ;;  %12061 = vmatmul.mubr.f32.vlgmr.msra.gmra.mrb[108].mxu1 %v8640_v40  ;;  %v12067_v44 = vpop.f32.mrb[111].mxu0 }
0x3919   : > { %12069 = vmatpush3.xpose.msra.mxu1 %v13488_v55  ;;  %12070 = vmatprep.mubr.msk.f32.mxu1 %vm12502_vm0, %v12501_v0 }
0x391a   : > { %v8782_v1 = vmax.f32 %v8779_v42, 0.0  ;;  %12078 = vmatprep.subr.mxu1 %v12501_v0 }
0x391c   : > { %12071 = vmatmul.mubr.f32.vlgmr.msra.gmra.mrb[110].mxu1 %v8782_v1 }
0x391d   : > { %12079 = vmatpush3.msk.msra.mxu1 %vm591_vm1, %v13311_v3  ;;  %12080 = vmatprep.mubr.msk.f32.mxu1 %vm12502_vm0, %v12501_v0 }
0x391e   : > { %12088 = vmatprep.subr.mxu1 %v12501_v0 }
0x39eb   : > { %v8707_v15 = vpop.f32.mrb[108].mxu1 }
0x39ec   : > { %v8711_v51 = vadd.f32 %v8707_v15, %v8567_v30  ;;  %v12062_v53 = vpop.f32.mrb[109].mxu1 }
0x39ef   : > { %v8849_v31 = vpop.f32.mrb[110].mxu1 }
0x39f0   : > { %v8853_v56 = vadd.f32 %v8849_v31, %v8711_v51  ;;  %v12072_v60 = vpop.f32.mrb[111].mxu1 }
0x39f2   : > { %v8854_v61 = vadd.f32 %v13502_v4, %v8853_v56 }
0x39f4   : > { %v8855_v8 = vmul.f32 0.1, %v8854_v61 }
0x39f6   : > { %v8856_v62 = vadd.f32 %v8855_v8, %v8284_v19 }
0x39f8   : > { %12076 = vmatmul.mubr.msk.f32.vlgmr.msra.gmra.mrb[112].mxu0 %vm587_vm2, %v8856_v62  ;;  %12081 = vmatmul.mubr.msk.f32.vlgmr.msra.gmra.mrb[112].mxu1 %vm587_vm2, %v8856_v62 }
0x39f9   : > { %12089 = vmatpush3.msk.msra.mxu1 %vm591_vm1, %v13329_v49  ;;  %12090 = vmatprep.mubr.msk.f32.mxu1 %vm12502_vm0, %v12501_v0 }
0x39fa   : > { %12085 = vmatprep.mubr.msk.f32.mxu0 %vm12502_vm0, %v12501_v0  ;;  %12098 = vmatprep.subr.mxu1 %v12501_v0 }
0x39fc   : > { %12091 = vmatmul.mubr.msk.f32.vlgmr.msra.gmra.mrb[114].mxu1 %vm587_vm2, %v8856_v62 }
0x39fd   : > { %12099 = vmatpush3.msk.msra.mxu1 %vm591_vm1, %v13343_v23  ;;  %12100 = vmatprep.mubr.msk.f32.mxu1 %vm12502_vm0, %v12501_v0 }
0x39fe   : > { %12108 = vmatprep.subr.mxu1 %v12501_v0 }
0x3acb   : > { %v8926_v28 = vpop.f32.mrb[112].mxu0  ;;  %v8996_v2 = vpop.f32.mrb[112].mxu1 }
0x3acc   : > { %v8997_v5 = vadd.f32 %v13350_v50, %v8996_v2  ;;  %v12077_v9 = vpop.f32.mrb[113].mxu0  ;;  %v12082_v11 = vpop.f32.mrb[113].mxu1  ;;  %v8927_v17 = vadd.f32 %v13354_v54, %v8926_v28 }
0x3ace   : > { %12084 = vmatpush3.xpose.msk.msra.mxu0 %vm587_vm2, %v8997_v5 }
0x3acf   : > { %v9155_v13 = vpop.f32.mrb[114].mxu1  ;;  %12093 = vmatprep.subr.mxu0 %v12501_v0 }
0x3ad0   : > { %v9156_v14 = vadd.f32 %v13358_v7, %v9155_v13  ;;  %v12092_v38 = vpop.f32.mrb[115].mxu1 }
0x3ad1   : > { %12086 = vmatmul.mubr.msk.f32.vlgmr.msra.gmra.mrb[114].mxu0 %vm587_vm2, %v8927_v17 }
0x3ad2   : > { %12094 = vmatpush3.msra.mxu0 %v9156_v14  ;;  %12095 = vmatprep.mubr.msk.f32.mxu0 %vm12502_vm0, %v12501_v0 }
0x3ad3   : > { %12103 = vmatprep.subr.mxu0 %v12501_v0 }
0x3ba4   : > { %v9072_v18 = vpop.f32.mrb[114].mxu0 }
0x3ba5   : > { %v9076_v19 = vmul.f32 0.57735026, %v9072_v18  ;;  %v12087_v39 = vpop.f32.mrb[115].mxu0 }
0x3ba7   : > { %v9077_v21 = vadd.f32 %v13365_v63, %v9076_v19 }
0x3ba9   : > { %v9078_v22 = vsel %vm576_vm3, %v9077_v21, -inf }
0x3baa   : > { %9079 = vmax.xlane.f32.xlu0 %v9078_v22 }
0x3c37   : > { %v9080_v45 = vpop.xlane.xlu0 %9079 }
0x3c38   : > { %v9081_v24 = vsub.f32 %v9077_v21, %v9080_v45 }
0x3c3a   : > { %v9082_v57 = vmul.f32 1.442695, %v9081_v24 }
0x3c3c   : > { %12306 = vpow2.f32 %v9082_v57 }
0x3c46   : > { %v12307_v58 = vpop.eup %12306 }
0x3c47   : > { %v9084_v25 = vsel %vm576_vm3, %v12307_v58, 0.0 }
0x3c48   : > { %9085 = vadd.xlane.f32.xlu1 %v9084_v25 }
0x3cd5   : > { %v9086_v27 = vpop.xlane.xlu1 %9085 }
0x3cd6   : > { %12308 = vrcp.f32 %v9086_v27 }
0x3ce0   : > { %v12309_v29 = vpop.eup %12308 }
0x3ce1   : > { %v9088_v30 = vmul.f32 %v12309_v29, %v12307_v58 }
0x3ce3   : > { %12096 = vmatmul.mubr.msk.f32.vlgmr.msra.gmra.mrb[116].mxu0 %vm576_vm3, %v9088_v30 }
0x3ce4   : > { %12104 = vmatpush3.msk.msra.mxu0 %vm591_vm1, %v13374_v16  ;;  %12105 = vmatprep.mubr.msk.f32.mxu0 %vm12502_vm0, %v12501_v0 }
0x3ce5   : > { %12113 = vmatprep.subr.mxu0 %v12501_v0 }
0x3db6   : > { %v9228_v32 = vpop.f32.mrb[116].mxu0 }
0x3db7   : > { %v12097_v6 = vpop.f32.mrb[117].mxu0  ;;  %12101 = vmatmul.mubr.msk.f32.vlgmr.msra.gmra.mrb[116].mxu1 %vm587_vm2, %v9228_v32 }
0x3db8   : > { %12109 = vmatpush3.msk.msra.mxu1 %vm591_vm1, %v13385_v37  ;;  %12110 = vmatprep.mubr.msk.f32.mxu1 %vm12502_vm0, %v12501_v0 }
0x3db9   : > { %12118 = vmatprep.subr.mxu1 %v12501_v0 }
0x3e8a   : > { %v9301_v12 = vpop.f32.mrb[116].mxu1 }
0x3e8b   : > { %v9302_v35 = vadd.f32 %v13395_v20, %v9301_v12  ;;  %v12102_v36 = vpop.f32.mrb[117].mxu1 }
0x3e8d   : > { %v9305_v40 = vmul.f32 0.1, %v9302_v35 }
0x3e8f   : > { %v9306_v41 = vadd.f32 %v9305_v40, %v8856_v62 }
0x3e91   : > { %12106 = vmatmul.mubr.msk.f32.vlgmr.msra.gmra.mrb[118].mxu0 %vm587_vm2, %v9306_v41  ;;  %12111 = vmatmul.mubr.msk.f32.vlgmr.msra.gmra.mrb[118].mxu1 %vm587_vm2, %v9306_v41 }
0x3e92   : > { %12114 = vmatpush3.xpose.msra.mxu0 %v13408_v46  ;;  %12119 = vmatpush3.xpose.msra.mxu1 %v13414_v48 }
0x3e93   : > { %12115 = vmatprep.mubr.msk.f32.mxu0 %vm12502_vm0, %v12501_v0  ;;  %12120 = vmatprep.mubr.msk.f32.mxu1 %vm12502_vm0, %v12501_v0 }
0x3e94   : > { %12123 = vmatprep.subr.mxu0 %v12501_v0  ;;  %12128 = vmatprep.subr.mxu1 %v12501_v0 }
0x3f64   : > { %v9376_v42 = vpop.f32.mrb[118].mxu0  ;;  %v9447_v44 = vpop.f32.mrb[118].mxu1 }
0x3f65   : > { %v9377_v1 = vadd.f32 %v13426_v59, %v9376_v42  ;;  %v9448_v15 = vadd.f32 %v13432_v26, %v9447_v44  ;;  %v12107_v51 = vpop.f32.mrb[119].mxu0  ;;  %v12112_v53 = vpop.f32.mrb[119].mxu1 }
0x3f67   : > { %v9380_v31 = vmax.f32 %v9377_v1, 0.0  ;;  %v9451_v56 = vmax.f32 %v9448_v15, 0.0 }
0x3f69   : > { %12116 = vmatmul.mubr.f32.vlgmr.msra.gmra.mrb[120].mxu0 %v9451_v56  ;;  %12121 = vmatmul.mubr.f32.vlgmr.msra.gmra.mrb[120].mxu1 %v9380_v31 }
0x3f6a   : > { %12124 = vmatpush3.msk.msra.mxu0 %vm591_vm1, %v13438_v33  ;;  %12125 = vmatprep.mubr.msk.f32.mxu0 %vm12502_vm0, %v12501_v0 }
0x3f6b   : > { %12133 = vmatprep.subr.mxu0 %v12501_v0  ;;  %12129 = vmatpush3.xpose.msra.mxu1 %v13448_v34 }
0x3f6c   : > { %12130 = vmatprep.mubr.msk.f32.mxu1 %vm12502_vm0, %v12501_v0  ;;  %12138 = vmatprep.subr.mxu1 %v12501_v0 }
0x3f6d   : > { %12126 = vmatmul.mubr.msk.f32.vlgmr.msra.gmra.mrb[122].mxu0 %vm587_vm2, %v9306_v41 }
0x3f6e   : > { %12134 = vmatpush3.msk.msra.mxu0 %vm591_vm1, %v13459_v10  ;;  %12135 = vmatprep.mubr.msk.f32.mxu0 %vm12502_vm0, %v12501_v0 }
0x3f6f   : > { %12143 = vmatprep.subr.mxu0 %v12501_v0 }
0x3f71   : > { %12136 = vmatmul.mubr.msk.f32.vlgmr.msra.gmra.mrb[124].mxu0 %vm587_vm2, %v9306_v41 }
0x3f72   : > { %12144 = vmatpush3.msk.msra.mxu0 %vm591_vm1, %v13295_v47  ;;  %12145 = vmatprep.mubr.msk.f32.mxu0 %vm12502_vm0, %v12501_v0 }
0x3f73   : > { %12153 = vmatprep.subr.mxu0 %v12501_v0 }
0x403c   : > { %v9518_v60 = vpop.f32.mrb[120].mxu0  ;;  %v9588_v61 = vpop.f32.mrb[120].mxu1 }
0x403d   : > { %v9589_v8 = vadd.f32 %v9588_v61, %v9518_v60  ;;  %v12117_v62 = vpop.f32.mrb[121].mxu0  ;;  %v12122_v28 = vpop.f32.mrb[121].mxu1 }
0x4040   : > { %v9658_v2 = vpop.f32.mrb[122].mxu0 }
0x4041   : > { %v9659_v5 = vadd.f32 %v13476_v43, %v9658_v2  ;;  %v12127_v9 = vpop.f32.mrb[123].mxu0 }
0x4043   : > { %v9662_v11 = vmax.f32 %v9659_v5, 0.0 }
0x4044   : > { %v9800_v17 = vpop.f32.mrb[124].mxu0 }
0x4045   : > { %v9801_v13 = vadd.f32 %v13482_v52, %v9800_v17  ;;  %12131 = vmatmul.mubr.f32.vlgmr.msra.gmra.mrb[122].mxu1 %v9662_v11  ;;  %v12137_v47 = vpop.f32.mrb[125].mxu0 }
0x4046   : > { %12139 = vmatpush3.xpose.msra.mxu1 %v13488_v55  ;;  %12140 = vmatprep.mubr.msk.f32.mxu1 %vm12502_vm0, %v12501_v0 }
0x4047   : > { %v9804_v14 = vmax.f32 %v9801_v13, 0.0  ;;  %12148 = vmatprep.subr.mxu1 %v12501_v0 }
0x4049   : > { %12141 = vmatmul.mubr.f32.vlgmr.msra.gmra.mrb[124].mxu1 %v9804_v14 }
0x404a   : > { %12149 = vmatpush3.msk.msra.mxu1 %vm591_vm1, %v13311_v3  ;;  %12150 = vmatprep.mubr.msk.f32.mxu1 %vm12502_vm0, %v12501_v0 }
0x404b   : > { %12158 = vmatprep.subr.mxu1 %v12501_v0 }
0x4118   : > { %v9729_v38 = vpop.f32.mrb[122].mxu1 }
0x4119   : > { %v9733_v18 = vadd.f32 %v9729_v38, %v9589_v8  ;;  %v12132_v19 = vpop.f32.mrb[123].mxu1 }
0x411c   : > { %v9871_v39 = vpop.f32.mrb[124].mxu1 }
0x411d   : > { %v9875_v21 = vadd.f32 %v9871_v39, %v9733_v18  ;;  %v12142_v22 = vpop.f32.mrb[125].mxu1 }
0x411f   : > { %v9876_v45 = vadd.f32 %v13502_v4, %v9875_v21 }
0x4121   : > { %v9877_v24 = vmul.f32 0.1, %v9876_v45 }
0x4123   : > { %v9878_v57 = vadd.f32 %v9877_v24, %v9306_v41 }
0x4125   : > { %12146 = vmatmul.mubr.msk.f32.vlgmr.msra.gmra.mrb[126].mxu0 %vm587_vm2, %v9878_v57  ;;  %12151 = vmatmul.mubr.msk.f32.vlgmr.msra.gmra.mrb[126].mxu1 %vm587_vm2, %v9878_v57 }
0x4126   : > { %12159 = vmatpush3.msk.msra.mxu1 %vm591_vm1, %v13329_v49  ;;  %12160 = vmatprep.mubr.msk.f32.mxu1 %vm12502_vm0, %v12501_v0 }
0x4127   : > { %12155 = vmatprep.mubr.msk.f32.mxu0 %vm12502_vm0, %v12501_v0  ;;  %12168 = vmatprep.subr.mxu1 %v12501_v0 }
0x4129   : > { %12161 = vmatmul.mubr.msk.f32.vlgmr.msra.gmra.mrb[128].mxu1 %vm587_vm2, %v9878_v57 }
0x412a   : > { %12169 = vmatpush3.msk.msra.mxu1 %vm591_vm1, %v13343_v23  ;;  %12170 = vmatprep.mubr.msk.f32.mxu1 %vm12502_vm0, %v12501_v0 }
0x412b   : > { %12178 = vmatprep.subr.mxu1 %v12501_v0 }
0x41f8   : > { %v9948_v3 = vpop.f32.mrb[126].mxu0  ;;  %v10018_v49 = vpop.f32.mrb[126].mxu1 }
0x41f9   : > { %v10019_v58 = vadd.f32 %v13350_v50, %v10018_v49  ;;  %v12147_v25 = vpop.f32.mrb[127].mxu0  ;;  %v12152_v27 = vpop.f32.mrb[127].mxu1  ;;  %v9949_v29 = vadd.f32 %v13354_v54, %v9948_v3 }
0x41fb   : > { %12154 = vmatpush3.xpose.msk.msra.mxu0 %vm587_vm2, %v10019_v58 }
0x41fc   : > { %v10177_v30 = vpop.f32.mrb[128].mxu1  ;;  %12163 = vmatprep.subr.mxu0 %v12501_v0 }
0x41fd   : > { %v10178_v23 = vadd.f32 %v13358_v7, %v10177_v30  ;;  %v12162_v32 = vpop.f32.mrb[129].mxu1 }
0x41fe   : > { %12156 = vmatmul.mubr.msk.f32.vlgmr.msra.gmra.mrb[128].mxu0 %vm587_vm2, %v9949_v29 }
0x41ff   : > { %12164 = vmatpush3.msra.mxu0 %v10178_v23  ;;  %12165 = vmatprep.mubr.msk.f32.mxu0 %vm12502_vm0, %v12501_v0 }
0x4200   : > { %12173 = vmatprep.subr.mxu0 %v12501_v0 }
0x42d1   : > { %v10094_v50 = vpop.f32.mrb[128].mxu0 }
0x42d2   : > { %v10098_v6 = vmul.f32 0.57735026, %v10094_v50  ;;  %v12157_v12 = vpop.f32.mrb[129].mxu0 }
0x42d4   : > { %v10099_v35 = vadd.f32 %v13365_v63, %v10098_v6 }
0x42d6   : > { %v10100_v54 = vsel %vm576_vm3, %v10099_v35, -inf }
0x42d7   : > { %10101 = vmax.xlane.f32.xlu0 %v10100_v54 }
0x4364   : > { %v10102_v36 = vpop.xlane.xlu0 %10101 }
0x4365   : > { %v10103_v40 = vsub.f32 %v10099_v35, %v10102_v36 }
0x4367   : > { %v10104_v7 = vmul.f32 1.442695, %v10103_v40 }
0x4369   : > { %12310 = vpow2.f32 %v10104_v7 }
0x4373   : > { %v12311_v41 = vpop.eup %12310 }
0x4374   : > { %v10106_v42 = vsel %vm576_vm3, %v12311_v41, 0.0 }
0x4375   : > { %10107 = vadd.xlane.f32.xlu1 %v10106_v42 }
0x4402   : > { %v10108_v44 = vpop.xlane.xlu1 %10107 }
0x4403   : > { %12312 = vrcp.f32 %v10108_v44 }
0x440d   : > { %v12313_v1 = vpop.eup %12312 }
0x440e   : > { %v10110_v15 = vmul.f32 %v12313_v1, %v12311_v41 }
0x4410   : > { %12166 = vmatmul.mubr.msk.f32.vlgmr.msra.gmra.mrb[130].mxu0 %vm576_vm3, %v10110_v15 }
0x4411   : > { %12174 = vmatpush3.msk.msra.mxu0 %vm591_vm1, %v13374_v16  ;;  %12175 = vmatprep.mubr.msk.f32.mxu0 %vm12502_vm0, %v12501_v0 }
0x4412   : > { %12183 = vmatprep.subr.mxu0 %v12501_v0 }
0x44e3   : > { %v10250_v63 = vpop.f32.mrb[130].mxu0 }
0x44e4   : > { %v12167_v51 = vpop.f32.mrb[131].mxu0  ;;  %12171 = vmatmul.mubr.msk.f32.vlgmr.msra.gmra.mrb[130].mxu1 %vm587_vm2, %v10250_v63 }
0x44e5   : > { %12179 = vmatpush3.msk.msra.mxu1 %vm591_vm1, %v13385_v37  ;;  %12180 = vmatprep.mubr.msk.f32.mxu1 %vm12502_vm0, %v12501_v0 }
0x44e6   : > { %12188 = vmatprep.subr.mxu1 %v12501_v0 }
0x45b7   : > { %v10323_v53 = vpop.f32.mrb[130].mxu1 }
0x45b8   : > { %v10324_v16 = vadd.f32 %v13395_v20, %v10323_v53  ;;  %v12172_v31 = vpop.f32.mrb[131].mxu1 }
0x45ba   : > { %v10327_v56 = vmul.f32 0.1, %v10324_v16 }
0x45bc   : > { %v10328_v60 = vadd.f32 %v10327_v56, %v9878_v57 }
0x45be   : > { %12176 = vmatmul.mubr.msk.f32.vlgmr.msra.gmra.mrb[132].mxu0 %vm587_vm2, %v10328_v60  ;;  %12181 = vmatmul.mubr.msk.f32.vlgmr.msra.gmra.mrb[132].mxu1 %vm587_vm2, %v10328_v60 }
0x45bf   : > { %12184 = vmatpush3.xpose.msra.mxu0 %v13408_v46  ;;  %12189 = vmatpush3.xpose.msra.mxu1 %v13414_v48 }
0x45c0   : > { %12185 = vmatprep.mubr.msk.f32.mxu0 %vm12502_vm0, %v12501_v0  ;;  %12190 = vmatprep.mubr.msk.f32.mxu1 %vm12502_vm0, %v12501_v0 }
0x45c1   : > { %12193 = vmatprep.subr.mxu0 %v12501_v0  ;;  %12198 = vmatprep.subr.mxu1 %v12501_v0 }
0x4691   : > { %v10398_v37 = vpop.f32.mrb[132].mxu0  ;;  %v10469_v20 = vpop.f32.mrb[132].mxu1 }
0x4692   : > { %v10399_v61 = vadd.f32 %v13426_v59, %v10398_v37  ;;  %v10470_v8 = vadd.f32 %v13432_v26, %v10469_v20  ;;  %v12177_v62 = vpop.f32.mrb[133].mxu0  ;;  %v12182_v46 = vpop.f32.mrb[133].mxu1 }
0x4694   : > { %v10402_v28 = vmax.f32 %v10399_v61, 0.0  ;;  %v10473_v48 = vmax.f32 %v10470_v8, 0.0 }
0x4696   : > { %12186 = vmatmul.mubr.f32.vlgmr.msra.gmra.mrb[134].mxu0 %v10473_v48  ;;  %12191 = vmatmul.mubr.f32.vlgmr.msra.gmra.mrb[134].mxu1 %v10402_v28 }
0x4697   : > { %12194 = vmatpush3.msk.msra.mxu0 %vm591_vm1, %v13438_v33  ;;  %12195 = vmatprep.mubr.msk.f32.mxu0 %vm12502_vm0, %v12501_v0 }
0x4698   : > { %12203 = vmatprep.subr.mxu0 %v12501_v0  ;;  %12199 = vmatpush3.xpose.msra.mxu1 %v13448_v34 }
0x4699   : > { %12200 = vmatprep.mubr.msk.f32.mxu1 %vm12502_vm0, %v12501_v0  ;;  %12208 = vmatprep.subr.mxu1 %v12501_v0 }
0x469a   : > { %12196 = vmatmul.mubr.msk.f32.vlgmr.msra.gmra.mrb[136].mxu0 %vm587_vm2, %v10328_v60 }
0x469b   : > { %12204 = vmatpush3.msk.msra.mxu0 %vm591_vm1, %v13459_v10  ;;  %12205 = vmatprep.mubr.msk.f32.mxu0 %vm12502_vm0, %v12501_v0 }
0x469e   : > { %12206 = vmatmul.mubr.msk.f32.vlgmr.msra.gmra.mrb[138].mxu0 %vm587_vm2, %v10328_v60 }
0x4769   : > { %v10540_v59 = vpop.f32.mrb[134].mxu0  ;;  %v10610_v26 = vpop.f32.mrb[134].mxu1 }
0x476a   : > { %v10611_v33 = vadd.f32 %v10610_v26, %v10540_v59  ;;  %v12187_v2 = vpop.f32.mrb[135].mxu0  ;;  %v12192_v34 = vpop.f32.mrb[135].mxu1 }
0x476d   : > { %v10680_v5 = vpop.f32.mrb[136].mxu0 }
0x476e   : > { %v10681_v9 = vadd.f32 %v13476_v43, %v10680_v5  ;;  %v12197_v11 = vpop.f32.mrb[137].mxu0 }
0x4770   : > { %v10684_v17 = vmax.f32 %v10681_v9, 0.0 }
0x4771   : > { %v10822_v13 = vpop.f32.mrb[138].mxu0 }
0x4772   : > { %v10823_v47 = vadd.f32 %v13482_v52, %v10822_v13  ;;  %12201 = vmatmul.mubr.f32.vlgmr.msra.gmra.mrb[136].mxu1 %v10684_v17  ;;  %v12207_v10 = vpop.f32.mrb[139].mxu0 }
0x4773   : > { %12209 = vmatpush3.xpose.msra.mxu1 %v13488_v55  ;;  %12210 = vmatprep.mubr.msk.f32.mxu1 %vm12502_vm0, %v12501_v0 }
0x4774   : > { %v10826_v14 = vmax.f32 %v10823_v47, 0.0 }
0x4776   : > { %12211 = vmatmul.mubr.f32.vlgmr.msra.gmra.mrb[138].mxu1 %v10826_v14 }
0x4845   : > { %v10751_v38 = vpop.f32.mrb[136].mxu1 }
0x4846   : > { %v10755_v18 = vadd.f32 %v10751_v38, %v10611_v33  ;;  %v12202_v19 = vpop.f32.mrb[137].mxu1 }
0x4849   : > { %v10893_v39 = vpop.f32.mrb[138].mxu1 }
0x484a   : > { %v10897_v43 = vadd.f32 %v10893_v39, %v10755_v18  ;;  %v12212_v21 = vpop.f32.mrb[139].mxu1 }
0x484c   : > { %v10898_v22 = vadd.f32 %v13502_v4, %v10897_v43 }
0x484e   : > { %v10899_v45 = vmul.f32 0.1, %v10898_v22 }
0x4850   : > { %v10900_v52 = vadd.f32 %v10899_v45, %v10328_v60 }
0x4852   : > { %10901 = vst.msk [vmem:[%s566_s17] sm:$0xff] %vm587_vm2, %v10900_v52 }
0x4853 PF: > { %s13878_s19 = sld [smem:[#allocation14_spill]] }
0x4859   : > { %s28_s18 = sadd.s32 1, %s13878_s19  }
0x485a   : > { %p25_p9 = scmp.ge.s32.totalorder %s28_s18, 4  }
0x485c   :  { %27 = sbr.rel (!%p25_p9) target bundleno = 6 (0x6), region = 134 }
0x4863   :  { %10921 = vsyncpa [#allocation4], 1 }
0x4864   :  { %10923 = vsyncpa [#allocation4 + $0x1], 1 }
0x4865   :  { %10924 = vsyncpa [#allocation6], 1 }
0x4866   :  { %10925 = vsyncpa [#allocation9], 1 }

</bundles_post_ra>
